<compile_context>
chip_gen: v6e
topology: v6e:2x2x1
jax: 0.10.0
libtpu: 0.0.40
codegen_flags: <defaults>
</compile_context>

<pallas_src>
import jax
import jax.numpy as jnp
from jax.experimental import pallas as pl
from jax.experimental.pallas import tpu as pltpu  # noqa: F401  (kept for tuning hooks)

# ----------------------- config (small, deterministic) -----------------------
B = 2
L_PROT = 16
L_DNA = 12              # natural length (no structural padding -> correct mean pool)
PROT_DEMB = 32          # stand-in for ESM hidden size
DNA_DEMB = 48           # stand-in for nucleotide-transformer hidden size
D_EMB = 32              # cross_attentn_kwargs['d_embedding']
N_HEADS = 4
HEAD_DIM = D_EMB // N_HEADS
D_FF = 64
MLP_H1 = 32             # mlp l1: 2*D_EMB -> 32
MLP_H2 = 16             # mlp l2: 32 -> 16
N_OUT = 2               # mlp l3: 16 -> 2
PAD_IDX = 0
VOCAB = 24
NEG_INF = -1e9

# ----------------------- packed-slab row offsets ------------------------------
SLAB_COLS = 64
# per-xattn slab (208, 64): matrices then one 16-row vector region
XQ, XKV, XO, XF1, XF2 = 0, 32, 64, 96, 128
VBQ, VBKV, VBO, VBF1, VBF2, VG1, VBE1, VG2, VBE2 = 192, 193, 194, 195, 196, 197, 198, 199, 200
XATTN_ROWS = 208
# head slab (200, 64): reshape linears + split MLP W1 + W2 + W3 + vector region
HRPW, HRDW, HW1P, HW1D, HW2, HW3 = 0, 32, 80, 112, 144, 176
HRPB, HRDB, HB1, HB2, HB3 = 192, 193, 194, 195, 196
HEAD_ROWS = 200


# ------------------------------- kernel helpers --------------------------------
def _layernorm(x, g, b):
    inv_n = 1.0 / x.shape[-1]
    mu = jnp.sum(x, axis=-1, keepdims=True) * inv_n          # independent reductions
    ms = jnp.sum(x * x, axis=-1, keepdims=True) * inv_n
    var = ms - mu * mu
    return (x - mu) * jax.lax.rsqrt(var + 1e-5) * g + b


def _xattn_block(x_q, x_kv, bias, w_ref):
    """Masked MHA + residual/LN + FFN + residual/LN.  Weights are read from the
    packed slab ref at point of use; per-head contexts stay in registers."""
    # 1/sqrt(head_dim) already folded into the Q weights/bias at pack time.
    q = (jnp.dot(x_q, w_ref[XQ:XQ + D_EMB, :D_EMB], preferred_element_type=jnp.float32)
         + w_ref[VBQ:VBQ + 1, :D_EMB])                                   # (Lq, D)
    kv = (jnp.dot(x_kv, w_ref[XKV:XKV + D_EMB, :2 * D_EMB], preferred_element_type=jnp.float32)
          + w_ref[VBKV:VBKV + 1, :2 * D_EMB])                            # (Lk, 2D) = [K | V]

    ctx = []
    for h in range(N_HEADS):
        lo, hi = h * HEAD_DIM, (h + 1) * HEAD_DIM
        s = jax.lax.dot_general(q[:, lo:hi], kv[:, lo:hi], (((1,), (1,)), ((), ())),
                                preferred_element_type=jnp.float32)      # (Lq, Lk)
        s = s + bias                                                     # masked_fill(-1e9) semantics
        p = jnp.exp(s - jnp.max(s, axis=-1, keepdims=True))
        p = p * pl.reciprocal(jnp.sum(p, axis=-1, keepdims=True), approx=True)
        ctx.append(jnp.dot(p, kv[:, D_EMB + lo:D_EMB + hi],
                           preferred_element_type=jnp.float32))          # (Lq, hd)
    ctx = jnp.concatenate(ctx, axis=-1)                                  # (Lq, D), one lane concat

    attn = (jnp.dot(ctx, w_ref[XO:XO + D_EMB, :D_EMB], preferred_element_type=jnp.float32)
            + w_ref[VBO:VBO + 1, :D_EMB])
    y = _layernorm(x_q + attn, w_ref[VG1:VG1 + 1, :D_EMB], w_ref[VBE1:VBE1 + 1, :D_EMB])
    f = jnp.maximum(
        jnp.dot(y, w_ref[XF1:XF1 + D_EMB, :D_FF], preferred_element_type=jnp.float32)
        + w_ref[VBF1:VBF1 + 1, :D_FF], 0.0)
    f = (jnp.dot(f, w_ref[XF2:XF2 + D_FF, :D_EMB], preferred_element_type=jnp.float32)
         + w_ref[VBF2:VBF2 + 1, :D_EMB])
    return _layernorm(y + f, w_ref[VG2:VG2 + 1, :D_EMB], w_ref[VBE2:VBE2 + 1, :D_EMB])


# ------------------------------- fused kernel ----------------------------------
def fused_forward_kernel(ph_ref, dh_ref, bias_pd_ref, bias_dp_ref,
                         pxw_ref, dxw_ref, hw_ref, o_ref):
    # reshape linears (frozen-encoder outputs -> shared embedding dim)
    prot_e = (jnp.dot(ph_ref[...], hw_ref[HRPW:HRPW + PROT_DEMB, :D_EMB],
                      preferred_element_type=jnp.float32)
              + hw_ref[HRPB:HRPB + 1, :D_EMB])                            # (B*Lp, D)
    dna_e = (jnp.dot(dh_ref[...], hw_ref[HRDW:HRDW + DNA_DEMB, :D_EMB],
                     preferred_element_type=jnp.float32)
             + hw_ref[HRDB:HRDB + 1, :D_EMB])                             # (B*Ld, D)

    # cross-attention blocks (dna block consumes the UPDATED prot embedding,
    # matching the PyTorch forward order)
    prot_e = _xattn_block(prot_e, dna_e, bias_pd_ref[...], pxw_ref)
    dna_e = _xattn_block(dna_e, prot_e, bias_dp_ref[...], dxw_ref)

    # per-batch mean pool over sequence (torch.mean(x, 1); pads included, true length)
    prot_pool = jnp.concatenate(
        [jnp.sum(prot_e[b * L_PROT:(b + 1) * L_PROT, :], axis=0, keepdims=True)
         for b in range(B)], axis=0) * (1.0 / L_PROT)                     # (B, D)
    dna_pool = jnp.concatenate(
        [jnp.sum(dna_e[b * L_DNA:(b + 1) * L_DNA, :], axis=0, keepdims=True)
         for b in range(B)], axis=0) * (1.0 / L_DNA)                      # (B, D)

    # cat(prot, dna) @ W1 == prot @ W1[:D] + dna @ W1[D:]  (no lane concat)
    h = jnp.maximum(
        jnp.dot(prot_pool, hw_ref[HW1P:HW1P + D_EMB, :MLP_H1], preferred_element_type=jnp.float32)
        + jnp.dot(dna_pool, hw_ref[HW1D:HW1D + D_EMB, :MLP_H1], preferred_element_type=jnp.float32)
        + hw_ref[HB1:HB1 + 1, :MLP_H1], 0.0)
    h = jnp.maximum(
        jnp.dot(h, hw_ref[HW2:HW2 + MLP_H1, :MLP_H2], preferred_element_type=jnp.float32)
        + hw_ref[HB2:HB2 + 1, :MLP_H2], 0.0)
    o_ref[...] = (jnp.dot(h, hw_ref[HW3:HW3 + MLP_H2, :N_OUT], preferred_element_type=jnp.float32)
                  + hw_ref[HB3:HB3 + 1, :N_OUT])


# ------------------------------ pallas_call wrapper ----------------------------
def _make_attn_bias(q_valid, k_valid):
    """(B,Lq),(B,Lk) -> (B*Lq, B*Lk) additive bias: 0 where same batch AND both
    q and k are non-pad (reference make_pad_mask = q_valid & k_valid), else -1e9."""
    Lq, Lk = q_valid.shape[1], k_valid.shape[1]
    same_batch = jnp.kron(jnp.eye(B, dtype=jnp.float32), jnp.ones((Lq, Lk), jnp.float32))
    ok = same_batch * q_valid.reshape(-1, 1) * k_valid.reshape(1, -1)
    return jnp.where(ok > 0.0, 0.0, NEG_INF).astype(jnp.float32)


def fused_forward(prot_hidden, dna_hidden, prot_valid, dna_valid, slabs):
    # fold batch into the sublane axis: (B, L, F) -> (B*L, F)
    ph = prot_hidden.reshape(B * L_PROT, PROT_DEMB).astype(jnp.float32)
    dh = dna_hidden.reshape(B * L_DNA, DNA_DEMB).astype(jnp.float32)
    bias_pd = _make_attn_bias(prot_valid, dna_valid)        # (B*Lp, B*Ld)
    bias_dp = _make_attn_bias(dna_valid, prot_valid)        # (B*Ld, B*Lp)

    # single invocation, no grid: whole (tiny) working set lives in VMEM.
    out = pl.pallas_call(
        fused_forward_kernel,
        out_shape=jax.ShapeDtypeStruct((B, N_OUT), jnp.float32),
    )(ph, dh, bias_pd, bias_dp,
      slabs['prot_xattn'], slabs['dna_xattn'], slabs['head'])
    return out


# ----------------------------- params (glue, JAX) -----------------------------
def init_params(key):
    ks = jax.random.split(key, 10)

    def lin(k, din, dout):
        w = jax.random.normal(k, (din, dout), jnp.float32) * 0.05
        b = jnp.zeros((1, dout), jnp.float32)
        return w, b

    def xattn(k):
        kk = jax.random.split(k, 6)
        wq, bq = lin(kk[0], D_EMB, D_EMB)
        wk, bk = lin(kk[1], D_EMB, D_EMB)
        wv, bv = lin(kk[2], D_EMB, D_EMB)
        wo, bo = lin(kk[3], D_EMB, D_EMB)
        wf1, bf1 = lin(kk[4], D_EMB, D_FF)
        wf2, bf2 = lin(kk[5], D_FF, D_EMB)
        return dict(wq=wq, bq=bq, wk=wk, bk=bk, wv=wv, bv=bv, wo=wo, bo=bo,
                    g1=jnp.ones((1, D_EMB), jnp.float32),
                    be1=jnp.zeros((1, D_EMB), jnp.float32),
                    wf1=wf1, bf1=bf1, wf2=wf2, bf2=bf2,
                    g2=jnp.ones((1, D_EMB), jnp.float32),
                    be2=jnp.zeros((1, D_EMB), jnp.float32))

    w1, b1 = lin(ks[6], 2 * D_EMB, MLP_H1)
    w2, b2 = lin(ks[7], MLP_H1, MLP_H2)
    w3, b3 = lin(ks[8], MLP_H2, N_OUT)

    return {
        'prot_table': jax.random.normal(ks[0], (VOCAB, PROT_DEMB), jnp.float32) * 0.5,
        'dna_table': jax.random.normal(ks[1], (VOCAB, DNA_DEMB), jnp.float32) * 0.5,
        'reshape_prot': lin(ks[2], PROT_DEMB, D_EMB),
        'reshape_dna': lin(ks[3], DNA_DEMB, D_EMB),
        'prot_xattn': xattn(ks[4]),
        'dna_xattn': xattn(ks[5]),
        'mlp': (w1, b1, w2, b2, w3, b3),
    }


def pack_params(params):
    """Pack all weights into 3 contiguous f32 slabs (few DMAs, static in-kernel slices).
    K|V fused, 1/sqrt(head_dim) folded into Q, MLP W1 split for the concat-free head."""
    scale = 1.0 / (HEAD_DIM ** 0.5)

    def pack_xattn(p):
        s = jnp.zeros((XATTN_ROWS, SLAB_COLS), jnp.float32)
        s = s.at[XQ:XQ + D_EMB, :D_EMB].set(p['wq'] * scale)
        s = s.at[XKV:XKV + D_EMB, :2 * D_EMB].set(jnp.concatenate([p['wk'], p['wv']], axis=1))
        s = s.at[XO:XO + D_EMB, :D_EMB].set(p['wo'])
        s = s.at[XF1:XF1 + D_EMB, :D_FF].set(p['wf1'])
        s = s.at[XF2:XF2 + D_FF, :D_EMB].set(p['wf2'])
        vec_rows = ((VBQ, p['bq'] * scale),
                    (VBKV, jnp.concatenate([p['bk'], p['bv']], axis=1)),
                    (VBO, p['bo']), (VBF1, p['bf1']), (VBF2, p['bf2']),
                    (VG1, p['g1']), (VBE1, p['be1']), (VG2, p['g2']), (VBE2, p['be2']))
        for r, v in vec_rows:
            s = s.at[r:r + 1, :v.shape[-1]].set(v)
        return s

    def pack_head():
        rpw, rpb = params['reshape_prot']
        rdw, rdb = params['reshape_dna']
        w1, b1, w2, b2, w3, b3 = params['mlp']
        s = jnp.zeros((HEAD_ROWS, SLAB_COLS), jnp.float32)
        s = s.at[HRPW:HRPW + PROT_DEMB, :D_EMB].set(rpw)
        s = s.at[HRDW:HRDW + DNA_DEMB, :D_EMB].set(rdw)
        s = s.at[HW1P:HW1P + D_EMB, :MLP_H1].set(w1[:D_EMB])
        s = s.at[HW1D:HW1D + D_EMB, :MLP_H1].set(w1[D_EMB:])
        s = s.at[HW2:HW2 + MLP_H1, :MLP_H2].set(w2)
        s = s.at[HW3:HW3 + MLP_H2, :N_OUT].set(w3)
        for r, v in ((HRPB, rpb), (HRDB, rdb), (HB1, b1), (HB2, b2), (HB3, b3)):
            s = s.at[r:r + 1, :v.shape[-1]].set(v)
        return s

    return {
        'prot_xattn': pack_xattn(params['prot_xattn']),
        'dna_xattn': pack_xattn(params['dna_xattn']),
        'head': pack_head(),
    }


def forward(params, slabs, prot_tok, dna_tok):
    # frozen-encoder stand-ins: deterministic embedding-table lookups (glue)
    prot_hidden = params['prot_table'][prot_tok]            # (B, Lp, PROT_DEMB)
    dna_hidden = params['dna_table'][dna_tok]               # (B, Ld, DNA_DEMB)
    prot_valid = (prot_tok != PAD_IDX).astype(jnp.float32)  # (B, Lp)
    dna_valid = (dna_tok != PAD_IDX).astype(jnp.float32)    # (B, Ld)
    return fused_forward(prot_hidden, dna_hidden, prot_valid, dna_valid, slabs)


if __name__ == "__main__":
    key = jax.random.PRNGKey(0)
    k_param, k_prot, k_dna = jax.random.split(key, 3)
    params = init_params(k_param)
    slabs = pack_params(params)

    prot_tok = jax.random.randint(k_prot, (B, L_PROT), 1, VOCAB, dtype=jnp.int32)
    dna_tok = jax.random.randint(k_dna, (B, L_DNA), 1, VOCAB, dtype=jnp.int32)
    # trailing padding exercises the pad masks
    prot_tok = prot_tok.at[:, -3:].set(PAD_IDX)
    dna_tok = dna_tok.at[:, -2:].set(PAD_IDX)

    out = jax.jit(forward)(params, slabs, prot_tok, dna_tok)   # (B, N_OUT)
    jax.block_until_ready(out)
    assert out.shape == (B, N_OUT)
    print("KERNEL_OK")
</pallas_src>

<mosaic_0001>
module attributes {stable_mosaic.version = 11 : i64} {
  func.func @fused_forward_kernel(%arg0: memref<32x32xf32, #tpu.memory_space<vmem>>, %arg1: memref<24x48xf32, #tpu.memory_space<vmem>>, %arg2: memref<32x24xf32, #tpu.memory_space<vmem>>, %arg3: memref<24x32xf32, #tpu.memory_space<vmem>>, %arg4: memref<208x64xf32, #tpu.memory_space<vmem>>, %arg5: memref<208x64xf32, #tpu.memory_space<vmem>>, %arg6: memref<200x64xf32, #tpu.memory_space<vmem>>, %arg7: memref<2x2xf32, #tpu.memory_space<vmem>>) attributes {dimension_semantics = [], scalar_prefetch = 0 : i64, scratch_operands = 0 : i64, tpu.core_type = #tpu.core_type<tc>} {
    %c0 = arith.constant 0 : index
    %c0_0 = arith.constant 0 : index
    %0 = vector.load %arg0[%c0, %c0_0] : memref<32x32xf32, #tpu.memory_space<vmem>>, vector<32x32xf32>
    %c0_1 = arith.constant 0 : index
    %c0_2 = arith.constant 0 : index
    %1 = vector.load %arg6[%c0_1, %c0_2] : memref<200x64xf32, #tpu.memory_space<vmem>>, vector<32x32xf32>
    %cst = arith.constant dense<0.000000e+00> : vector<32x32xf32>
    %2 = tpu.matmul %0, %1, %cst {dimension_numbers = #tpu.dot_dimension_numbers<[1], [0], [0], [1], [0, 0, 1, 1], [], []>} : vector<32x32xf32>, vector<32x32xf32>, vector<32x32xf32> -> vector<32x32xf32>
    %c192 = arith.constant 192 : index
    %c0_3 = arith.constant 0 : index
    %3 = vector.load %arg6[%c192, %c0_3] : memref<200x64xf32, #tpu.memory_space<vmem>>, vector<1x32xf32>
    %4 = vector.broadcast %3 : vector<1x32xf32> to vector<32x32xf32>
    %5 = arith.addf %2, %4 : vector<32x32xf32>
    %c0_4 = arith.constant 0 : index
    %c0_5 = arith.constant 0 : index
    %6 = vector.load %arg1[%c0_4, %c0_5] : memref<24x48xf32, #tpu.memory_space<vmem>>, vector<24x48xf32>
    %c32 = arith.constant 32 : index
    %c0_6 = arith.constant 0 : index
    %7 = vector.load %arg6[%c32, %c0_6] : memref<200x64xf32, #tpu.memory_space<vmem>>, vector<48x32xf32>
    %cst_7 = arith.constant dense<0.000000e+00> : vector<24x32xf32>
    %8 = tpu.matmul %6, %7, %cst_7 {dimension_numbers = #tpu.dot_dimension_numbers<[1], [0], [0], [1], [0, 0, 1, 1], [], []>} : vector<24x48xf32>, vector<48x32xf32>, vector<24x32xf32> -> vector<24x32xf32>
    %c193 = arith.constant 193 : index
    %c0_8 = arith.constant 0 : index
    %9 = vector.load %arg6[%c193, %c0_8] : memref<200x64xf32, #tpu.memory_space<vmem>>, vector<1x32xf32>
    %10 = vector.broadcast %9 : vector<1x32xf32> to vector<24x32xf32>
    %11 = arith.addf %8, %10 : vector<24x32xf32>
    %c0_9 = arith.constant 0 : index
    %c0_10 = arith.constant 0 : index
    %12 = vector.load %arg2[%c0_9, %c0_10] : memref<32x24xf32, #tpu.memory_space<vmem>>, vector<32x24xf32>
    %c0_11 = arith.constant 0 : index
    %c0_12 = arith.constant 0 : index
    %13 = vector.load %arg4[%c0_11, %c0_12] : memref<208x64xf32, #tpu.memory_space<vmem>>, vector<32x32xf32>
    %cst_13 = arith.constant dense<0.000000e+00> : vector<32x32xf32>
    %14 = tpu.matmul %5, %13, %cst_13 {dimension_numbers = #tpu.dot_dimension_numbers<[1], [0], [0], [1], [0, 0, 1, 1], [], []>} : vector<32x32xf32>, vector<32x32xf32>, vector<32x32xf32> -> vector<32x32xf32>
    %c192_14 = arith.constant 192 : index
    %c0_15 = arith.constant 0 : index
    %15 = vector.load %arg4[%c192_14, %c0_15] : memref<208x64xf32, #tpu.memory_space<vmem>>, vector<1x32xf32>
    %16 = vector.broadcast %15 : vector<1x32xf32> to vector<32x32xf32>
    %17 = arith.addf %14, %16 : vector<32x32xf32>
    %c32_16 = arith.constant 32 : index
    %c0_17 = arith.constant 0 : index
    %18 = vector.load %arg4[%c32_16, %c0_17] : memref<208x64xf32, #tpu.memory_space<vmem>>, vector<32x64xf32>
    %cst_18 = arith.constant dense<0.000000e+00> : vector<24x64xf32>
    %19 = tpu.matmul %11, %18, %cst_18 {dimension_numbers = #tpu.dot_dimension_numbers<[1], [0], [0], [1], [0, 0, 1, 1], [], []>} : vector<24x32xf32>, vector<32x64xf32>, vector<24x64xf32> -> vector<24x64xf32>
    %c193_19 = arith.constant 193 : index
    %c0_20 = arith.constant 0 : index
    %20 = vector.load %arg4[%c193_19, %c0_20] : memref<208x64xf32, #tpu.memory_space<vmem>>, vector<1x64xf32>
    %21 = vector.broadcast %20 : vector<1x64xf32> to vector<24x64xf32>
    %22 = arith.addf %19, %21 : vector<24x64xf32>
    %23 = vector.extract_strided_slice %17 {offsets = [0, 0], sizes = [32, 8], strides = [1, 1]} : vector<32x32xf32> to vector<32x8xf32>
    %24 = vector.extract_strided_slice %22 {offsets = [0, 0], sizes = [24, 8], strides = [1, 1]} : vector<24x64xf32> to vector<24x8xf32>
    %cst_21 = arith.constant dense<0.000000e+00> : vector<32x24xf32>
    %25 = tpu.matmul %23, %24, %cst_21 {dimension_numbers = #tpu.dot_dimension_numbers<[1], [1], [0], [0], [0, 0, 1, 0], [], []>} : vector<32x8xf32>, vector<24x8xf32>, vector<32x24xf32> -> vector<32x24xf32>
    %26 = arith.addf %25, %12 : vector<32x24xf32>
    %cst_22 = arith.constant dense<0xFF800000> : vector<32xf32>
    %27 = vector.multi_reduction <maximumf>, %26, %cst_22 [1] : vector<32x24xf32> to vector<32xf32>
    %28 = vector.shape_cast %27 : vector<32xf32> to vector<32x1xf32>
    %29 = vector.broadcast %28 : vector<32x1xf32> to vector<32x24xf32>
    %30 = arith.subf %26, %29 : vector<32x24xf32>
    %31 = math.exp %30 : vector<32x24xf32>
    %cst_23 = arith.constant dense<0.000000e+00> : vector<32xf32>
    %32 = vector.multi_reduction <add>, %31, %cst_23 [1] : vector<32x24xf32> to vector<32xf32>
    %33 = vector.shape_cast %32 : vector<32xf32> to vector<32x1xf32>
    %34 = tpu.reciprocal %33 {approx = true} : vector<32x1xf32> -> vector<32x1xf32>
    %35 = vector.broadcast %34 : vector<32x1xf32> to vector<32x24xf32>
    %36 = arith.mulf %31, %35 : vector<32x24xf32>
    %37 = vector.extract_strided_slice %22 {offsets = [0, 32], sizes = [24, 8], strides = [1, 1]} : vector<24x64xf32> to vector<24x8xf32>
    %cst_24 = arith.constant dense<0.000000e+00> : vector<32x8xf32>
    %38 = tpu.matmul %36, %37, %cst_24 {dimension_numbers = #tpu.dot_dimension_numbers<[1], [0], [0], [1], [0, 0, 1, 1], [], []>} : vector<32x24xf32>, vector<24x8xf32>, vector<32x8xf32> -> vector<32x8xf32>
    %39 = vector.extract_strided_slice %17 {offsets = [0, 8], sizes = [32, 8], strides = [1, 1]} : vector<32x32xf32> to vector<32x8xf32>
    %40 = vector.extract_strided_slice %22 {offsets = [0, 8], sizes = [24, 8], strides = [1, 1]} : vector<24x64xf32> to vector<24x8xf32>
    %cst_25 = arith.constant dense<0.000000e+00> : vector<32x24xf32>
    %41 = tpu.matmul %39, %40, %cst_25 {dimension_numbers = #tpu.dot_dimension_numbers<[1], [1], [0], [0], [0, 0, 1, 0], [], []>} : vector<32x8xf32>, vector<24x8xf32>, vector<32x24xf32> -> vector<32x24xf32>
    %42 = arith.addf %41, %12 : vector<32x24xf32>
    %cst_26 = arith.constant dense<0xFF800000> : vector<32xf32>
    %43 = vector.multi_reduction <maximumf>, %42, %cst_26 [1] : vector<32x24xf32> to vector<32xf32>
    %44 = vector.shape_cast %43 : vector<32xf32> to vector<32x1xf32>
    %45 = vector.broadcast %44 : vector<32x1xf32> to vector<32x24xf32>
    %46 = arith.subf %42, %45 : vector<32x24xf32>
    %47 = math.exp %46 : vector<32x24xf32>
    %cst_27 = arith.constant dense<0.000000e+00> : vector<32xf32>
    %48 = vector.multi_reduction <add>, %47, %cst_27 [1] : vector<32x24xf32> to vector<32xf32>
    %49 = vector.shape_cast %48 : vector<32xf32> to vector<32x1xf32>
    %50 = tpu.reciprocal %49 {approx = true} : vector<32x1xf32> -> vector<32x1xf32>
    %51 = vector.broadcast %50 : vector<32x1xf32> to vector<32x24xf32>
    %52 = arith.mulf %47, %51 : vector<32x24xf32>
    %53 = vector.extract_strided_slice %22 {offsets = [0, 40], sizes = [24, 8], strides = [1, 1]} : vector<24x64xf32> to vector<24x8xf32>
    %cst_28 = arith.constant dense<0.000000e+00> : vector<32x8xf32>
    %54 = tpu.matmul %52, %53, %cst_28 {dimension_numbers = #tpu.dot_dimension_numbers<[1], [0], [0], [1], [0, 0, 1, 1], [], []>} : vector<32x24xf32>, vector<24x8xf32>, vector<32x8xf32> -> vector<32x8xf32>
    %55 = vector.extract_strided_slice %17 {offsets = [0, 16], sizes = [32, 8], strides = [1, 1]} : vector<32x32xf32> to vector<32x8xf32>
    %56 = vector.extract_strided_slice %22 {offsets = [0, 16], sizes = [24, 8], strides = [1, 1]} : vector<24x64xf32> to vector<24x8xf32>
    %cst_29 = arith.constant dense<0.000000e+00> : vector<32x24xf32>
    %57 = tpu.matmul %55, %56, %cst_29 {dimension_numbers = #tpu.dot_dimension_numbers<[1], [1], [0], [0], [0, 0, 1, 0], [], []>} : vector<32x8xf32>, vector<24x8xf32>, vector<32x24xf32> -> vector<32x24xf32>
    %58 = arith.addf %57, %12 : vector<32x24xf32>
    %cst_30 = arith.constant dense<0xFF800000> : vector<32xf32>
    %59 = vector.multi_reduction <maximumf>, %58, %cst_30 [1] : vector<32x24xf32> to vector<32xf32>
    %60 = vector.shape_cast %59 : vector<32xf32> to vector<32x1xf32>
    %61 = vector.broadcast %60 : vector<32x1xf32> to vector<32x24xf32>
    %62 = arith.subf %58, %61 : vector<32x24xf32>
    %63 = math.exp %62 : vector<32x24xf32>
    %cst_31 = arith.constant dense<0.000000e+00> : vector<32xf32>
    %64 = vector.multi_reduction <add>, %63, %cst_31 [1] : vector<32x24xf32> to vector<32xf32>
    %65 = vector.shape_cast %64 : vector<32xf32> to vector<32x1xf32>
    %66 = tpu.reciprocal %65 {approx = true} : vector<32x1xf32> -> vector<32x1xf32>
    %67 = vector.broadcast %66 : vector<32x1xf32> to vector<32x24xf32>
    %68 = arith.mulf %63, %67 : vector<32x24xf32>
    %69 = vector.extract_strided_slice %22 {offsets = [0, 48], sizes = [24, 8], strides = [1, 1]} : vector<24x64xf32> to vector<24x8xf32>
    %cst_32 = arith.constant dense<0.000000e+00> : vector<32x8xf32>
    %70 = tpu.matmul %68, %69, %cst_32 {dimension_numbers = #tpu.dot_dimension_numbers<[1], [0], [0], [1], [0, 0, 1, 1], [], []>} : vector<32x24xf32>, vector<24x8xf32>, vector<32x8xf32> -> vector<32x8xf32>
    %71 = vector.extract_strided_slice %17 {offsets = [0, 24], sizes = [32, 8], strides = [1, 1]} : vector<32x32xf32> to vector<32x8xf32>
    %72 = vector.extract_strided_slice %22 {offsets = [0, 24], sizes = [24, 8], strides = [1, 1]} : vector<24x64xf32> to vector<24x8xf32>
    %cst_33 = arith.constant dense<0.000000e+00> : vector<32x24xf32>
    %73 = tpu.matmul %71, %72, %cst_33 {dimension_numbers = #tpu.dot_dimension_numbers<[1], [1], [0], [0], [0, 0, 1, 0], [], []>} : vector<32x8xf32>, vector<24x8xf32>, vector<32x24xf32> -> vector<32x24xf32>
    %74 = arith.addf %73, %12 : vector<32x24xf32>
    %cst_34 = arith.constant dense<0xFF800000> : vector<32xf32>
    %75 = vector.multi_reduction <maximumf>, %74, %cst_34 [1] : vector<32x24xf32> to vector<32xf32>
    %76 = vector.shape_cast %75 : vector<32xf32> to vector<32x1xf32>
    %77 = vector.broadcast %76 : vector<32x1xf32> to vector<32x24xf32>
    %78 = arith.subf %74, %77 : vector<32x24xf32>
    %79 = math.exp %78 : vector<32x24xf32>
    %cst_35 = arith.constant dense<0.000000e+00> : vector<32xf32>
    %80 = vector.multi_reduction <add>, %79, %cst_35 [1] : vector<32x24xf32> to vector<32xf32>
    %81 = vector.shape_cast %80 : vector<32xf32> to vector<32x1xf32>
    %82 = tpu.reciprocal %81 {approx = true} : vector<32x1xf32> -> vector<32x1xf32>
    %83 = vector.broadcast %82 : vector<32x1xf32> to vector<32x24xf32>
    %84 = arith.mulf %79, %83 : vector<32x24xf32>
    %85 = vector.extract_strided_slice %22 {offsets = [0, 56], sizes = [24, 8], strides = [1, 1]} : vector<24x64xf32> to vector<24x8xf32>
    %cst_36 = arith.constant dense<0.000000e+00> : vector<32x8xf32>
    %86 = tpu.matmul %84, %85, %cst_36 {dimension_numbers = #tpu.dot_dimension_numbers<[1], [0], [0], [1], [0, 0, 1, 1], [], []>} : vector<32x24xf32>, vector<24x8xf32>, vector<32x8xf32> -> vector<32x8xf32>
    %87 = tpu.concatenate %38, %54, %70, %86 in 1 : vector<32x8xf32>, vector<32x8xf32>, vector<32x8xf32>, vector<32x8xf32> -> vector<32x32xf32>
    %c64 = arith.constant 64 : index
    %c0_37 = arith.constant 0 : index
    %88 = vector.load %arg4[%c64, %c0_37] : memref<208x64xf32, #tpu.memory_space<vmem>>, vector<32x32xf32>
    %cst_38 = arith.constant dense<0.000000e+00> : vector<32x32xf32>
    %89 = tpu.matmul %87, %88, %cst_38 {dimension_numbers = #tpu.dot_dimension_numbers<[1], [0], [0], [1], [0, 0, 1, 1], [], []>} : vector<32x32xf32>, vector<32x32xf32>, vector<32x32xf32> -> vector<32x32xf32>
    %c194 = arith.constant 194 : index
    %c0_39 = arith.constant 0 : index
    %90 = vector.load %arg4[%c194, %c0_39] : memref<208x64xf32, #tpu.memory_space<vmem>>, vector<1x32xf32>
    %91 = vector.broadcast %90 : vector<1x32xf32> to vector<32x32xf32>
    %92 = arith.addf %89, %91 : vector<32x32xf32>
    %93 = arith.addf %5, %92 : vector<32x32xf32>
    %c197 = arith.constant 197 : index
    %c0_40 = arith.constant 0 : index
    %94 = vector.load %arg4[%c197, %c0_40] : memref<208x64xf32, #tpu.memory_space<vmem>>, vector<1x32xf32>
    %c198 = arith.constant 198 : index
    %c0_41 = arith.constant 0 : index
    %95 = vector.load %arg4[%c198, %c0_41] : memref<208x64xf32, #tpu.memory_space<vmem>>, vector<1x32xf32>
    %cst_42 = arith.constant dense<0.000000e+00> : vector<32xf32>
    %96 = vector.multi_reduction <add>, %93, %cst_42 [1] : vector<32x32xf32> to vector<32xf32>
    %97 = vector.shape_cast %96 : vector<32xf32> to vector<32x1xf32>
    %cst_43 = arith.constant 3.125000e-02 : f32
    %98 = vector.broadcast %cst_43 : f32 to vector<32x1xf32>
    %99 = arith.mulf %97, %98 : vector<32x1xf32>
    %100 = arith.mulf %93, %93 : vector<32x32xf32>
    %cst_44 = arith.constant dense<0.000000e+00> : vector<32xf32>
    %101 = vector.multi_reduction <add>, %100, %cst_44 [1] : vector<32x32xf32> to vector<32xf32>
    %102 = vector.shape_cast %101 : vector<32xf32> to vector<32x1xf32>
    %cst_45 = arith.constant 3.125000e-02 : f32
    %103 = vector.broadcast %cst_45 : f32 to vector<32x1xf32>
    %104 = arith.mulf %102, %103 : vector<32x1xf32>
    %105 = arith.mulf %99, %99 : vector<32x1xf32>
    %106 = arith.subf %104, %105 : vector<32x1xf32>
    %107 = vector.broadcast %99 : vector<32x1xf32> to vector<32x32xf32>
    %108 = arith.subf %93, %107 : vector<32x32xf32>
    %cst_46 = arith.constant 9.99999974E-6 : f32
    %109 = vector.broadcast %cst_46 : f32 to vector<32x1xf32>
    %110 = arith.addf %106, %109 : vector<32x1xf32>
    %111 = math.rsqrt %110 : vector<32x1xf32>
    %112 = vector.broadcast %111 : vector<32x1xf32> to vector<32x32xf32>
    %113 = arith.mulf %108, %112 : vector<32x32xf32>
    %114 = vector.broadcast %94 : vector<1x32xf32> to vector<32x32xf32>
    %115 = arith.mulf %113, %114 : vector<32x32xf32>
    %116 = vector.broadcast %95 : vector<1x32xf32> to vector<32x32xf32>
    %117 = arith.addf %115, %116 : vector<32x32xf32>
    %c96 = arith.constant 96 : index
    %c0_47 = arith.constant 0 : index
    %118 = vector.load %arg4[%c96, %c0_47] : memref<208x64xf32, #tpu.memory_space<vmem>>, vector<32x64xf32>
    %cst_48 = arith.constant dense<0.000000e+00> : vector<32x64xf32>
    %119 = tpu.matmul %117, %118, %cst_48 {dimension_numbers = #tpu.dot_dimension_numbers<[1], [0], [0], [1], [0, 0, 1, 1], [], []>} : vector<32x32xf32>, vector<32x64xf32>, vector<32x64xf32> -> vector<32x64xf32>
    %c195 = arith.constant 195 : index
    %c0_49 = arith.constant 0 : index
    %120 = vector.load %arg4[%c195, %c0_49] : memref<208x64xf32, #tpu.memory_space<vmem>>, vector<1x64xf32>
    %121 = vector.broadcast %120 : vector<1x64xf32> to vector<32x64xf32>
    %122 = arith.addf %119, %121 : vector<32x64xf32>
    %cst_50 = arith.constant 0.000000e+00 : f32
    %123 = vector.broadcast %cst_50 : f32 to vector<32x64xf32>
    %124 = arith.maximumf %122, %123 : vector<32x64xf32>
    %c128 = arith.constant 128 : index
    %c0_51 = arith.constant 0 : index
    %125 = vector.load %arg4[%c128, %c0_51] : memref<208x64xf32, #tpu.memory_space<vmem>>, vector<64x32xf32>
    %cst_52 = arith.constant dense<0.000000e+00> : vector<32x32xf32>
    %126 = tpu.matmul %124, %125, %cst_52 {dimension_numbers = #tpu.dot_dimension_numbers<[1], [0], [0], [1], [0, 0, 1, 1], [], []>} : vector<32x64xf32>, vector<64x32xf32>, vector<32x32xf32> -> vector<32x32xf32>
    %c196 = arith.constant 196 : index
    %c0_53 = arith.constant 0 : index
    %127 = vector.load %arg4[%c196, %c0_53] : memref<208x64xf32, #tpu.memory_space<vmem>>, vector<1x32xf32>
    %128 = vector.broadcast %127 : vector<1x32xf32> to vector<32x32xf32>
    %129 = arith.addf %126, %128 : vector<32x32xf32>
    %130 = arith.addf %117, %129 : vector<32x32xf32>
    %c199 = arith.constant 199 : index
    %c0_54 = arith.constant 0 : index
    %131 = vector.load %arg4[%c199, %c0_54] : memref<208x64xf32, #tpu.memory_space<vmem>>, vector<1x32xf32>
    %c200 = arith.constant 200 : index
    %c0_55 = arith.constant 0 : index
    %132 = vector.load %arg4[%c200, %c0_55] : memref<208x64xf32, #tpu.memory_space<vmem>>, vector<1x32xf32>
    %cst_56 = arith.constant dense<0.000000e+00> : vector<32xf32>
    %133 = vector.multi_reduction <add>, %130, %cst_56 [1] : vector<32x32xf32> to vector<32xf32>
    %134 = vector.shape_cast %133 : vector<32xf32> to vector<32x1xf32>
    %cst_57 = arith.constant 3.125000e-02 : f32
    %135 = vector.broadcast %cst_57 : f32 to vector<32x1xf32>
    %136 = arith.mulf %134, %135 : vector<32x1xf32>
    %137 = arith.mulf %130, %130 : vector<32x32xf32>
    %cst_58 = arith.constant dense<0.000000e+00> : vector<32xf32>
    %138 = vector.multi_reduction <add>, %137, %cst_58 [1] : vector<32x32xf32> to vector<32xf32>
    %139 = vector.shape_cast %138 : vector<32xf32> to vector<32x1xf32>
    %cst_59 = arith.constant 3.125000e-02 : f32
    %140 = vector.broadcast %cst_59 : f32 to vector<32x1xf32>
    %141 = arith.mulf %139, %140 : vector<32x1xf32>
    %142 = arith.mulf %136, %136 : vector<32x1xf32>
    %143 = arith.subf %141, %142 : vector<32x1xf32>
    %144 = vector.broadcast %136 : vector<32x1xf32> to vector<32x32xf32>
    %145 = arith.subf %130, %144 : vector<32x32xf32>
    %cst_60 = arith.constant 9.99999974E-6 : f32
    %146 = vector.broadcast %cst_60 : f32 to vector<32x1xf32>
    %147 = arith.addf %143, %146 : vector<32x1xf32>
    %148 = math.rsqrt %147 : vector<32x1xf32>
    %149 = vector.broadcast %148 : vector<32x1xf32> to vector<32x32xf32>
    %150 = arith.mulf %145, %149 : vector<32x32xf32>
    %151 = vector.broadcast %131 : vector<1x32xf32> to vector<32x32xf32>
    %152 = arith.mulf %150, %151 : vector<32x32xf32>
    %153 = vector.broadcast %132 : vector<1x32xf32> to vector<32x32xf32>
    %154 = arith.addf %152, %153 : vector<32x32xf32>
    %c0_61 = arith.constant 0 : index
    %c0_62 = arith.constant 0 : index
    %155 = vector.load %arg3[%c0_61, %c0_62] : memref<24x32xf32, #tpu.memory_space<vmem>>, vector<24x32xf32>
    %c0_63 = arith.constant 0 : index
    %c0_64 = arith.constant 0 : index
    %156 = vector.load %arg5[%c0_63, %c0_64] : memref<208x64xf32, #tpu.memory_space<vmem>>, vector<32x32xf32>
    %cst_65 = arith.constant dense<0.000000e+00> : vector<24x32xf32>
    %157 = tpu.matmul %11, %156, %cst_65 {dimension_numbers = #tpu.dot_dimension_numbers<[1], [0], [0], [1], [0, 0, 1, 1], [], []>} : vector<24x32xf32>, vector<32x32xf32>, vector<24x32xf32> -> vector<24x32xf32>
    %c192_66 = arith.constant 192 : index
    %c0_67 = arith.constant 0 : index
    %158 = vector.load %arg5[%c192_66, %c0_67] : memref<208x64xf32, #tpu.memory_space<vmem>>, vector<1x32xf32>
    %159 = vector.broadcast %158 : vector<1x32xf32> to vector<24x32xf32>
    %160 = arith.addf %157, %159 : vector<24x32xf32>
    %c32_68 = arith.constant 32 : index
    %c0_69 = arith.constant 0 : index
    %161 = vector.load %arg5[%c32_68, %c0_69] : memref<208x64xf32, #tpu.memory_space<vmem>>, vector<32x64xf32>
    %cst_70 = arith.constant dense<0.000000e+00> : vector<32x64xf32>
    %162 = tpu.matmul %154, %161, %cst_70 {dimension_numbers = #tpu.dot_dimension_numbers<[1], [0], [0], [1], [0, 0, 1, 1], [], []>} : vector<32x32xf32>, vector<32x64xf32>, vector<32x64xf32> -> vector<32x64xf32>
    %c193_71 = arith.constant 193 : index
    %c0_72 = arith.constant 0 : index
    %163 = vector.load %arg5[%c193_71, %c0_72] : memref<208x64xf32, #tpu.memory_space<vmem>>, vector<1x64xf32>
    %164 = vector.broadcast %163 : vector<1x64xf32> to vector<32x64xf32>
    %165 = arith.addf %162, %164 : vector<32x64xf32>
    %166 = vector.extract_strided_slice %160 {offsets = [0, 0], sizes = [24, 8], strides = [1, 1]} : vector<24x32xf32> to vector<24x8xf32>
    %167 = vector.extract_strided_slice %165 {offsets = [0, 0], sizes = [32, 8], strides = [1, 1]} : vector<32x64xf32> to vector<32x8xf32>
    %cst_73 = arith.constant dense<0.000000e+00> : vector<24x32xf32>
    %168 = tpu.matmul %166, %167, %cst_73 {dimension_numbers = #tpu.dot_dimension_numbers<[1], [1], [0], [0], [0, 0, 1, 0], [], []>} : vector<24x8xf32>, vector<32x8xf32>, vector<24x32xf32> -> vector<24x32xf32>
    %169 = arith.addf %168, %155 : vector<24x32xf32>
    %cst_74 = arith.constant dense<0xFF800000> : vector<24xf32>
    %170 = vector.multi_reduction <maximumf>, %169, %cst_74 [1] : vector<24x32xf32> to vector<24xf32>
    %171 = vector.shape_cast %170 : vector<24xf32> to vector<24x1xf32>
    %172 = vector.broadcast %171 : vector<24x1xf32> to vector<24x32xf32>
    %173 = arith.subf %169, %172 : vector<24x32xf32>
    %174 = math.exp %173 : vector<24x32xf32>
    %cst_75 = arith.constant dense<0.000000e+00> : vector<24xf32>
    %175 = vector.multi_reduction <add>, %174, %cst_75 [1] : vector<24x32xf32> to vector<24xf32>
    %176 = vector.shape_cast %175 : vector<24xf32> to vector<24x1xf32>
    %177 = tpu.reciprocal %176 {approx = true} : vector<24x1xf32> -> vector<24x1xf32>
    %178 = vector.broadcast %177 : vector<24x1xf32> to vector<24x32xf32>
    %179 = arith.mulf %174, %178 : vector<24x32xf32>
    %180 = vector.extract_strided_slice %165 {offsets = [0, 32], sizes = [32, 8], strides = [1, 1]} : vector<32x64xf32> to vector<32x8xf32>
    %cst_76 = arith.constant dense<0.000000e+00> : vector<24x8xf32>
    %181 = tpu.matmul %179, %180, %cst_76 {dimension_numbers = #tpu.dot_dimension_numbers<[1], [0], [0], [1], [0, 0, 1, 1], [], []>} : vector<24x32xf32>, vector<32x8xf32>, vector<24x8xf32> -> vector<24x8xf32>
    %182 = vector.extract_strided_slice %160 {offsets = [0, 8], sizes = [24, 8], strides = [1, 1]} : vector<24x32xf32> to vector<24x8xf32>
    %183 = vector.extract_strided_slice %165 {offsets = [0, 8], sizes = [32, 8], strides = [1, 1]} : vector<32x64xf32> to vector<32x8xf32>
    %cst_77 = arith.constant dense<0.000000e+00> : vector<24x32xf32>
    %184 = tpu.matmul %182, %183, %cst_77 {dimension_numbers = #tpu.dot_dimension_numbers<[1], [1], [0], [0], [0, 0, 1, 0], [], []>} : vector<24x8xf32>, vector<32x8xf32>, vector<24x32xf32> -> vector<24x32xf32>
    %185 = arith.addf %184, %155 : vector<24x32xf32>
    %cst_78 = arith.constant dense<0xFF800000> : vector<24xf32>
    %186 = vector.multi_reduction <maximumf>, %185, %cst_78 [1] : vector<24x32xf32> to vector<24xf32>
    %187 = vector.shape_cast %186 : vector<24xf32> to vector<24x1xf32>
    %188 = vector.broadcast %187 : vector<24x1xf32> to vector<24x32xf32>
    %189 = arith.subf %185, %188 : vector<24x32xf32>
    %190 = math.exp %189 : vector<24x32xf32>
    %cst_79 = arith.constant dense<0.000000e+00> : vector<24xf32>
    %191 = vector.multi_reduction <add>, %190, %cst_79 [1] : vector<24x32xf32> to vector<24xf32>
    %192 = vector.shape_cast %191 : vector<24xf32> to vector<24x1xf32>
    %193 = tpu.reciprocal %192 {approx = true} : vector<24x1xf32> -> vector<24x1xf32>
    %194 = vector.broadcast %193 : vector<24x1xf32> to vector<24x32xf32>
    %195 = arith.mulf %190, %194 : vector<24x32xf32>
    %196 = vector.extract_strided_slice %165 {offsets = [0, 40], sizes = [32, 8], strides = [1, 1]} : vector<32x64xf32> to vector<32x8xf32>
    %cst_80 = arith.constant dense<0.000000e+00> : vector<24x8xf32>
    %197 = tpu.matmul %195, %196, %cst_80 {dimension_numbers = #tpu.dot_dimension_numbers<[1], [0], [0], [1], [0, 0, 1, 1], [], []>} : vector<24x32xf32>, vector<32x8xf32>, vector<24x8xf32> -> vector<24x8xf32>
    %198 = vector.extract_strided_slice %160 {offsets = [0, 16], sizes = [24, 8], strides = [1, 1]} : vector<24x32xf32> to vector<24x8xf32>
    %199 = vector.extract_strided_slice %165 {offsets = [0, 16], sizes = [32, 8], strides = [1, 1]} : vector<32x64xf32> to vector<32x8xf32>
    %cst_81 = arith.constant dense<0.000000e+00> : vector<24x32xf32>
    %200 = tpu.matmul %198, %199, %cst_81 {dimension_numbers = #tpu.dot_dimension_numbers<[1], [1], [0], [0], [0, 0, 1, 0], [], []>} : vector<24x8xf32>, vector<32x8xf32>, vector<24x32xf32> -> vector<24x32xf32>
    %201 = arith.addf %200, %155 : vector<24x32xf32>
    %cst_82 = arith.constant dense<0xFF800000> : vector<24xf32>
    %202 = vector.multi_reduction <maximumf>, %201, %cst_82 [1] : vector<24x32xf32> to vector<24xf32>
    %203 = vector.shape_cast %202 : vector<24xf32> to vector<24x1xf32>
    %204 = vector.broadcast %203 : vector<24x1xf32> to vector<24x32xf32>
    %205 = arith.subf %201, %204 : vector<24x32xf32>
    %206 = math.exp %205 : vector<24x32xf32>
    %cst_83 = arith.constant dense<0.000000e+00> : vector<24xf32>
    %207 = vector.multi_reduction <add>, %206, %cst_83 [1] : vector<24x32xf32> to vector<24xf32>
    %208 = vector.shape_cast %207 : vector<24xf32> to vector<24x1xf32>
    %209 = tpu.reciprocal %208 {approx = true} : vector<24x1xf32> -> vector<24x1xf32>
    %210 = vector.broadcast %209 : vector<24x1xf32> to vector<24x32xf32>
    %211 = arith.mulf %206, %210 : vector<24x32xf32>
    %212 = vector.extract_strided_slice %165 {offsets = [0, 48], sizes = [32, 8], strides = [1, 1]} : vector<32x64xf32> to vector<32x8xf32>
    %cst_84 = arith.constant dense<0.000000e+00> : vector<24x8xf32>
    %213 = tpu.matmul %211, %212, %cst_84 {dimension_numbers = #tpu.dot_dimension_numbers<[1], [0], [0], [1], [0, 0, 1, 1], [], []>} : vector<24x32xf32>, vector<32x8xf32>, vector<24x8xf32> -> vector<24x8xf32>
    %214 = vector.extract_strided_slice %160 {offsets = [0, 24], sizes = [24, 8], strides = [1, 1]} : vector<24x32xf32> to vector<24x8xf32>
    %215 = vector.extract_strided_slice %165 {offsets = [0, 24], sizes = [32, 8], strides = [1, 1]} : vector<32x64xf32> to vector<32x8xf32>
    %cst_85 = arith.constant dense<0.000000e+00> : vector<24x32xf32>
    %216 = tpu.matmul %214, %215, %cst_85 {dimension_numbers = #tpu.dot_dimension_numbers<[1], [1], [0], [0], [0, 0, 1, 0], [], []>} : vector<24x8xf32>, vector<32x8xf32>, vector<24x32xf32> -> vector<24x32xf32>
    %217 = arith.addf %216, %155 : vector<24x32xf32>
    %cst_86 = arith.constant dense<0xFF800000> : vector<24xf32>
    %218 = vector.multi_reduction <maximumf>, %217, %cst_86 [1] : vector<24x32xf32> to vector<24xf32>
    %219 = vector.shape_cast %218 : vector<24xf32> to vector<24x1xf32>
    %220 = vector.broadcast %219 : vector<24x1xf32> to vector<24x32xf32>
    %221 = arith.subf %217, %220 : vector<24x32xf32>
    %222 = math.exp %221 : vector<24x32xf32>
    %cst_87 = arith.constant dense<0.000000e+00> : vector<24xf32>
    %223 = vector.multi_reduction <add>, %222, %cst_87 [1] : vector<24x32xf32> to vector<24xf32>
    %224 = vector.shape_cast %223 : vector<24xf32> to vector<24x1xf32>
    %225 = tpu.reciprocal %224 {approx = true} : vector<24x1xf32> -> vector<24x1xf32>
    %226 = vector.broadcast %225 : vector<24x1xf32> to vector<24x32xf32>
    %227 = arith.mulf %222, %226 : vector<24x32xf32>
    %228 = vector.extract_strided_slice %165 {offsets = [0, 56], sizes = [32, 8], strides = [1, 1]} : vector<32x64xf32> to vector<32x8xf32>
    %cst_88 = arith.constant dense<0.000000e+00> : vector<24x8xf32>
    %229 = tpu.matmul %227, %228, %cst_88 {dimension_numbers = #tpu.dot_dimension_numbers<[1], [0], [0], [1], [0, 0, 1, 1], [], []>} : vector<24x32xf32>, vector<32x8xf32>, vector<24x8xf32> -> vector<24x8xf32>
    %230 = tpu.concatenate %181, %197, %213, %229 in 1 : vector<24x8xf32>, vector<24x8xf32>, vector<24x8xf32>, vector<24x8xf32> -> vector<24x32xf32>
    %c64_89 = arith.constant 64 : index
    %c0_90 = arith.constant 0 : index
    %231 = vector.load %arg5[%c64_89, %c0_90] : memref<208x64xf32, #tpu.memory_space<vmem>>, vector<32x32xf32>
    %cst_91 = arith.constant dense<0.000000e+00> : vector<24x32xf32>
    %232 = tpu.matmul %230, %231, %cst_91 {dimension_numbers = #tpu.dot_dimension_numbers<[1], [0], [0], [1], [0, 0, 1, 1], [], []>} : vector<24x32xf32>, vector<32x32xf32>, vector<24x32xf32> -> vector<24x32xf32>
    %c194_92 = arith.constant 194 : index
    %c0_93 = arith.constant 0 : index
    %233 = vector.load %arg5[%c194_92, %c0_93] : memref<208x64xf32, #tpu.memory_space<vmem>>, vector<1x32xf32>
    %234 = vector.broadcast %233 : vector<1x32xf32> to vector<24x32xf32>
    %235 = arith.addf %232, %234 : vector<24x32xf32>
    %236 = arith.addf %11, %235 : vector<24x32xf32>
    %c197_94 = arith.constant 197 : index
    %c0_95 = arith.constant 0 : index
    %237 = vector.load %arg5[%c197_94, %c0_95] : memref<208x64xf32, #tpu.memory_space<vmem>>, vector<1x32xf32>
    %c198_96 = arith.constant 198 : index
    %c0_97 = arith.constant 0 : index
    %238 = vector.load %arg5[%c198_96, %c0_97] : memref<208x64xf32, #tpu.memory_space<vmem>>, vector<1x32xf32>
    %cst_98 = arith.constant dense<0.000000e+00> : vector<24xf32>
    %239 = vector.multi_reduction <add>, %236, %cst_98 [1] : vector<24x32xf32> to vector<24xf32>
    %240 = vector.shape_cast %239 : vector<24xf32> to vector<24x1xf32>
    %cst_99 = arith.constant 3.125000e-02 : f32
    %241 = vector.broadcast %cst_99 : f32 to vector<24x1xf32>
    %242 = arith.mulf %240, %241 : vector<24x1xf32>
    %243 = arith.mulf %236, %236 : vector<24x32xf32>
    %cst_100 = arith.constant dense<0.000000e+00> : vector<24xf32>
    %244 = vector.multi_reduction <add>, %243, %cst_100 [1] : vector<24x32xf32> to vector<24xf32>
    %245 = vector.shape_cast %244 : vector<24xf32> to vector<24x1xf32>
    %cst_101 = arith.constant 3.125000e-02 : f32
    %246 = vector.broadcast %cst_101 : f32 to vector<24x1xf32>
    %247 = arith.mulf %245, %246 : vector<24x1xf32>
    %248 = arith.mulf %242, %242 : vector<24x1xf32>
    %249 = arith.subf %247, %248 : vector<24x1xf32>
    %250 = vector.broadcast %242 : vector<24x1xf32> to vector<24x32xf32>
    %251 = arith.subf %236, %250 : vector<24x32xf32>
    %cst_102 = arith.constant 9.99999974E-6 : f32
    %252 = vector.broadcast %cst_102 : f32 to vector<24x1xf32>
    %253 = arith.addf %249, %252 : vector<24x1xf32>
    %254 = math.rsqrt %253 : vector<24x1xf32>
    %255 = vector.broadcast %254 : vector<24x1xf32> to vector<24x32xf32>
    %256 = arith.mulf %251, %255 : vector<24x32xf32>
    %257 = vector.broadcast %237 : vector<1x32xf32> to vector<24x32xf32>
    %258 = arith.mulf %256, %257 : vector<24x32xf32>
    %259 = vector.broadcast %238 : vector<1x32xf32> to vector<24x32xf32>
    %260 = arith.addf %258, %259 : vector<24x32xf32>
    %c96_103 = arith.constant 96 : index
    %c0_104 = arith.constant 0 : index
    %261 = vector.load %arg5[%c96_103, %c0_104] : memref<208x64xf32, #tpu.memory_space<vmem>>, vector<32x64xf32>
    %cst_105 = arith.constant dense<0.000000e+00> : vector<24x64xf32>
    %262 = tpu.matmul %260, %261, %cst_105 {dimension_numbers = #tpu.dot_dimension_numbers<[1], [0], [0], [1], [0, 0, 1, 1], [], []>} : vector<24x32xf32>, vector<32x64xf32>, vector<24x64xf32> -> vector<24x64xf32>
    %c195_106 = arith.constant 195 : index
    %c0_107 = arith.constant 0 : index
    %263 = vector.load %arg5[%c195_106, %c0_107] : memref<208x64xf32, #tpu.memory_space<vmem>>, vector<1x64xf32>
    %264 = vector.broadcast %263 : vector<1x64xf32> to vector<24x64xf32>
    %265 = arith.addf %262, %264 : vector<24x64xf32>
    %cst_108 = arith.constant 0.000000e+00 : f32
    %266 = vector.broadcast %cst_108 : f32 to vector<24x64xf32>
    %267 = arith.maximumf %265, %266 : vector<24x64xf32>
    %c128_109 = arith.constant 128 : index
    %c0_110 = arith.constant 0 : index
    %268 = vector.load %arg5[%c128_109, %c0_110] : memref<208x64xf32, #tpu.memory_space<vmem>>, vector<64x32xf32>
    %cst_111 = arith.constant dense<0.000000e+00> : vector<24x32xf32>
    %269 = tpu.matmul %267, %268, %cst_111 {dimension_numbers = #tpu.dot_dimension_numbers<[1], [0], [0], [1], [0, 0, 1, 1], [], []>} : vector<24x64xf32>, vector<64x32xf32>, vector<24x32xf32> -> vector<24x32xf32>
    %c196_112 = arith.constant 196 : index
    %c0_113 = arith.constant 0 : index
    %270 = vector.load %arg5[%c196_112, %c0_113] : memref<208x64xf32, #tpu.memory_space<vmem>>, vector<1x32xf32>
    %271 = vector.broadcast %270 : vector<1x32xf32> to vector<24x32xf32>
    %272 = arith.addf %269, %271 : vector<24x32xf32>
    %273 = arith.addf %260, %272 : vector<24x32xf32>
    %c199_114 = arith.constant 199 : index
    %c0_115 = arith.constant 0 : index
    %274 = vector.load %arg5[%c199_114, %c0_115] : memref<208x64xf32, #tpu.memory_space<vmem>>, vector<1x32xf32>
    %c200_116 = arith.constant 200 : index
    %c0_117 = arith.constant 0 : index
    %275 = vector.load %arg5[%c200_116, %c0_117] : memref<208x64xf32, #tpu.memory_space<vmem>>, vector<1x32xf32>
    %cst_118 = arith.constant dense<0.000000e+00> : vector<24xf32>
    %276 = vector.multi_reduction <add>, %273, %cst_118 [1] : vector<24x32xf32> to vector<24xf32>
    %277 = vector.shape_cast %276 : vector<24xf32> to vector<24x1xf32>
    %cst_119 = arith.constant 3.125000e-02 : f32
    %278 = vector.broadcast %cst_119 : f32 to vector<24x1xf32>
    %279 = arith.mulf %277, %278 : vector<24x1xf32>
    %280 = arith.mulf %273, %273 : vector<24x32xf32>
    %cst_120 = arith.constant dense<0.000000e+00> : vector<24xf32>
    %281 = vector.multi_reduction <add>, %280, %cst_120 [1] : vector<24x32xf32> to vector<24xf32>
    %282 = vector.shape_cast %281 : vector<24xf32> to vector<24x1xf32>
    %cst_121 = arith.constant 3.125000e-02 : f32
    %283 = vector.broadcast %cst_121 : f32 to vector<24x1xf32>
    %284 = arith.mulf %282, %283 : vector<24x1xf32>
    %285 = arith.mulf %279, %279 : vector<24x1xf32>
    %286 = arith.subf %284, %285 : vector<24x1xf32>
    %287 = vector.broadcast %279 : vector<24x1xf32> to vector<24x32xf32>
    %288 = arith.subf %273, %287 : vector<24x32xf32>
    %cst_122 = arith.constant 9.99999974E-6 : f32
    %289 = vector.broadcast %cst_122 : f32 to vector<24x1xf32>
    %290 = arith.addf %286, %289 : vector<24x1xf32>
    %291 = math.rsqrt %290 : vector<24x1xf32>
    %292 = vector.broadcast %291 : vector<24x1xf32> to vector<24x32xf32>
    %293 = arith.mulf %288, %292 : vector<24x32xf32>
    %294 = vector.broadcast %274 : vector<1x32xf32> to vector<24x32xf32>
    %295 = arith.mulf %293, %294 : vector<24x32xf32>
    %296 = vector.broadcast %275 : vector<1x32xf32> to vector<24x32xf32>
    %297 = arith.addf %295, %296 : vector<24x32xf32>
    %298 = vector.extract_strided_slice %154 {offsets = [0, 0], sizes = [16, 32], strides = [1, 1]} : vector<32x32xf32> to vector<16x32xf32>
    %cst_123 = arith.constant dense<0.000000e+00> : vector<32xf32>
    %299 = vector.multi_reduction <add>, %298, %cst_123 [0] : vector<16x32xf32> to vector<32xf32>
    %300 = vector.shape_cast %299 : vector<32xf32> to vector<1x32xf32>
    %301 = vector.extract_strided_slice %154 {offsets = [16, 0], sizes = [16, 32], strides = [1, 1]} : vector<32x32xf32> to vector<16x32xf32>
    %cst_124 = arith.constant dense<0.000000e+00> : vector<32xf32>
    %302 = vector.multi_reduction <add>, %301, %cst_124 [0] : vector<16x32xf32> to vector<32xf32>
    %303 = vector.shape_cast %302 : vector<32xf32> to vector<1x32xf32>
    %304 = tpu.concatenate %300, %303 in 0 : vector<1x32xf32>, vector<1x32xf32> -> vector<2x32xf32>
    %cst_125 = arith.constant 6.250000e-02 : f32
    %305 = vector.broadcast %cst_125 : f32 to vector<2x32xf32>
    %306 = arith.mulf %304, %305 : vector<2x32xf32>
    %307 = vector.extract_strided_slice %297 {offsets = [0, 0], sizes = [12, 32], strides = [1, 1]} : vector<24x32xf32> to vector<12x32xf32>
    %cst_126 = arith.constant dense<0.000000e+00> : vector<32xf32>
    %308 = vector.multi_reduction <add>, %307, %cst_126 [0] : vector<12x32xf32> to vector<32xf32>
    %309 = vector.shape_cast %308 : vector<32xf32> to vector<1x32xf32>
    %310 = vector.extract_strided_slice %297 {offsets = [12, 0], sizes = [12, 32], strides = [1, 1]} : vector<24x32xf32> to vector<12x32xf32>
    %cst_127 = arith.constant dense<0.000000e+00> : vector<32xf32>
    %311 = vector.multi_reduction <add>, %310, %cst_127 [0] : vector<12x32xf32> to vector<32xf32>
    %312 = vector.shape_cast %311 : vector<32xf32> to vector<1x32xf32>
    %313 = tpu.concatenate %309, %312 in 0 : vector<1x32xf32>, vector<1x32xf32> -> vector<2x32xf32>
    %cst_128 = arith.constant 0.0833333358 : f32
    %314 = vector.broadcast %cst_128 : f32 to vector<2x32xf32>
    %315 = arith.mulf %313, %314 : vector<2x32xf32>
    %c80 = arith.constant 80 : index
    %c0_129 = arith.constant 0 : index
    %316 = vector.load %arg6[%c80, %c0_129] : memref<200x64xf32, #tpu.memory_space<vmem>>, vector<32x32xf32>
    %cst_130 = arith.constant dense<0.000000e+00> : vector<2x32xf32>
    %317 = tpu.matmul %306, %316, %cst_130 {dimension_numbers = #tpu.dot_dimension_numbers<[1], [0], [0], [1], [0, 0, 1, 1], [], []>} : vector<2x32xf32>, vector<32x32xf32>, vector<2x32xf32> -> vector<2x32xf32>
    %c112 = arith.constant 112 : index
    %c0_131 = arith.constant 0 : index
    %318 = vector.load %arg6[%c112, %c0_131] : memref<200x64xf32, #tpu.memory_space<vmem>>, vector<32x32xf32>
    %cst_132 = arith.constant dense<0.000000e+00> : vector<2x32xf32>
    %319 = tpu.matmul %315, %318, %cst_132 {dimension_numbers = #tpu.dot_dimension_numbers<[1], [0], [0], [1], [0, 0, 1, 1], [], []>} : vector<2x32xf32>, vector<32x32xf32>, vector<2x32xf32> -> vector<2x32xf32>
    %320 = arith.addf %317, %319 : vector<2x32xf32>
    %c194_133 = arith.constant 194 : index
    %c0_134 = arith.constant 0 : index
    %321 = vector.load %arg6[%c194_133, %c0_134] : memref<200x64xf32, #tpu.memory_space<vmem>>, vector<1x32xf32>
    %322 = vector.broadcast %321 : vector<1x32xf32> to vector<2x32xf32>
    %323 = arith.addf %320, %322 : vector<2x32xf32>
    %cst_135 = arith.constant 0.000000e+00 : f32
    %324 = vector.broadcast %cst_135 : f32 to vector<2x32xf32>
    %325 = arith.maximumf %323, %324 : vector<2x32xf32>
    %c144 = arith.constant 144 : index
    %c0_136 = arith.constant 0 : index
    %326 = vector.load %arg6[%c144, %c0_136] : memref<200x64xf32, #tpu.memory_space<vmem>>, vector<32x16xf32>
    %cst_137 = arith.constant dense<0.000000e+00> : vector<2x16xf32>
    %327 = tpu.matmul %325, %326, %cst_137 {dimension_numbers = #tpu.dot_dimension_numbers<[1], [0], [0], [1], [0, 0, 1, 1], [], []>} : vector<2x32xf32>, vector<32x16xf32>, vector<2x16xf32> -> vector<2x16xf32>
    %c195_138 = arith.constant 195 : index
    %c0_139 = arith.constant 0 : index
    %328 = vector.load %arg6[%c195_138, %c0_139] : memref<200x64xf32, #tpu.memory_space<vmem>>, vector<1x16xf32>
    %329 = vector.broadcast %328 : vector<1x16xf32> to vector<2x16xf32>
    %330 = arith.addf %327, %329 : vector<2x16xf32>
    %cst_140 = arith.constant 0.000000e+00 : f32
    %331 = vector.broadcast %cst_140 : f32 to vector<2x16xf32>
    %332 = arith.maximumf %330, %331 : vector<2x16xf32>
    %c176 = arith.constant 176 : index
    %c0_141 = arith.constant 0 : index
    %333 = vector.load %arg6[%c176, %c0_141] : memref<200x64xf32, #tpu.memory_space<vmem>>, vector<16x2xf32>
    %cst_142 = arith.constant dense<0.000000e+00> : vector<2x2xf32>
    %334 = tpu.matmul %332, %333, %cst_142 {dimension_numbers = #tpu.dot_dimension_numbers<[1], [0], [0], [1], [0, 0, 1, 1], [], []>} : vector<2x16xf32>, vector<16x2xf32>, vector<2x2xf32> -> vector<2x2xf32>
    %c196_143 = arith.constant 196 : index
    %c0_144 = arith.constant 0 : index
    %335 = vector.load %arg6[%c196_143, %c0_144] : memref<200x64xf32, #tpu.memory_space<vmem>>, vector<1x2xf32>
    %336 = vector.broadcast %335 : vector<1x2xf32> to vector<2x2xf32>
    %337 = arith.addf %334, %336 : vector<2x2xf32>
    %c0_145 = arith.constant 0 : index
    %c0_146 = arith.constant 0 : index
    %338 = vector.load %arg7[%c0_145, %c0_146] : memref<2x2xf32, #tpu.memory_space<vmem>>, vector<2x2xf32>
    tpu.vector_store %arg7[%c0_145, %c0_146], %337 {strides = array<i32>} : memref<2x2xf32, #tpu.memory_space<vmem>>, vector<2x2xf32>,
    return
  }
}

</mosaic_0001>

<bundles_post_ra>
// kernel: forward.1
= control target key start
LH: loop header
LB: loop body
LE: loop exit
PB: predicated region body
PF: predicated region fallthrough
CT: control target
= control target key end

     0   :  { %vm40_vm0 = vcmask 261120   ;;  %v5108_v2 = vmov 0.0   ;;  %s6418_s0 = inlined_call_operand.vmem [shape: f32[32,32], index: 0, kind: input, shape index: {}]   ;;  %s6419_s1 = inlined_call_operand.vmem [shape: f32[24,48], index: 1, kind: input, shape index: {}]   ;;  %s6420_s2 = inlined_call_operand.vmem [shape: f32[32,24], index: 2, kind: input, shape index: {}]   ;;  %s6421_s3 = inlined_call_operand.vmem [shape: f32[24,32], index: 3, kind: input, shape index: {}]   ;;  %s6422_s4 = inlined_call_operand.vmem [shape: f32[208,64], index: 4, kind: input, shape index: {}]   ;;  %s6423_s5 = inlined_call_operand.vmem [shape: f32[208,64], index: 5, kind: input, shape index: {}]   ;;  %s6424_s6 = inlined_call_operand.vmem [shape: f32[200,64], index: 6, kind: input, shape index: {}]   ;;  %s6425_s7 = inlined_call_operand.hbm [shape: f32[2,2], index: 7, kind: output, shape index: {}]  }
   0x1   :  { %v34_v0 = vld [vmem:[%s6424_s6 + $0x18] sm:$0xff]  ;;  %v33_v1 = vld [vmem:[%s6424_s6 + $0x10] sm:$0xff]  ;;  %4469 = vmatprep.subr.mxu1 %v5108_v2  ;;  %v146_v3 = vld [vmem:[%s6424_s6 + $0x48] sm:$0xff] }
   0x2   :  { %4455 = vmatprep.subr.mxu0 %v34_v0  ;;  %v27_v4 = vld [vmem:[%s6418_s0] sm:$0xff]  ;;  %v32_v5 = vld [vmem:[%s6424_s6 + $0x8] sm:$0xff]  ;;  %4470 = vmatpush3.msra.mxu1 %v146_v3  ;;  %v144_v8 = vld [vmem:[%s6424_s6 + $0x38] sm:$0xff] }
   0x3   :  { %4456 = vmatpush3.msra.mxu0 %v34_v0  ;;  %v145_v6 = vld [vmem:[%s6424_s6 + $0x40] sm:$0xff]  ;;  %4463 = vmatprep.mubr.msk.f32.mxu0 %vm40_vm0, %v27_v4  ;;  %v28_v9 = vld [vmem:[%s6418_s0 + $0x8] sm:$0xff]  ;;  %v143_v10 = vld [vmem:[%s6424_s6 + $0x30] sm:$0xff] }
   0x4   :  { %4457 = vmatprep.subr.mxu0 %v33_v1  ;;  %v31_v7 = vld [vmem:[%s6424_s6] sm:$0xff]  ;;  %4471 = vmatprep.subr.mxu1 %v5108_v2 }
   0x5   :  { %4458 = vmatpush3.msra.mxu0 %v33_v1  ;;  %4472 = vmatpush3.msra.mxu1 %v145_v6 }
   0x6   :  { %4459 = vmatprep.subr.mxu0 %v32_v5  ;;  %4473 = vmatprep.subr.mxu1 %v5108_v2 }
   0x7   :  { %4460 = vmatpush3.msra.mxu0 %v32_v5 }
   0x8   :  { %12 = vsyncpa [#allocation3], 0  ;;  %4461 = vmatprep.subr.mxu0 %v31_v7  ;;  %4474 = vmatpush3.msra.mxu1 %v144_v8  ;;  %v29_v11 = vld [vmem:[%s6418_s0 + $0x10] sm:$0xff]  ;;  %v142_v12 = vld [vmem:[%s6424_s6 + $0x28] sm:$0xff]  ;;  %vm5109_vm1 = vmmov 0   ;;  %vm152_vm2 = vcmask 392192  }
   0x9   :  { %4462 = vmatpush3.msra.mxu0 %v31_v7  ;;  %4475 = vmatprep.subr.mxu1 %v5108_v2  ;;  %v249_v13 = vld [vmem:[%s6422_s4 + $0x18] sm:$0xff]  ;;  %v141_v15 = vld [vmem:[%s6424_s6 + $0x20] sm:$0xff]  ;;  %v139_v17 = vld [vmem:[%s6419_s1 + $0x8] sm:$0xff]  ;;  %vm450_vm3 = vcmask 64512   ;;  %s5110_s10 = smov 120   ;;  %s5111_s11 = smov 112  }
   0xa   :  { %4464 = vmatmul.mubr.msk.f32.vlgmr.msra.gmra.mxu0 %vm40_vm0, %v28_v9  ;;  %4476 = vmatpush3.msra.mxu1 %v143_v10  ;;  %v30_v14 = vld [vmem:[%s6418_s0 + $0x18] sm:$0xff]  ;;  %v138_v16 = vld [vmem:[%s6419_s1] sm:$0xff]  ;;  %v140_v18 = vld [vmem:[%s6419_s1 + $0x10] sm:$0xff]  ;;  %s5112_s12 = smov 104   ;;  %s5113_s13 = smov 96   ;;  %vm557_vm4 = vcmask 195584  }
   0xb   :  { %4466 = vmatprep.mubr.msk.f32.mxu0 %vm40_vm0, %v29_v11  ;;  %4477 = vmatprep.subr.mxu1 %v5108_v2  ;;  %v248_v19 = vld [vmem:[%s6422_s4 + $0x10] sm:$0xff]  ;;  %v247_v20 = vld [vmem:[%s6422_s4 + $0x8] sm:$0xff]  ;;  %v246_v21 = vld [vmem:[%s6422_s4] sm:$0xff]  ;;  %s5114_s14 = smov 88   ;;  %s5115_s15 = smov 80   ;;  %vm1549_vm5 = vcmask 130048  }
   0xc   :  { %4478 = vmatpush3.msra.mxu1 %v142_v12  ;;  %4481 = vmatprep.mubr.msk.f32.mxu1 %vm5109_vm1, %v5108_v2  ;;  %v4072_v23 = vld [vmem:[%s6424_s6 + $0xc0] ss:$0 sm:$0xff]  ;;  %v355_v28 = vld [vmem:[%s6422_s4 + $0x38] sm:$0xff]  ;;  %v354_v31 = vld [vmem:[%s6422_s4 + $0x30] sm:$0xff]  ;;  %s5117_s23 = smov 8   ;;  %s5118_s28 = smov 16  }
   0xd   :  { %4479 = vmatprep.subr.mxu1 %v5108_v2  ;;  %4490 = vmatprep.subr.mxu0 %v249_v13  ;;  %v4077_v33 = vld [vmem:[%s6424_s6 + $0xc1] ss:$0 sm:$0xff]  ;;  %v353_v36 = vld [vmem:[%s6422_s4 + $0x28] sm:$0xff]  ;;  %v4081_v46 = vld [vmem:[%s6422_s4 + $0xc0] ss:$0 sm:$0xff]  ;;  %s5119_s0 = smov 24  }
   0xe   :  { %4467 = vmatmul.mubr.msk.f32.gmra.mxu0 %vm40_vm0, %v30_v14  ;;  %4480 = vmatpush3.msra.mxu1 %v141_v15  ;;  %v352_v39 = vld [vmem:[%s6422_s4 + $0x20] sm:$0xff]  ;;  %vm1869_vm6 = vcmask 523264   ;;  %vm3700_vm7 = vcmask 1040384   ;;  %vm3715_vm8 = vcmask 1043456   ;;  %vm3704_vm9 = vcmask 257024   ;;  %s5120_s26 = smov [#allocation2]  }
   0xf   :  { %4482 = vmatmul.mubr.msk.f32.vlgmr.msra.gmra.mxu1 %vm152_vm2, %v138_v16  ;;  %4491 = vmatpush3.msra.mxu0 %v249_v13  ;;  %v4086_v51 = vld [vmem:[%s6422_s4 + $0xc1] ss:$0 sm:$0xff]  ;;  %s4064_s27 = sshll.u32 %s5120_s26, 4  ;;  %vm4056_vm10 = vcmask 9216   ;;  %s4065_s27 = int_to_ptr.vmem [resolvable:$true] %s4064_s27 }
  0x10   :  { %4484 = vmatprep.mubr.msk.f32.mxu1 %vm5109_vm1, %v5108_v2  ;;  %4492 = vmatprep.subr.mxu0 %v248_v19  ;;  %s5086_s29 = scalar_lea.vmem %s4065_s27, 32  ;;  %p5091_p1 = scmp.lt.s32.totalorder %s4065_s27, %s4065_s27 }
  0x11   :  { %4493 = vmatpush3.msra.mxu0 %v248_v19  ;;  %p5087_p0 = scmp.ne.s32.totalorder %s4065_s27, %s5086_s29  ;;  %p5092_p2 = scmp.lt.s32.totalorder %s5086_s29, %s5086_s29 }
  0x12   :  { %4494 = vmatprep.subr.mxu0 %v247_v20 }
  0x13   :  { %4485 = vmatmul.mubr.msk.f32.gmra.mxu1 %vm152_vm2, %v139_v17  ;;  %4495 = vmatpush3.msra.mxu0 %v247_v20  ;;  %p5093_p3 = por %p5092_p2, %p5091_p1 }
  0x14   :  { %4487 = vmatprep.mubr.msk.f32.mxu1 %vm5109_vm1, %v5108_v2  ;;  %4496 = vmatprep.subr.mxu0 %v246_v21 }
  0x15   :  { %4497 = vmatpush3.msra.mxu0 %v246_v21  ;;  %p5094_p4 = pnand %p5093_p3, %p5087_p0 }
  0x16   :  { %4504 = vmatprep.subr.mxu0 %v5108_v2 }
  0x17   :  { %4488 = vmatmul.mubr.msk.f32.gmra.mxu1 %vm152_vm2, %v140_v18 }
  0xca   :  { %v4465_v22 = vpop.f32.mrf.mxu0 }
  0xcb   :  { %v5246_v26 = vadd.f32 %v4465_v22, %v4072_v23 }
  0xcc   :  { %v119_v24 = vpop.f32.mrf.mxu0 }
  0xcd   :  { %v5244_v25 = vadd.f32 %v4072_v23, %v119_v24 }
  0xce   :  { %v4468_v27 = vpop.f32.mrf.mxu0 }
  0xcf   :  { %4498 = vmatprep.mubr.msk.f32.mxu0 %vm40_vm0, %v5244_v25  ;;  %v228_v29 = vpop.f32.mrf.mxu1  ;;  %v5263_v35 = vadd.f32 %v4468_v27, %v4072_v23 }
  0xd0   :  { %v129_v30 = vpop.f32.mrf.mxu0  ;;  %4499 = vmatmul.mubr.msk.f32.vlgmr.msra.gmra.mxu0 %vm40_vm0, %v5246_v26  ;;  %v5271_v38 = vadd.f32 %v4077_v33, %v228_v29 }
  0xd1   :  { %v5258_v32 = vadd.f32 %v4072_v23, %v129_v30  ;;  %4505 = vmatpush3.msra.mxu0 %v355_v28  ;;  %v4483_v34 = vpop.f32.mrf.mxu1  ;;  %v243_v30 = vld [vmem:[%s6420_s2 + $0x8] sm:$0xff] }
  0xd2   :  { %4506 = vmatprep.subr.mxu0 %v5108_v2 }
  0xd3   :  { %4501 = vmatprep.mubr.msk.f32.mxu0 %vm40_vm0, %v5258_v32  ;;  %4507 = vmatpush3.msra.mxu0 %v354_v31  ;;  %v233_v37 = vpop.f32.mrf.mxu1 }
  0xd4   :  { %4502 = vmatmul.mubr.msk.f32.gmra.mxu0 %vm40_vm0, %v5263_v35  ;;  %4508 = vmatprep.subr.mxu0 %v5108_v2  ;;  %v5282_v42 = vadd.f32 %v4077_v33, %v233_v37  ;;  %v245_v37 = vld [vmem:[%s6420_s2 + $0x18] sm:$0xff] }
  0xd5   :  { %4509 = vmatpush3.msra.mxu0 %v353_v36  ;;  %4512 = vmatprep.mubr.msk.f32.mxu0 %vm5109_vm1, %v5108_v2  ;;  %v4486_v40 = vpop.f32.mrf.mxu1 }
  0xd6   :  { %4510 = vmatprep.subr.mxu0 %v5108_v2 }
  0xd7   :  { %4511 = vmatpush3.msra.mxu0 %v352_v39  ;;  %v238_v41 = vpop.f32.mrf.mxu1 }
  0xd8   :  { %4513 = vmatmul.mubr.msk.f32.vlgmr.msra.gmra.mxu0 %vm40_vm0, %v5271_v38  ;;  %v5288_v44 = vadd.f32 %v4077_v33, %v238_v41  ;;  %v242_v33 = vld [vmem:[%s6420_s2] sm:$0xff] }
  0xd9   :  { %4515 = vmatprep.mubr.msk.f32.mxu0 %vm5109_vm1, %v5108_v2  ;;  %v4489_v43 = vpop.f32.mrf.mxu1 }
  0xda   :  { %v244_v43 = vld [vmem:[%s6420_s2 + $0x10] sm:$0xff]  ;;  %s5116_s2 = smov 72  }
  0xdc   :  { %4516 = vmatmul.mubr.msk.f32.gmra.mxu0 %vm40_vm0, %v5282_v42 }
  0xdd   :  { %4518 = vmatprep.mubr.msk.f32.mxu0 %vm5109_vm1, %v5108_v2 }
  0xe0   :  { %4519 = vmatmul.mubr.msk.f32.gmra.mxu0 %vm40_vm0, %v5288_v44 }
 0x190   :  { %v4500_v45 = vpop.f32.mrf.mxu0 }
 0x191   :  { %v339_v59 = vadd.f32 %v4500_v45, %v4081_v46 }
 0x192   :  { %v333_v47 = vpop.f32.mrf.mxu0 }
 0x193   :  { %v334_v48 = vadd.f32 %v4081_v46, %v333_v47 }
 0x194   :  { %v4503_v49 = vpop.f32.mrf.mxu0 }
 0x195   :  { %4527 = vmatprep.mubr.msk.f32.mxu1 %vm450_vm3, %v334_v48  ;;  %v349_v63 = vadd.f32 %v4503_v49, %v4081_v46 }
 0x196   :  { %v343_v50 = vpop.f32.mrf.mxu0 }
 0x197   :  { %v344_v62 = vadd.f32 %v4081_v46, %v343_v50 }
 0x198   :  { %v436_v52 = vpop.f32.mrf.mxu0 }
 0x199   :  { %v5303_v53 = vadd.f32 %v4086_v51, %v436_v52 }
 0x19a   :  { %v4514_v54 = vpop.f32.mrf.mxu0 }
 0x19b   :  { %716 = vrot.lane.b32.xlu1 %v5303_v53, %s5110_s10 }
 0x19c   :  { %v441_v55 = vpop.f32.mrf.mxu0 }
 0x19d   :  { %v5310_v61 = vadd.f32 %v4086_v51, %v441_v55 }
 0x19e   :  { %v4517_v56 = vpop.f32.mrf.mxu0 }
 0x19f   :  { %708 = vrot.lane.b32.xlu1 %v334_v48, %s5110_s10 }
 0x1a0   :  { %v446_v57 = vpop.f32.mrf.mxu0 }
 0x1a1   :  { %v5308_v58 = vadd.f32 %v4086_v51, %v446_v57 }
 0x1a2   :  { %v4520_v60 = vpop.f32.mrf.mxu0 }
 0x1a3   :  { %720 = vrot.lane.b32.xlu0 %v5308_v58, %s5110_s10  ;;  %4521 = vmatprep.subr.msk.mxu1 %vm450_vm3, %v5308_v58 }
 0x1a4   :  { %710 = vrot.lane.b32.xlu1 %v339_v59, %s5110_s10  ;;  %4522 = vmatpush3.xpose.msk.msra.mxu1 %vm450_vm3, %v5308_v58 }
 0x1a5   :  { %4523 = vmatprep.subr.msk.mxu1 %vm450_vm3, %v5310_v61 }
 0x1a7   :  { %718 = vrot.lane.b32.xlu0 %v5310_v61, %s5110_s10 }
 0x1a8   :  { %712 = vrot.lane.b32.xlu1 %v344_v62, %s5110_s10  ;;  %4524 = vmatpush3.xpose.msk.msra.mxu1 %vm450_vm3, %v5310_v61 }
 0x1a9   :  { %4525 = vmatprep.subr.msk.mxu1 %vm450_vm3, %v5303_v53 }
 0x1ab   :  { %981 = vrot.lane.b32.xlu0 %v5310_v61, %s5111_s11 }
 0x1ac   :  { %714 = vrot.lane.b32.xlu1 %v349_v63, %s5110_s10  ;;  %4526 = vmatpush3.xpose.msk.msra.mxu1 %vm450_vm3, %v5303_v53 }
 0x1af   :  { %983 = vrot.lane.b32.xlu0 %v5308_v58, %s5111_s11  ;;  %4528 = vmatmul.mubr.msk.f32.vlgmr.msra.gmra.mxu1 %vm450_vm3, %v339_v59 }
 0x1b0   :  { %1246 = vrot.lane.b32.xlu1 %v5308_v58, %s5112_s12  ;;  %4530 = vmatprep.mubr.msk.f32.mxu1 %vm450_vm3, %v344_v62 }
 0x1b3   :  { %979 = vrot.lane.b32.xlu0 %v5303_v53, %s5111_s11  ;;  %4531 = vmatmul.mubr.msk.f32.gmra.mxu1 %vm450_vm3, %v349_v63 }
 0x1b4   :  { %1244 = vrot.lane.b32.xlu1 %v5310_v61, %s5112_s12 }
 0x1b7   :  { %971 = vrot.lane.b32.xlu0 %v334_v48, %s5111_s11 }
 0x1b8   :  { %977 = vrot.lane.b32.xlu1 %v349_v63, %s5111_s11 }
 0x1bb   :  { %973 = vrot.lane.b32.xlu0 %v339_v59, %s5111_s11 }
 0x1bc   :  { %1234 = vrot.lane.b32.xlu1 %v334_v48, %s5112_s12 }
 0x1bf   :  { %975 = vrot.lane.b32.xlu0 %v344_v62, %s5111_s11 }
 0x1c0   :  { %1238 = vrot.lane.b32.xlu1 %v344_v62, %s5112_s12 }
 0x1c3   :  { %1242 = vrot.lane.b32.xlu0 %v5303_v53, %s5112_s12 }
 0x1c4   :  { %604 = vrot.lane.b32.xlu1 %v5310_v61, %s5113_s13 }
 0x1c7   :  { %1236 = vrot.lane.b32.xlu0 %v339_v59, %s5112_s12 }
 0x1c8   :  { %602 = vrot.lane.b32.xlu1 %v5303_v53, %s5113_s13 }
 0x1cb   :  { %1240 = vrot.lane.b32.xlu0 %v349_v63, %s5112_s12 }
 0x1cc   :  { %867 = vrot.lane.b32.xlu1 %v5310_v61, %s5114_s14 }
 0x1cf   :  { %865 = vrot.lane.b32.xlu0 %v5303_v53, %s5114_s14 }
 0x1d0   :  { %1132 = vrot.lane.b32.xlu1 %v5308_v58, %s5115_s15 }
 0x1d3   :  { %1130 = vrot.lane.b32.xlu0 %v5310_v61, %s5115_s15 }
 0x1d7   :  { %606 = vrot.lane.b32.xlu0 %v5308_v58, %s5113_s13 }
 0x1db   :  { %869 = vrot.lane.b32.xlu0 %v5308_v58, %s5114_s14 }
 0x20d   :  { %v717_v0 = vpop.permute.xlu1 %716 }
 0x211   :  { %v709_v1 = vpop.permute.xlu1 %708 }
 0x212   :  { %4551 = vmatprep.mubr.msk.f32.mxu0 %vm450_vm3, %v709_v1 }
 0x215   :  { %v721_v3 = vpop.permute.xlu0 %720 }
 0x216   :  { %v711_v4 = vpop.permute.xlu1 %710  ;;  %4545 = vmatprep.subr.msk.mxu0 %vm450_vm3, %v721_v3 }
 0x217   :  { %4546 = vmatpush3.xpose.msk.msra.mxu0 %vm450_vm3, %v721_v3 }
 0x219   :  { %v719_v5 = vpop.permute.xlu0 %718 }
 0x21a   :  { %v713_v6 = vpop.permute.xlu1 %712  ;;  %4547 = vmatprep.subr.msk.mxu0 %vm450_vm3, %v719_v5 }
 0x21b   :  { %4548 = vmatpush3.xpose.msk.msra.mxu0 %vm450_vm3, %v719_v5 }
 0x21c   :  { %4549 = vmatprep.subr.msk.mxu0 %vm450_vm3, %v717_v0 }
 0x21d   :  { %v982_v7 = vpop.permute.xlu0 %981 }
 0x21e   :  { %v715_v8 = vpop.permute.xlu1 %714 }
 0x21f   :  { %4550 = vmatpush3.xpose.msk.msra.mxu0 %vm450_vm3, %v717_v0 }
 0x221   :  { %v984_v9 = vpop.permute.xlu0 %983 }
 0x222   :  { %v1247_v10 = vpop.permute.xlu1 %1246  ;;  %4552 = vmatmul.mubr.msk.f32.vlgmr.msra.gmra.mxu0 %vm450_vm3, %v711_v4  ;;  %4569 = vmatprep.subr.msk.mxu0 %vm450_vm3, %v984_v9 }
 0x223   :  { %4554 = vmatprep.mubr.msk.f32.mxu0 %vm450_vm3, %v713_v6  ;;  %4570 = vmatpush3.xpose.msk.msra.mxu0 %vm450_vm3, %v984_v9 }
 0x224   :  { %4571 = vmatprep.subr.msk.mxu0 %vm450_vm3, %v982_v7 }
 0x225   :  { %v980_v11 = vpop.permute.xlu0 %979 }
 0x226   :  { %4555 = vmatmul.mubr.msk.f32.gmra.mxu0 %vm450_vm3, %v715_v8  ;;  %v1245_v12 = vpop.permute.xlu1 %1244 }
 0x227   :  { %4572 = vmatpush3.xpose.msk.msra.mxu0 %vm450_vm3, %v982_v7 }
 0x228   :  { %4573 = vmatprep.subr.msk.mxu0 %vm450_vm3, %v980_v11 }
 0x229   :  { %v972_v13 = vpop.permute.xlu0 %971 }
 0x22a   :  { %4575 = vmatprep.mubr.msk.f32.mxu0 %vm450_vm3, %v972_v13  ;;  %v978_v14 = vpop.permute.xlu1 %977 }
 0x22b   :  { %4574 = vmatpush3.xpose.msk.msra.mxu0 %vm450_vm3, %v980_v11 }
 0x22c   :  { %4593 = vmatprep.subr.msk.mxu0 %vm450_vm3, %v1247_v10 }
 0x22d   :  { %v974_v15 = vpop.permute.xlu0 %973 }
 0x22e   :  { %4576 = vmatmul.mubr.msk.f32.vlgmr.msra.gmra.mxu0 %vm450_vm3, %v974_v15  ;;  %v1235_v17 = vpop.permute.xlu1 %1234 }
 0x22f   :  { %4594 = vmatpush3.xpose.msk.msra.mxu0 %vm450_vm3, %v1247_v10 }
 0x230   :  { %4595 = vmatprep.subr.msk.mxu0 %vm450_vm3, %v1245_v12 }
 0x231   :  { %v976_v16 = vpop.permute.xlu0 %975 }
 0x232   :  { %4578 = vmatprep.mubr.msk.f32.mxu0 %vm450_vm3, %v976_v16  ;;  %v1239_v20 = vpop.permute.xlu1 %1238 }
 0x233   :  { %4579 = vmatmul.mubr.msk.f32.gmra.mxu0 %vm450_vm3, %v978_v14 }
 0x234   :  { %4596 = vmatpush3.xpose.msk.msra.mxu0 %vm450_vm3, %v1245_v12  ;;  %4599 = vmatprep.mubr.msk.f32.mxu0 %vm450_vm3, %v1235_v17 }
 0x235   :  { %v1243_v18 = vpop.permute.xlu0 %1242 }
 0x236   :  { %4597 = vmatprep.subr.msk.mxu0 %vm450_vm3, %v1243_v18  ;;  %v605_v24 = vpop.permute.xlu1 %604 }
 0x238   :  { %4598 = vmatpush3.xpose.msk.msra.mxu0 %vm450_vm3, %v1243_v18 }
 0x239   :  { %v1237_v19 = vpop.permute.xlu0 %1236 }
 0x23a   :  { %v603_v28 = vpop.permute.xlu1 %602 }
 0x23b   :  { %4600 = vmatmul.mubr.msk.f32.vlgmr.msra.gmra.mxu0 %vm450_vm3, %v1237_v19 }
 0x23c   :  { %4602 = vmatprep.mubr.msk.f32.mxu0 %vm450_vm3, %v1239_v20 }
 0x23d   :  { %v1241_v21 = vpop.permute.xlu0 %1240 }
 0x23f   :  { %4603 = vmatmul.mubr.msk.f32.gmra.mxu0 %vm450_vm3, %v1241_v21 }
 0x241   :  { %v5400_v22 = vpop.permute.xlu0 %865 }
 0x245   :  { %v5402_v23 = vpop.permute.xlu0 %1130 }
 0x249   :  { %v607_v27 = vpop.permute.xlu0 %606 }
 0x24a   :  { %4533 = vmatprep.subr.mxu1 %v607_v27 }
 0x24b   :  { %4534 = vmatpush3.msra.mxu1 %v607_v27 }
 0x24c   :  { %4535 = vmatprep.subr.mxu1 %v605_v24 }
 0x24d   :  { %4536 = vmatpush3.msra.mxu1 %v605_v24  ;;  %v5404_v29 = vpop.permute.xlu0 %869 }
 0x24e   :  { %4537 = vmatprep.subr.mxu1 %v603_v28 }
 0x24f   :  { %4538 = vmatpush3.msra.mxu1 %v603_v28 }
 0x250   :  { %4557 = vmatprep.subr.mxu1 %v5404_v29 }
 0x26f   :  { %v4529_v31 = vpop.f32.mrf.mxu1 }
 0x270   :  { %v5413_v34 = vadd.f32 %v4529_v31, %v243_v30 }
 0x271   :  { %v538_v36 = vpop.f32.mrf.mxu1 }
 0x272   :  { %v5418_v39 = vadd.f32 %v538_v36, %v242_v33  ;;  %v561_v40 = vsel %vm557_vm4, %v5413_v34, -inf }
 0x273   :  { %562 = vmax.xlane.f32.xlu0 %v561_v40  ;;  %v4532_v41 = vpop.f32.mrf.mxu1 }
 0x274   :  { %v5425_v45 = vadd.f32 %v4532_v41, %v245_v37  ;;  %v558_v46 = vsel %vm557_vm4, %v5418_v39, -inf }
 0x275   :  { %v548_v47 = vpop.f32.mrf.mxu1  ;;  %559 = vmax.xlane.f32.xlu1 %v558_v46 }
 0x276   :  { %v5429_v48 = vadd.f32 %v548_v47, %v244_v43  ;;  %v567_v50 = vsel %vm557_vm4, %v5425_v45, -inf }
 0x278   :  { %v564_v49 = vsel %vm557_vm4, %v5429_v48, -inf }
 0x279   :  { %565 = vmax.xlane.f32.xlu0 %v564_v49  ;;  %568 = vmax.xlane.f32.xlu1 %v567_v50 }
 0x2e2   :  { %v4553_v51 = vpop.f32.mrf.mxu0 }
 0x2e3   :  { %v5435_v52 = vadd.f32 %v4553_v51, %v243_v30 }
 0x2e4   :  { %v802_v54 = vpop.f32.mrf.mxu0 }
 0x2e5   :  { %v5437_v55 = vadd.f32 %v802_v54, %v242_v33  ;;  %v824_v56 = vsel %vm557_vm4, %v5435_v52, -inf }
 0x2e6   :  { %v4556_v57 = vpop.f32.mrf.mxu0  ;;  %825 = vmax.xlane.f32.xlu1 %v824_v56 }
 0x2e7   :  { %v5441_v59 = vadd.f32 %v4556_v57, %v245_v37  ;;  %v821_v60 = vsel %vm557_vm4, %v5437_v55, -inf }
 0x2e8   :  { %v812_v62 = vpop.f32.mrf.mxu0  ;;  %822 = vmax.xlane.f32.xlu0 %v821_v60 }
 0x2e9   :  { %v5445_v63 = vadd.f32 %v812_v62, %v244_v43  ;;  %v830_v0 = vsel %vm557_vm4, %v5441_v59, -inf }
 0x2ea   :  { %831 = vmax.xlane.f32.xlu1 %v830_v0 }
 0x2eb   :  { %v827_v1 = vsel %vm557_vm4, %v5445_v63, -inf }
 0x2ec   :  { %828 = vmax.xlane.f32.xlu0 %v827_v1 }
 0x2ee   :  { %v4577_v3 = vpop.f32.mrf.mxu0 }
 0x2ef   :  { %v5451_v4 = vadd.f32 %v4577_v3, %v243_v30 }
 0x2f0   :  { %v1065_v5 = vpop.f32.mrf.mxu0 }
 0x2f1   :  { %v5453_v6 = vadd.f32 %v1065_v5, %v242_v33  ;;  %v1087_v7 = vsel %vm557_vm4, %v5451_v4, -inf }
 0x2f2   :  { %1088 = vmax.xlane.f32.xlu1 %v1087_v7 }
 0x2f3   :  { %v4580_v8 = vpop.f32.mrf.mxu0  ;;  %v1084_v9 = vsel %vm557_vm4, %v5453_v6, -inf }
 0x2f4   :  { %v5459_v10 = vadd.f32 %v4580_v8, %v245_v37  ;;  %1085 = vmax.xlane.f32.xlu0 %v1084_v9 }
 0x2f5   :  { %v1075_v11 = vpop.f32.mrf.mxu0 }
 0x2f6   :  { %v5461_v12 = vadd.f32 %v1075_v11, %v244_v43  ;;  %v1093_v13 = vsel %vm557_vm4, %v5459_v10, -inf }
 0x2f7   :  { %1094 = vmax.xlane.f32.xlu1 %v1093_v13 }
 0x2f8   :  { %v1090_v14 = vsel %vm557_vm4, %v5461_v12, -inf }
 0x2f9   :  { %1091 = vmax.xlane.f32.xlu0 %v1090_v14 }
 0x2fb   :  { %v4601_v15 = vpop.f32.mrf.mxu0 }
 0x2fc   :  { %v5467_v16 = vadd.f32 %v4601_v15, %v243_v30  ;;  %v563_v40 = vpop.xlane.xlu0 %562 }
 0x2fd   :  { %v1328_v17 = vpop.f32.mrf.mxu0  ;;  %v571_v41 = vsub.f32 %v5413_v34, %v563_v40 }
 0x2fe   :  { %v5469_v18 = vadd.f32 %v1328_v17, %v242_v33  ;;  %v1350_v19 = vsel %vm557_vm4, %v5467_v16, -inf  ;;  %v5483_v33 = vpop.permute.xlu1 %867 }
 0x2ff   :  { %v4604_v20 = vpop.f32.mrf.mxu0  ;;  %1351 = vmax.xlane.f32.xlu1 %v1350_v19  ;;  %v576_v49 = vmul.f32 1.442695, %v571_v41 }
 0x300   :  { %v5473_v21 = vadd.f32 %v4604_v20, %v245_v37  ;;  %v1347_v24 = vsel %vm557_vm4, %v5469_v18, -inf }
 0x301   :  { %v1338_v27 = vpop.f32.mrf.mxu0  ;;  %1348 = vmax.xlane.f32.xlu0 %v1347_v24  ;;  %4946 = vpow2.f32 %v576_v49 }
 0x302   :  { %v5477_v28 = vadd.f32 %v1338_v27, %v244_v43  ;;  %v1356_v30 = vsel %vm557_vm4, %v5473_v21, -inf  ;;  %v5487_v36 = vpop.permute.xlu1 %1132  ;;  %v566_v47 = vpop.xlane.xlu0 %565 }
 0x303   :  { %1357 = vmax.xlane.f32.xlu1 %v1356_v30  ;;  %v572_v54 = vsub.f32 %v5429_v48, %v566_v47 }
 0x304   :  { %v1353_v31 = vsel %vm557_vm4, %v5477_v28, -inf }
 0x305   :  { %1354 = vmax.xlane.f32.xlu0 %v1353_v31  ;;  %v578_v57 = vmul.f32 1.442695, %v572_v54 }
 0x306   :  { %v560_v37 = vpop.xlane.xlu1 %559 }
 0x307   :  { %v570_v46 = vsub.f32 %v5418_v39, %v560_v37 }
 0x309   :  { %v574_v51 = vmul.f32 1.442695, %v570_v46 }
 0x30a   :  { %v569_v43 = vpop.xlane.xlu1 %568 }
 0x30b   :  { %v573_v50 = vsub.f32 %v5425_v45, %v569_v43  ;;  %4948 = vpow2.f32 %v574_v51 }
 0x30d   :  { %v580_v56 = vmul.f32 1.442695, %v573_v50 }
 0x30f   :  { %4950 = vpow2.f32 %v580_v56 }
 0x310   :  { %4952 = vpow2.f32 %v578_v57 }
 0x314   :  { %1128 = vrot.lane.b32.xlu1 %v5303_v53, %s5115_s15 }
 0x31b   :  { %1395 = vrot.lane.b32.xlu0 %v5308_v58, %s5116_s2  ;;  %v5495_v58 = vpop.eup %4946 }
 0x31c   :  { %v5497_v60 = vpop.eup %4948  ;;  %v585_v34 = vsel %vm557_vm4, %v5495_v58, 0.0 }
 0x31d   :  { %v5501_v39 = vpop.eup %4950  ;;  %v582_v45 = vsel %vm557_vm4, %v5497_v60, 0.0 }
 0x31e   :  { %v5505_v48 = vpop.eup %4952  ;;  %v591_v62 = vsel %vm557_vm4, %v5501_v39, 0.0 }
 0x31f   :  { %v588_v0 = vsel %vm557_vm4, %v5505_v48, 0.0 }
 0x338   :  { %586 = vadd.xlane.f32.xlu1 %v585_v34 }
 0x33a   :  { %583 = vadd.xlane.f32.xlu0 %v582_v45 }
 0x33c   :  { %592 = vadd.xlane.f32.xlu1 %v591_v62 }
 0x33e   :  { %589 = vadd.xlane.f32.xlu0 %v588_v0 }
 0x36f   :  { %v826_v1 = vpop.xlane.xlu1 %825 }
 0x370   :  { %v834_v3 = vsub.f32 %v5435_v52, %v826_v1 }
 0x371   :  { %v823_v5 = vpop.xlane.xlu0 %822 }
 0x372   :  { %v839_v7 = vmul.f32 1.442695, %v834_v3  ;;  %v833_v8 = vsub.f32 %v5437_v55, %v823_v5 }
 0x373   :  { %v832_v9 = vpop.xlane.xlu1 %831 }
 0x374   :  { %4954 = vpow2.f32 %v839_v7  ;;  %v837_v11 = vmul.f32 1.442695, %v833_v8  ;;  %v836_v13 = vsub.f32 %v5441_v59, %v832_v9 }
 0x375   :  { %v829_v14 = vpop.xlane.xlu0 %828 }
 0x376   :  { %4956 = vpow2.f32 %v837_v11  ;;  %v843_v15 = vmul.f32 1.442695, %v836_v13  ;;  %v835_v17 = vsub.f32 %v5445_v63, %v829_v14 }
 0x378   :  { %4958 = vpow2.f32 %v843_v15  ;;  %v841_v19 = vmul.f32 1.442695, %v835_v17 }
 0x37a   :  { %4960 = vpow2.f32 %v841_v19 }
 0x37b   :  { %v1089_v20 = vpop.xlane.xlu1 %1088 }
 0x37c   :  { %v1097_v52 = vsub.f32 %v5451_v4, %v1089_v20 }
 0x37d   :  { %v1086_v24 = vpop.xlane.xlu0 %1085 }
 0x37e   :  { %v1102_v27 = vmul.f32 1.442695, %v1097_v52  ;;  %v1096_v55 = vsub.f32 %v5453_v6, %v1086_v24 }
 0x380   :  { %4962 = vpow2.f32 %v1102_v27  ;;  %v1100_v30 = vmul.f32 1.442695, %v1096_v55  ;;  %v1095_v31 = vpop.xlane.xlu1 %1094 }
 0x381   :  { %v5517_v37 = vpop.eup %4954  ;;  %v1099_v59 = vsub.f32 %v5459_v10, %v1095_v31 }
 0x382   :  { %4964 = vpow2.f32 %v1100_v30  ;;  %v1092_v40 = vpop.xlane.xlu0 %1091  ;;  %v848_v63 = vsel %vm557_vm4, %v5517_v37, 0.0 }
 0x383   :  { %v5522_v41 = vpop.eup %4956  ;;  %v1106_v43 = vmul.f32 1.442695, %v1099_v59  ;;  %v1098_v4 = vsub.f32 %v5461_v12, %v1092_v40  ;;  %849 = vadd.xlane.f32.xlu1 %v848_v63 }
 0x384   :  { %v845_v6 = vsel %vm557_vm4, %v5522_v41, 0.0 }
 0x385   :  { %v5527_v46 = vpop.eup %4958  ;;  %4966 = vpow2.f32 %v1106_v43  ;;  %v1104_v47 = vmul.f32 1.442695, %v1098_v4  ;;  %846 = vadd.xlane.f32.xlu0 %v845_v6 }
 0x386   :  { %v854_v10 = vsel %vm557_vm4, %v5527_v46, 0.0 }
 0x387   :  { %v5531_v49 = vpop.eup %4960  ;;  %4968 = vpow2.f32 %v1104_v47  ;;  %855 = vadd.xlane.f32.xlu1 %v854_v10 }
 0x388   :  { %v1352_v50 = vpop.xlane.xlu1 %1351  ;;  %v851_v12 = vsel %vm557_vm4, %v5531_v49, 0.0 }
 0x389   :  { %v1360_v51 = vsub.f32 %v5467_v16, %v1352_v50  ;;  %852 = vadd.xlane.f32.xlu0 %v851_v12 }
 0x38a   :  { %v1349_v54 = vpop.xlane.xlu0 %1348 }
 0x38b   :  { %v1365_v56 = vmul.f32 1.442695, %v1360_v51  ;;  %v1359_v57 = vsub.f32 %v5469_v18, %v1349_v54 }
 0x38c   :  { %v1358_v34 = vpop.xlane.xlu1 %1357 }
 0x38d   :  { %v5537_v45 = vpop.eup %4962  ;;  %4970 = vpow2.f32 %v1365_v56  ;;  %v1363_v62 = vmul.f32 1.442695, %v1359_v57  ;;  %v1362_v0 = vsub.f32 %v5473_v21, %v1358_v34 }
 0x38e   :  { %v1355_v1 = vpop.xlane.xlu0 %1354  ;;  %v1111_v3 = vsel %vm557_vm4, %v5537_v45, 0.0 }
 0x38f   :  { %v5542_v5 = vpop.eup %4964  ;;  %4972 = vpow2.f32 %v1363_v62  ;;  %v1369_v16 = vmul.f32 1.442695, %v1362_v0  ;;  %v1361_v7 = vsub.f32 %v5477_v28, %v1355_v1  ;;  %1112 = vadd.xlane.f32.xlu1 %v1111_v3 }
 0x390   :  { %v1108_v18 = vsel %vm557_vm4, %v5542_v5, 0.0  ;;  %v1129_v27 = vpop.permute.xlu1 %1128 }
 0x391   :  { %4974 = vpow2.f32 %v1369_v16  ;;  %v1367_v8 = vmul.f32 1.442695, %v1361_v7  ;;  %1109 = vadd.xlane.f32.xlu0 %v1108_v18 }
 0x392   :  { %v5547_v9 = vpop.eup %4966  ;;  %v5575_v55 = vpop.permute.xlu0 %1395 }
 0x393   :  { %4976 = vpow2.f32 %v1367_v8  ;;  %v1117_v21 = vsel %vm557_vm4, %v5547_v9, 0.0 }
 0x394   :  { %v5551_v11 = vpop.eup %4968  ;;  %1118 = vadd.xlane.f32.xlu1 %v1117_v21 }
 0x395   :  { %v1114_v13 = vsel %vm557_vm4, %v5551_v11, 0.0 }
 0x396   :  { %1115 = vadd.xlane.f32.xlu0 %v1114_v13 }
 0x39a   :  { %v5555_v28 = vpop.eup %4970 }
 0x39b   :  { %v1374_v14 = vsel %vm557_vm4, %v5555_v28, 0.0 }
 0x39c   :  { %v5559_v15 = vpop.eup %4972  ;;  %1375 = vadd.xlane.f32.xlu0 %v1374_v14 }
 0x39d   :  { %v1371_v17 = vsel %vm557_vm4, %v5559_v15, 0.0 }
 0x39e   :  { %v5563_v19 = vpop.eup %4974  ;;  %1372 = vadd.xlane.f32.xlu1 %v1371_v17 }
 0x39f   :  { %v1380_v20 = vsel %vm557_vm4, %v5563_v19, 0.0 }
 0x3a0   :  { %v5567_v52 = vpop.eup %4976  ;;  %1381 = vadd.xlane.f32.xlu0 %v1380_v20 }
 0x3a1   :  { %v1377_v24 = vsel %vm557_vm4, %v5567_v52, 0.0 }
 0x3a2   :  { %1378 = vadd.xlane.f32.xlu1 %v1377_v24 }
 0x3b3   :  { %1393 = vrot.lane.b32.xlu1 %v5310_v61, %s5116_s2 }
 0x3b6   :  { %1391 = vrot.lane.b32.xlu0 %v5303_v53, %s5116_s2 }
 0x3c1   :  { %v587_v30 = vpop.xlane.xlu1 %586 }
 0x3c2   :  { %4978 = vrcp.f32 %v587_v30 }
 0x3c3   :  { %v584_v31 = vpop.xlane.xlu0 %583 }
 0x3c4   :  { %4980 = vrcp.f32 %v584_v31 }
 0x3c5   :  { %v593_v59 = vpop.xlane.xlu1 %592 }
 0x3c6   :  { %4982 = vrcp.f32 %v593_v59 }
 0x3c7   :  { %v590_v40 = vpop.xlane.xlu0 %589 }
 0x3c8   :  { %4984 = vrcp.f32 %v590_v40  ;;  %v1560_v40 = vld [vmem:[%s6422_s4 + $0x50] sm:$0xff] }
 0x3cf   :  { %v4979_v63 = vpop.eup %4978 }
 0x3d0   :  { %v599_v61 = vmul.f32 %v4979_v63, %v5495_v58 }
 0x3d1   :  { %v4981_v43 = vpop.eup %4980 }
 0x3d2   :  { %v598_v4 = vmul.f32 %v4981_v43, %v5497_v60  ;;  %v1559_v43 = vld [vmem:[%s6422_s4 + $0x48] sm:$0xff] }
 0x3d3   :  { %v4983_v6 = vpop.eup %4982 }
 0x3d4   :  { %4539 = vmatprep.mubr.msk.f32.mxu1 %vm557_vm4, %v598_v4  ;;  %v601_v10 = vmul.f32 %v4983_v6, %v5501_v39 }
 0x3d5   :  { %v4985_v53 = vpop.eup %4984  ;;  %4540 = vmatmul.mubr.msk.f32.vlgmr.msra.gmra.mxu1 %vm557_vm4, %v599_v61  ;;  %v1558_v61 = vld [vmem:[%s6422_s4 + $0x40] sm:$0xff] }
 0x3d6   :  { %4558 = vmatpush3.msra.mxu1 %v5404_v29  ;;  %v600_v47 = vmul.f32 %v4985_v53, %v5505_v48 }
 0x3d7   :  { %4559 = vmatprep.subr.mxu1 %v5483_v33 }
 0x3d8   :  { %4560 = vmatpush3.msra.mxu1 %v5483_v33  ;;  %4542 = vmatprep.mubr.msk.f32.mxu1 %vm557_vm4, %v600_v47 }
 0x3d9   :  { %4561 = vmatprep.subr.mxu1 %v5400_v22  ;;  %4543 = vmatmul.mubr.msk.f32.gmra.mxu1 %vm557_vm4, %v601_v10 }
 0x3da   :  { %4562 = vmatpush3.msra.mxu1 %v5400_v22 }
 0x3db   :  { %4581 = vmatprep.subr.mxu1 %v5487_v36 }
 0x40c   :  { %v850_v58 = vpop.xlane.xlu1 %849 }
 0x40d   :  { %4986 = vrcp.f32 %v850_v58 }
 0x40e   :  { %v847_v29 = vpop.xlane.xlu0 %846 }
 0x40f   :  { %4988 = vrcp.f32 %v847_v29 }
 0x410   :  { %v856_v60 = vpop.xlane.xlu1 %855 }
 0x411   :  { %4990 = vrcp.f32 %v856_v60 }
 0x412   :  { %v853_v48 = vpop.xlane.xlu0 %852 }
 0x413   :  { %4992 = vrcp.f32 %v853_v48 }
 0x418   :  { %v1113_v39 = vpop.xlane.xlu1 %1112 }
 0x419   :  { %4994 = vrcp.f32 %v1113_v39 }
 0x41a   :  { %v1110_v33 = vpop.xlane.xlu0 %1109  ;;  %v4987_v50 = vpop.eup %4986 }
 0x41b   :  { %4996 = vrcp.f32 %v1110_v33  ;;  %v862_v22 = vmul.f32 %v4987_v50, %v5517_v37 }
 0x41c   :  { %v4989_v12 = vpop.eup %4988 }
 0x41d   :  { %v1119_v51 = vpop.xlane.xlu1 %1118  ;;  %v861_v54 = vmul.f32 %v4989_v12, %v5522_v41 }
 0x41e   :  { %v4991_v56 = vpop.eup %4990  ;;  %4998 = vrcp.f32 %v1119_v51 }
 0x41f   :  { %v1116_v57 = vpop.xlane.xlu0 %1115  ;;  %4563 = vmatprep.mubr.msk.f32.mxu1 %vm557_vm4, %v861_v54  ;;  %v864_v0 = vmul.f32 %v4991_v56, %v5527_v46 }
 0x420   :  { %v4993_v34 = vpop.eup %4992  ;;  %5000 = vrcp.f32 %v1116_v57  ;;  %4564 = vmatmul.mubr.msk.f32.vlgmr.msra.gmra.mxu1 %vm557_vm4, %v862_v22 }
 0x421   :  { %4582 = vmatpush3.msra.mxu1 %v5487_v36  ;;  %v863_v62 = vmul.f32 %v4993_v34, %v5531_v49 }
 0x422   :  { %4583 = vmatprep.subr.mxu1 %v5402_v23 }
 0x423   :  { %4584 = vmatpush3.msra.mxu1 %v5402_v23  ;;  %4566 = vmatprep.mubr.msk.f32.mxu1 %vm557_vm4, %v863_v62 }
 0x424   :  { %4585 = vmatprep.subr.mxu1 %v1129_v27  ;;  %4567 = vmatmul.mubr.msk.f32.gmra.mxu1 %vm557_vm4, %v864_v0 }
 0x425   :  { %v1376_v37 = vpop.xlane.xlu0 %1375  ;;  %4586 = vmatpush3.msra.mxu1 %v1129_v27 }
 0x426   :  { %4605 = vmatprep.subr.mxu1 %v5575_v55  ;;  %v4995_v41 = vpop.eup %4994  ;;  %5002 = vrcp.f32 %v1376_v37 }
 0x427   :  { %v1373_v36 = vpop.xlane.xlu1 %1372  ;;  %v1125_v46 = vmul.f32 %v4995_v41, %v5537_v45 }
 0x428   :  { %v4997_v1 = vpop.eup %4996  ;;  %5004 = vrcp.f32 %v1373_v36 }
 0x429   :  { %v1382_v49 = vpop.xlane.xlu0 %1381  ;;  %v1124_v3 = vmul.f32 %v4997_v1, %v5542_v5 }
 0x42a   :  { %5006 = vrcp.f32 %v1382_v49 }
 0x42b   :  { %v1379_v23 = vpop.xlane.xlu1 %1378  ;;  %4587 = vmatprep.mubr.msk.f32.mxu1 %vm557_vm4, %v1124_v3  ;;  %v4999_v16 = vpop.eup %4998 }
 0x42c   :  { %5008 = vrcp.f32 %v1379_v23  ;;  %4588 = vmatmul.mubr.msk.f32.vlgmr.msra.gmra.mxu1 %vm557_vm4, %v1125_v46  ;;  %v1127_v5 = vmul.f32 %v4999_v16, %v5547_v9 }
 0x42d   :  { %v5001_v7 = vpop.eup %5000  ;;  %4606 = vmatpush3.msra.mxu1 %v5575_v55  ;;  %v1392_v45 = vpop.permute.xlu0 %1391 }
 0x42e   :  { %v1126_v18 = vmul.f32 %v5001_v7, %v5551_v11 }
 0x42f   :  { %v1394_v8 = vpop.permute.xlu1 %1393 }
 0x430   :  { %4607 = vmatprep.subr.mxu1 %v1394_v8  ;;  %4590 = vmatprep.mubr.msk.f32.mxu1 %vm557_vm4, %v1126_v18  ;;  %v4134_v18 = vld [vmem:[%s6422_s4 + $0xc2] ss:$0 sm:$0xff] }
 0x431   :  { %4608 = vmatpush3.msra.mxu1 %v1394_v8 }
 0x432   :  { %4591 = vmatmul.mubr.msk.f32.gmra.mxu1 %vm557_vm4, %v1127_v5  ;;  %4609 = vmatprep.subr.mxu1 %v1392_v45 }
 0x433   :  { %4610 = vmatpush3.msra.mxu1 %v1392_v45  ;;  %v5003_v21 = vpop.eup %5002 }
 0x434   :  { %v1388_v17 = vmul.f32 %v5003_v21, %v5555_v28 }
 0x435   :  { %v5005_v13 = vpop.eup %5004 }
 0x436   :  { %v1387_v14 = vmul.f32 %v5005_v13, %v5559_v15 }
 0x437   :  { %v5007_v20 = vpop.eup %5006 }
 0x438   :  { %4611 = vmatprep.mubr.msk.f32.mxu1 %vm557_vm4, %v1387_v14  ;;  %v1390_v24 = vmul.f32 %v5007_v20, %v5563_v19 }
 0x439   :  { %v5009_v11 = vpop.eup %5008  ;;  %4612 = vmatmul.mubr.msk.f32.vlgmr.msra.gmra.mxu1 %vm557_vm4, %v1388_v17 }
 0x43a   :  { %v1389_v9 = vmul.f32 %v5009_v11, %v5567_v52  ;;  %v1561_v52 = vld [vmem:[%s6422_s4 + $0x58] sm:$0xff] }
 0x43b   :  { %4617 = vmatprep.subr.mxu1 %v1561_v52 }
 0x43c   :  { %4614 = vmatprep.mubr.msk.f32.mxu1 %vm557_vm4, %v1389_v9  ;;  %4618 = vmatpush3.msra.mxu1 %v1561_v52 }
 0x43d   :  { %4615 = vmatmul.mubr.msk.f32.gmra.mxu1 %vm557_vm4, %v1390_v24  ;;  %4619 = vmatprep.subr.mxu1 %v1560_v40 }
 0x43e   :  { %4620 = vmatpush3.msra.mxu1 %v1560_v40  ;;  %v1749_v40 = vld [vmem:[%s6422_s4 + $0x78] sm:$0xff] }
 0x43f   :  { %4621 = vmatprep.subr.mxu1 %v1559_v43  ;;  %4631 = vmatprep.subr.mxu0 %v1749_v40 }
 0x440   :  { %4622 = vmatpush3.msra.mxu1 %v1559_v43  ;;  %4632 = vmatpush3.msra.mxu0 %v1749_v40  ;;  %v1747_v43 = vld [vmem:[%s6422_s4 + $0x68] sm:$0xff]  ;;  %v2052_v40 = vld [vmem:[%s6423_s5] sm:$0xff] }
 0x441   :  { %4623 = vmatprep.subr.mxu1 %v1558_v61 }
 0x442   :  { %4624 = vmatpush3.msra.mxu1 %v1558_v61  ;;  %v1863_v61 = vld [vmem:[%s6422_s4 + $0xb8] sm:$0xff] }
 0x443   :  { %4645 = vmatprep.subr.mxu1 %v1863_v61 }
 0x495   :  { %v4541_v27 = vpop.f32.mrf.mxu1 }
 0x497   :  { %v689_v55 = vpop.f32.mrf.mxu1 }
 0x499   :  { %v5620_v30 = vpop.f32.mrf.mxu1 }
 0x49b   :  { %v699_v15 = vpop.f32.mrf.mxu1 }
 0x4e0   :  { %v4565_v28 = vpop.f32.mrf.mxu1 }
 0x4e1   :  { %1503 = vrot.lane.b32.xlu0 %v4565_v28, %s5117_s23 }
 0x4e2   :  { %v952_v31 = vpop.f32.mrf.mxu1 }
 0x4e3   :  { %1501 = vrot.lane.b32.xlu1 %v952_v31, %s5117_s23 }
 0x4e4   :  { %v4568_v59 = vpop.f32.mrf.mxu1 }
 0x4e5   :  { %1507 = vrot.lane.b32.xlu0 %v4568_v59, %s5117_s23 }
 0x4e6   :  { %v962_v19 = vpop.f32.mrf.mxu1 }
 0x4e7   :  { %1505 = vrot.lane.b32.xlu1 %v962_v19, %s5117_s23 }
 0x4ec   :  { %v4589_v63 = vpop.f32.mrf.mxu1 }
 0x4ed   :  { %1519 = vrot.lane.b32.xlu0 %v4589_v63, %s5118_s28  ;;  %v1748_v63 = vld [vmem:[%s6422_s4 + $0x70] sm:$0xff] }
 0x4ee   :  { %v1215_v4 = vpop.f32.mrf.mxu1  ;;  %4633 = vmatprep.subr.mxu0 %v1748_v63 }
 0x4ef   :  { %1517 = vrot.lane.b32.xlu1 %v1215_v4, %s5118_s28  ;;  %4634 = vmatpush3.msra.mxu0 %v1748_v63  ;;  %v1746_v4 = vld [vmem:[%s6422_s4 + $0x60] sm:$0xff] }
 0x4f0   :  { %4635 = vmatprep.subr.mxu0 %v1747_v43 }
 0x4f1   :  { %4636 = vmatpush3.msra.mxu0 %v1747_v43  ;;  %v1859_v43 = vld [vmem:[%s6422_s4 + $0x98] sm:$0xff] }
 0x4f2   :  { %v4592_v6 = vpop.f32.mrf.mxu1  ;;  %4637 = vmatprep.subr.mxu0 %v1746_v4 }
 0x4f3   :  { %1523 = vrot.lane.b32.xlu0 %v4592_v6, %s5118_s28  ;;  %4638 = vmatpush3.msra.mxu0 %v1746_v4  ;;  %v1862_v6 = vld [vmem:[%s6422_s4 + $0xb0] sm:$0xff] }
 0x4f4   :  { %v1225_v53 = vpop.f32.mrf.mxu1  ;;  %4667 = vmatprep.subr.mxu0 %v5108_v2  ;;  %v1858_v4 = vld [vmem:[%s6422_s4 + $0x90] sm:$0xff] }
 0x4f5   :  { %1521 = vrot.lane.b32.xlu1 %v1225_v53, %s5118_s28  ;;  %v1861_v53 = vld [vmem:[%s6422_s4 + $0xa8] sm:$0xff] }
 0x4f9   :  { %v4613_v47 = vpop.f32.mrf.mxu1 }
 0x4fa   :  { %1535 = vrot.lane.b32.xlu0 %v4613_v47, %s5119_s0  ;;  %v1860_v47 = vld [vmem:[%s6422_s4 + $0xa0] sm:$0xff] }
 0x4fb   :  { %v1478_v10 = vpop.f32.mrf.mxu1 }
 0x4fc   :  { %1533 = vrot.lane.b32.xlu1 %v1478_v10, %s5119_s0 }
 0x4fd   :  { %v4616_v58 = vpop.f32.mrf.mxu1 }
 0x4fe   :  { %1539 = vrot.lane.b32.xlu0 %v4616_v58, %s5119_s0 }
 0x4ff   :  { %v1488_v29 = vpop.f32.mrf.mxu1 }
 0x500   :  { %1537 = vrot.lane.b32.xlu1 %v1488_v29, %s5119_s0 }
 0x553   :  { %v1504_v60 = vpop.permute.xlu0 %1503 }
 0x554   :  { %v1546_v57 = vsel %vm450_vm3, %v4541_v27, %v1504_v60 }
 0x555   :  { %v1502_v48 = vpop.permute.xlu1 %1501 }
 0x556   :  { %v1545_v56 = vsel %vm450_vm3, %v689_v55, %v1502_v48 }
 0x557   :  { %v1508_v39 = vpop.permute.xlu0 %1507 }
 0x558   :  { %v1548_v49 = vsel %vm450_vm3, %v5620_v30, %v1508_v39 }
 0x559   :  { %v1506_v33 = vpop.permute.xlu1 %1505 }
 0x55a   :  { %v1547_v36 = vsel %vm450_vm3, %v699_v15, %v1506_v33 }
 0x55f   :  { %v1520_v50 = vpop.permute.xlu0 %1519 }
 0x560   :  { %v1551_v0 = vsel %vm1549_vm5, %v1546_v57, %v1520_v50 }
 0x561   :  { %v1518_v12 = vpop.permute.xlu1 %1517 }
 0x562   :  { %v1550_v34 = vsel %vm1549_vm5, %v1545_v56, %v1518_v12 }
 0x565   :  { %v1524_v51 = vpop.permute.xlu0 %1523 }
 0x566   :  { %v1553_v23 = vsel %vm1549_vm5, %v1548_v49, %v1524_v51 }
 0x567   :  { %v1522_v54 = vpop.permute.xlu1 %1521 }
 0x568   :  { %v1552_v3 = vsel %vm1549_vm5, %v1547_v36, %v1522_v54 }
 0x56c   :  { %v1536_v22 = vpop.permute.xlu0 %1535 }
 0x56d   :  { %v1555_v41 = vsel %vm557_vm4, %v1551_v0, %v1536_v22 }
 0x56e   :  { %v1534_v62 = vpop.permute.xlu1 %1533 }
 0x56f   :  { %v1554_v37 = vsel %vm557_vm4, %v1550_v34, %v1534_v62 }
 0x570   :  { %4625 = vmatprep.mubr.msk.f32.mxu1 %vm40_vm0, %v1554_v37  ;;  %v1540_v1 = vpop.permute.xlu0 %1539 }
 0x571   :  { %4626 = vmatmul.mubr.msk.f32.vlgmr.msra.gmra.mxu1 %vm40_vm0, %v1555_v41  ;;  %v1557_v7 = vsel %vm557_vm4, %v1553_v23, %v1540_v1 }
 0x572   :  { %v1538_v46 = vpop.permute.xlu1 %1537  ;;  %4646 = vmatpush3.msra.mxu1 %v1863_v61  ;;  %v1857_v61 = vld [vmem:[%s6422_s4 + $0x88] sm:$0xff] }
 0x573   :  { %v1556_v16 = vsel %vm557_vm4, %v1552_v3, %v1538_v46  ;;  %4647 = vmatprep.subr.mxu1 %v1862_v6 }
 0x574   :  { %4628 = vmatprep.mubr.msk.f32.mxu1 %vm40_vm0, %v1556_v16  ;;  %4648 = vmatpush3.msra.mxu1 %v1862_v6  ;;  %v1856_v6 = vld [vmem:[%s6422_s4 + $0x80] sm:$0xff] }
 0x575   :  { %4629 = vmatmul.mubr.msk.f32.gmra.mxu1 %vm40_vm0, %v1557_v7  ;;  %4649 = vmatprep.subr.mxu1 %v1861_v53 }
 0x576   :  { %4650 = vmatpush3.msra.mxu1 %v1861_v53  ;;  %v4141_v53 = vld [vmem:[%s6422_s4 + $0xc3] ss:$0 sm:$0xff] }
 0x577   :  { %4651 = vmatprep.subr.mxu1 %v1860_v47 }
 0x578   :  { %4652 = vmatpush3.msra.mxu1 %v1860_v47 }
 0x579   :  { %4653 = vmatprep.subr.mxu1 %v1859_v43 }
 0x57a   :  { %4654 = vmatpush3.msra.mxu1 %v1859_v43 }
 0x57b   :  { %4655 = vmatprep.subr.mxu1 %v1858_v4 }
 0x57c   :  { %4656 = vmatpush3.msra.mxu1 %v1858_v4 }
 0x57d   :  { %4657 = vmatprep.subr.mxu1 %v1857_v61 }
 0x57e   :  { %4658 = vmatpush3.msra.mxu1 %v1857_v61 }
 0x57f   :  { %4659 = vmatprep.subr.mxu1 %v1856_v6 }
 0x580   :  { %4660 = vmatpush3.msra.mxu1 %v1856_v6 }
 0x581   :  { %4698 = vmatprep.subr.mxu1 %v5108_v2 }
 0x631   :  { %v4627_v8 = vpop.f32.mrf.mxu1 }
 0x632   :  { %v1651_v5 = vadd.f32 %v4627_v8, %v4134_v18 }
 0x633   :  { %v1645_v45 = vpop.f32.mrf.mxu1 }
 0x634   :  { %v5667_v21 = vadd.f32 %v1651_v5, %v5246_v26  ;;  %v1646_v13 = vadd.f32 %v4134_v18, %v1645_v45  ;;  %v4139_v45 = vld [vmem:[%s6422_s4 + $0xc5] ss:$0 sm:$0xff] }
 0x635   :  { %v4630_v14 = vpop.f32.mrf.mxu1 }
 0x636   :  { %v5670_v17 = vadd.f32 %v1646_v13, %v5244_v25  ;;  %v1673_v20 = vsel %vm40_vm0, %v5667_v21, 0.0  ;;  %v1661_v11 = vadd.f32 %v4630_v14, %v4134_v18  ;;  %v1687_v26 = vmul.f32 %v5667_v21, %v5667_v21 }
 0x637   :  { %1674 = vadd.xlane.f32.xlu0 %v1673_v20  ;;  %v1655_v9 = vpop.f32.mrf.mxu1 }
 0x638   :  { %v1656_v24 = vadd.f32 %v4134_v18, %v1655_v9  ;;  %v1670_v27 = vsel %vm40_vm0, %v5670_v17, 0.0  ;;  %v1686_v55 = vmul.f32 %v5670_v17, %v5670_v17  ;;  %v5685_v15 = vadd.f32 %v1661_v11, %v5263_v35  ;;  %v4140_v11 = vld [vmem:[%s6422_s4 + $0xc6] ss:$0 sm:$0xff] }
 0x639   :  { %1671 = vadd.xlane.f32.xlu1 %v1670_v27  ;;  %v1693_v28 = vsel %vm40_vm0, %v1687_v26, 0.0 }
 0x63a   :  { %v5681_v25 = vadd.f32 %v1656_v24, %v5258_v32  ;;  %v1690_v30 = vsel %vm40_vm0, %v1686_v55, 0.0  ;;  %v1679_v32 = vsel %vm40_vm0, %v5685_v15, 0.0  ;;  %v1689_v19 = vmul.f32 %v5685_v15, %v5685_v15 }
 0x63b   :  { %1691 = vadd.xlane.f32.xlu0 %v1690_v30 }
 0x63c   :  { %v1676_v31 = vsel %vm40_vm0, %v5681_v25, 0.0  ;;  %v1688_v59 = vmul.f32 %v5681_v25, %v5681_v25  ;;  %v1699_v52 = vsel %vm40_vm0, %v1689_v19, 0.0 }
 0x63d   :  { %1694 = vadd.xlane.f32.xlu1 %v1693_v28 }
 0x63e   :  { %v1696_v35 = vsel %vm40_vm0, %v1688_v59, 0.0 }
 0x63f   :  { %1677 = vadd.xlane.f32.xlu0 %v1676_v31 }
 0x641   :  { %1680 = vadd.xlane.f32.xlu1 %v1679_v32 }
 0x643   :  { %1697 = vadd.xlane.f32.xlu0 %v1696_v35  ;;  %v2053_v35 = vld [vmem:[%s6423_s5 + $0x8] sm:$0xff] }
 0x645   :  { %1700 = vadd.xlane.f32.xlu1 %v1699_v52 }
 0x6c0   :  { %v1675_v10 = vpop.xlane.xlu0 %1674 }
 0x6c1   :  { %v1683_v29 = vmul.f32 0.03125, %v1675_v10 }
 0x6c2   :  { %v1672_v58 = vpop.xlane.xlu1 %1671 }
 0x6c3   :  { %v1682_v60 = vmul.f32 0.03125, %v1672_v58  ;;  %v1707_v12 = vmul.f32 %v1683_v29, %v1683_v29  ;;  %v1715_v13 = vsub.f32 %v5667_v21, %v1683_v29  ;;  %v2055_v21 = vld [vmem:[%s6423_s5 + $0x18] sm:$0xff] }
 0x6c4   :  { %v1692_v48 = vpop.xlane.xlu0 %1691 }
 0x6c5   :  { %v1706_v39 = vmul.f32 %v1682_v60, %v1682_v60  ;;  %v1702_v33 = vmul.f32 0.03125, %v1692_v48  ;;  %v1714_v8 = vsub.f32 %v5670_v17, %v1682_v60 }
 0x6c6   :  { %v1695_v50 = vpop.xlane.xlu1 %1694 }
 0x6c7   :  { %v1710_v51 = vsub.f32 %v1702_v33, %v1706_v39  ;;  %v1703_v54 = vmul.f32 0.03125, %v1695_v50 }
 0x6c8   :  { %v1678_v22 = vpop.xlane.xlu0 %1677 }
 0x6c9   :  { %v1718_v56 = vadd.f32 1e-05, %v1710_v51  ;;  %v1711_v57 = vsub.f32 %v1703_v54, %v1707_v12  ;;  %v1684_v34 = vmul.f32 0.03125, %v1678_v22 }
 0x6ca   :  { %v1681_v62 = vpop.xlane.xlu1 %1680 }
 0x6cb   :  { %5010 = vrsqrt.f32 %v1718_v56  ;;  %v1719_v0 = vadd.f32 1e-05, %v1711_v57  ;;  %v1685_v37 = vmul.f32 0.03125, %v1681_v62  ;;  %v1708_v36 = vmul.f32 %v1684_v34, %v1684_v34 }
 0x6cc   :  { %v1698_v41 = vpop.xlane.xlu0 %1697  ;;  %v1716_v17 = vsub.f32 %v5681_v25, %v1684_v34  ;;  %v2054_v25 = vld [vmem:[%s6423_s5 + $0x10] sm:$0xff] }
 0x6cd   :  { %5012 = vrsqrt.f32 %v1719_v0  ;;  %v1704_v1 = vmul.f32 0.03125, %v1698_v41  ;;  %v1709_v3 = vmul.f32 %v1685_v37, %v1685_v37  ;;  %v1717_v28 = vsub.f32 %v5685_v15, %v1685_v37  ;;  %v4146_v37 = vld [vmem:[%s6422_s4 + $0xc4] ss:$0 sm:$0xff] }
 0x6ce   :  { %v1701_v49 = vpop.xlane.xlu1 %1700 }
 0x6cf   :  { %v1712_v46 = vsub.f32 %v1704_v1, %v1708_v36  ;;  %v1705_v23 = vmul.f32 0.03125, %v1701_v49 }
 0x6d1   :  { %v1720_v16 = vadd.f32 1e-05, %v1712_v46  ;;  %v1713_v7 = vsub.f32 %v1705_v23, %v1709_v3 }
 0x6d3   :  { %5014 = vrsqrt.f32 %v1720_v16  ;;  %v1721_v18 = vadd.f32 1e-05, %v1713_v7 }
 0x6d5   :  { %5016 = vrsqrt.f32 %v1721_v18 }
 0x6d8   :  { %v5011_v5 = vpop.eup %5010 }
 0x6d9   :  { %v1726_v14 = vmul.f32 %v5011_v5, %v1714_v8 }
 0x6da   :  { %v5013_v20 = vpop.eup %5012 }
 0x6db   :  { %v1727_v9 = vmul.f32 %v5013_v20, %v1715_v13  ;;  %v1734_v24 = vmul.f32 %v4139_v45, %v1726_v14 }
 0x6dd   :  { %v1735_v27 = vmul.f32 %v4139_v45, %v1727_v9  ;;  %v5731_v55 = vadd.f32 %v4140_v11, %v1734_v24 }
 0x6df   :  { %v5734_v26 = vadd.f32 %v4140_v11, %v1735_v27  ;;  %4639 = vmatprep.mubr.msk.f32.mxu0 %vm40_vm0, %v5731_v55 }
 0x6e0   :  { %v5015_v30 = vpop.eup %5014 }
 0x6e1   :  { %4640 = vmatmul.mubr.msk.f32.vlgmr.msra.gmra.mxu0 %vm40_vm0, %v5734_v26  ;;  %v1728_v31 = vmul.f32 %v5015_v30, %v1716_v17  ;;  %v2144_v30 = vld [vmem:[%s6423_s5 + $0x38] sm:$0xff] }
 0x6e2   :  { %v5017_v59 = vpop.eup %5016  ;;  %4668 = vmatpush3.msra.mxu0 %v2055_v21 }
 0x6e3   :  { %v1736_v32 = vmul.f32 %v4139_v45, %v1728_v31  ;;  %4669 = vmatprep.subr.mxu0 %v5108_v2  ;;  %v1729_v19 = vmul.f32 %v5017_v59, %v1717_v28  ;;  %v2143_v28 = vld [vmem:[%s6423_s5 + $0x30] sm:$0xff]  ;;  %v2142_v31 = vld [vmem:[%s6423_s5 + $0x28] sm:$0xff] }
 0x6e4   :  { %4670 = vmatpush3.msra.mxu0 %v2054_v25  ;;  %v2141_v25 = vld [vmem:[%s6423_s5 + $0x20] sm:$0xff] }
 0x6e5   :  { %v5751_v15 = vadd.f32 %v4140_v11, %v1736_v32  ;;  %v1737_v52 = vmul.f32 %v4139_v45, %v1729_v19  ;;  %4671 = vmatprep.subr.mxu0 %v5108_v2 }
 0x6e6   :  { %4672 = vmatpush3.msra.mxu0 %v2053_v35 }
 0x6e7   :  { %4642 = vmatprep.mubr.msk.f32.mxu0 %vm40_vm0, %v5751_v15  ;;  %v5759_v63 = vadd.f32 %v4140_v11, %v1737_v52  ;;  %4673 = vmatprep.subr.mxu0 %v5108_v2 }
 0x6e8   :  { %4674 = vmatpush3.msra.mxu0 %v2052_v40 }
 0x6e9   :  { %4643 = vmatmul.mubr.msk.f32.gmra.mxu0 %vm40_vm0, %v5759_v63  ;;  %4684 = vmatprep.subr.mxu0 %v2144_v30 }
 0x6ea   :  { %4675 = vmatprep.mubr.msk.f32.mxu0 %vm5109_vm1, %v5108_v2 }
 0x6ed   :  { %4676 = vmatmul.mubr.msk.f32.vlgmr.msra.gmra.mxu0 %vm40_vm0, %v5271_v38 }
 0x6ee   :  { %4678 = vmatprep.mubr.msk.f32.mxu0 %vm5109_vm1, %v5108_v2  ;;  %4685 = vmatpush3.msra.mxu0 %v2144_v30 }
 0x6ef   :  { %4686 = vmatprep.subr.mxu0 %v2143_v28 }
 0x6f0   :  { %4687 = vmatpush3.msra.mxu0 %v2143_v28 }
 0x6f1   :  { %4679 = vmatmul.mubr.msk.f32.gmra.mxu0 %vm40_vm0, %v5282_v42  ;;  %4688 = vmatprep.subr.mxu0 %v2142_v31 }
 0x6f2   :  { %4681 = vmatprep.mubr.msk.f32.mxu0 %vm5109_vm1, %v5108_v2  ;;  %4689 = vmatpush3.msra.mxu0 %v2142_v31 }
 0x6f3   :  { %4690 = vmatprep.subr.mxu0 %v2141_v25 }
 0x6f4   :  { %4691 = vmatpush3.msra.mxu0 %v2141_v25 }
 0x6f5   :  { %4682 = vmatmul.mubr.msk.f32.gmra.mxu0 %vm40_vm0, %v5288_v44  ;;  %4715 = vmatprep.subr.mxu0 %v5108_v2 }
 0x7a1   :  { %v4641_v47 = vpop.f32.mrf.mxu0 }
 0x7a2   :  { %v1839_v10 = vadd.f32 %v4641_v47, %v4141_v53 }
 0x7a3   :  { %v1833_v58 = vpop.f32.mrf.mxu0 }
 0x7a4   :  { %v1834_v29 = vadd.f32 %v4141_v53, %v1833_v58  ;;  %v1853_v48 = vmax.f32 %v1839_v10, 0.0 }
 0x7a6   :  { %v1852_v60 = vmax.f32 %v1834_v29, 0.0 }
 0x7a8   :  { %4661 = vmatprep.mubr.msk.f32.mxu1 %vm1869_vm6, %v1852_v60 }
 0x7a9   :  { %v4644_v39 = vpop.f32.mrf.mxu0  ;;  %4662 = vmatmul.mubr.msk.f32.vlgmr.msra.gmra.mxu1 %vm1869_vm6, %v1853_v48 }
 0x7aa   :  { %v1849_v33 = vadd.f32 %v4644_v39, %v4141_v53 }
 0x7ab   :  { %v1843_v50 = vpop.f32.mrf.mxu0 }
 0x7ac   :  { %v1844_v12 = vadd.f32 %v4141_v53, %v1843_v50  ;;  %v1855_v22 = vmax.f32 %v1849_v33, 0.0 }
 0x7ad   :  { %v5794_v51 = vpop.f32.mrf.mxu0 }
 0x7ae   :  { %v1854_v54 = vmax.f32 %v1844_v12, 0.0 }
 0x7af   :  { %v4677_v56 = vpop.f32.mrf.mxu0 }
 0x7b0   :  { %4664 = vmatprep.mubr.msk.f32.mxu1 %vm1869_vm6, %v1854_v54 }
 0x7b1   :  { %4665 = vmatmul.mubr.msk.f32.gmra.mxu1 %vm1869_vm6, %v1855_v22  ;;  %v5798_v57 = vpop.f32.mrf.mxu0 }
 0x7b2   :  { %4706 = vmatprep.mubr.msk.f32.mxu1 %vm5109_vm1, %v5108_v2 }
 0x7b3   :  { %v4680_v34 = vpop.f32.mrf.mxu0 }
 0x7b5   :  { %v5802_v62 = vpop.f32.mrf.mxu0 }
 0x7b7   :  { %v4683_v0 = vpop.f32.mrf.mxu0 }
 0x869   :  { %v4663_v41 = vpop.f32.mrf.mxu1 }
 0x86a   :  { %v1954_v36 = vadd.f32 %v4663_v41, %v4146_v37 }
 0x86b   :  { %v1948_v1 = vpop.f32.mrf.mxu1 }
 0x86c   :  { %v5808_v49 = vadd.f32 %v1954_v36, %v5734_v26  ;;  %v1949_v3 = vadd.f32 %v4146_v37, %v1948_v1  ;;  %v4151_v36 = vld [vmem:[%s6422_s4 + $0xc7] ss:$0 sm:$0xff] }
 0x86e   :  { %v5811_v46 = vadd.f32 %v1949_v3, %v5731_v55  ;;  %v1976_v23 = vsel %vm40_vm0, %v5808_v49, 0.0  ;;  %v1990_v16 = vmul.f32 %v5808_v49, %v5808_v49 }
 0x86f   :  { %1977 = vadd.xlane.f32.xlu1 %v1976_v23 }
 0x870   :  { %v1973_v7 = vsel %vm40_vm0, %v5811_v46, 0.0  ;;  %v1989_v18 = vmul.f32 %v5811_v46, %v5811_v46  ;;  %v1996_v45 = vsel %vm40_vm0, %v1990_v16, 0.0  ;;  %v4152_v16 = vld [vmem:[%s6422_s4 + $0xc8] ss:$0 sm:$0xff] }
 0x871   :  { %1974 = vadd.xlane.f32.xlu0 %v1973_v7  ;;  %v4666_v8 = vpop.f32.mrf.mxu1 }
 0x872   :  { %v1964_v5 = vadd.f32 %v4666_v8, %v4146_v37  ;;  %v1993_v11 = vsel %vm40_vm0, %v1989_v18, 0.0 }
 0x873   :  { %1997 = vadd.xlane.f32.xlu1 %v1996_v45  ;;  %v1958_v13 = vpop.f32.mrf.mxu1 }
 0x874   :  { %v5823_v14 = vadd.f32 %v1964_v5, %v5759_v63  ;;  %v1959_v20 = vadd.f32 %v4146_v37, %v1958_v13 }
 0x875   :  { %1994 = vadd.xlane.f32.xlu0 %v1993_v11 }
 0x876   :  { %v5827_v9 = vadd.f32 %v1959_v20, %v5751_v15  ;;  %v1982_v24 = vsel %vm40_vm0, %v5823_v14, 0.0  ;;  %v1992_v27 = vmul.f32 %v5823_v14, %v5823_v14 }
 0x877   :  { %1983 = vadd.xlane.f32.xlu1 %v1982_v24 }
 0x878   :  { %v1979_v55 = vsel %vm40_vm0, %v5827_v9, 0.0  ;;  %v1991_v17 = vmul.f32 %v5827_v9, %v5827_v9  ;;  %v2002_v26 = vsel %vm40_vm0, %v1992_v27, 0.0 }
 0x879   :  { %1980 = vadd.xlane.f32.xlu0 %v1979_v55 }
 0x87a   :  { %v1999_v21 = vsel %vm40_vm0, %v1991_v17, 0.0 }
 0x87b   :  { %2003 = vadd.xlane.f32.xlu1 %v2002_v26 }
 0x87d   :  { %2000 = vadd.xlane.f32.xlu0 %v1999_v21 }
 0x8f8   :  { %v1978_v59 = vpop.xlane.xlu1 %1977 }
 0x8f9   :  { %v1986_v32 = vmul.f32 0.03125, %v1978_v59 }
 0x8fa   :  { %v1975_v19 = vpop.xlane.xlu0 %1974 }
 0x8fb   :  { %v1985_v35 = vmul.f32 0.03125, %v1975_v19  ;;  %v2010_v52 = vmul.f32 %v1986_v32, %v1986_v32  ;;  %v2018_v37 = vsub.f32 %v5808_v49, %v1986_v32 }
 0x8fc   :  { %v1998_v15 = vpop.xlane.xlu1 %1997 }
 0x8fd   :  { %v2006_v40 = vmul.f32 0.03125, %v1998_v15  ;;  %v2009_v43 = vmul.f32 %v1985_v35, %v1985_v35  ;;  %v2017_v1 = vsub.f32 %v5811_v46, %v1985_v35 }
 0x8fe   :  { %v1995_v63 = vpop.xlane.xlu0 %1994 }
 0x8ff   :  { %v2014_v4 = vsub.f32 %v2006_v40, %v2010_v52  ;;  %v2005_v61 = vmul.f32 0.03125, %v1995_v63 }
 0x900   :  { %v1984_v6 = vpop.xlane.xlu1 %1983 }
 0x901   :  { %v2022_v53 = vadd.f32 1e-05, %v2014_v4  ;;  %v2013_v47 = vsub.f32 %v2005_v61, %v2009_v43  ;;  %v1988_v10 = vmul.f32 0.03125, %v1984_v6 }
 0x902   :  { %v1981_v58 = vpop.xlane.xlu0 %1980 }
 0x903   :  { %5018 = vrsqrt.f32 %v2022_v53  ;;  %v2021_v29 = vadd.f32 1e-05, %v2013_v47  ;;  %v1987_v60 = vmul.f32 0.03125, %v1981_v58  ;;  %v2012_v39 = vmul.f32 %v1988_v10, %v1988_v10 }
 0x904   :  { %v2004_v48 = vpop.xlane.xlu1 %2003  ;;  %v2020_v45 = vsub.f32 %v5823_v14, %v1988_v10  ;;  %v4157_v10 = vld [vmem:[%s6423_s5 + $0xc1] ss:$0 sm:$0xff] }
 0x905   :  { %5020 = vrsqrt.f32 %v2021_v29  ;;  %v2008_v33 = vmul.f32 0.03125, %v2004_v48  ;;  %v2011_v12 = vmul.f32 %v1987_v60, %v1987_v60  ;;  %v2019_v20 = vsub.f32 %v5827_v9, %v1987_v60 }
 0x906   :  { %v2001_v50 = vpop.xlane.xlu0 %2000 }
 0x907   :  { %v2016_v54 = vsub.f32 %v2008_v33, %v2012_v39  ;;  %v2007_v22 = vmul.f32 0.03125, %v2001_v50  ;;  %v4153_v33 = vld [vmem:[%s6423_s5 + $0xc0] ss:$0 sm:$0xff] }
 0x909   :  { %v2024_v56 = vadd.f32 1e-05, %v2016_v54  ;;  %v2015_v34 = vsub.f32 %v2007_v22, %v2011_v12  ;;  %v5901_v12 = vadd.f32 %v4153_v33, %v5794_v51  ;;  %v5909_v54 = vadd.f32 %v4153_v33, %v5798_v57  ;;  %v5925_v57 = vld [vmem:[%s6421_s3] sm:$0xff] }
 0x90a   :  { %v5916_v51 = vadd.f32 %v4153_v33, %v5802_v62  ;;  %v5931_v62 = vld [vmem:[%s6421_s3 + $0x8] sm:$0xff] }
 0x90b   :  { %5022 = vrsqrt.f32 %v2024_v56  ;;  %v2023_v0 = vadd.f32 1e-05, %v2015_v34 }
 0x90d   :  { %5024 = vrsqrt.f32 %v2023_v0 }
 0x910   :  { %v5019_v41 = vpop.eup %5018 }
 0x911   :  { %v2030_v3 = vmul.f32 %v5019_v41, %v2018_v37 }
 0x912   :  { %v5021_v23 = vpop.eup %5020 }
 0x913   :  { %v2029_v7 = vmul.f32 %v5021_v23, %v2017_v1  ;;  %v2038_v18 = vmul.f32 %v4151_v36, %v2030_v3  ;;  %v5938_v1 = vld [vmem:[%s6421_s3 + $0x10] sm:$0xff] }
 0x915   :  { %v2037_v8 = vmul.f32 %v4151_v36, %v2029_v7  ;;  %v2046_v5 = vadd.f32 %v4152_v16, %v2038_v18 }
 0x917   :  { %v2045_v49 = vadd.f32 %v4152_v16, %v2037_v8  ;;  %v3683_v11 = vsel %vm40_vm0, %v2046_v5, 0.0 }
 0x918   :  { %v5023_v13 = vpop.eup %5022 }
 0x919   :  { %4692 = vmatprep.mubr.msk.f32.mxu0 %vm40_vm0, %v2045_v49  ;;  %v3682_v46 = vsel %vm40_vm0, %v2045_v49, 0.0  ;;  %v2032_v24 = vmul.f32 %v5023_v13, %v2020_v45 }
 0x91a   :  { %v5025_v27 = vpop.eup %5024  ;;  %v3684_v55 = vadd.f32 %v3683_v11, %v3682_v46  ;;  %4693 = vmatmul.mubr.msk.f32.vlgmr.msra.gmra.mxu0 %vm40_vm0, %v2046_v5 }
 0x91b   :  { %v2031_v17 = vmul.f32 %v5025_v27, %v2019_v20  ;;  %v2040_v26 = vmul.f32 %v4151_v36, %v2032_v24 }
 0x91c   :  { %v3685_v21 = vrot.slane %v3684_v55, 4 }
 0x91d   :  { %v2039_v30 = vmul.f32 %v4151_v36, %v2031_v17  ;;  %v2048_v14 = vadd.f32 %v4152_v16, %v2040_v26 }
 0x91e   :  { %v3686_v28 = vadd.f32 %v3685_v21, %v3684_v55 }
 0x91f   :  { %v2047_v31 = vadd.f32 %v4152_v16, %v2039_v30  ;;  %v3692_v25 = vsel %vm40_vm0, %v2048_v14, 0.0 }
 0x920   :  { %v3687_v59 = vrot.slane %v3686_v28, 2 }
 0x921   :  { %4695 = vmatprep.mubr.msk.f32.mxu0 %vm40_vm0, %v2047_v31  ;;  %v3691_v9 = vsel %vm40_vm0, %v2047_v31, 0.0 }
 0x922   :  { %4696 = vmatmul.mubr.msk.f32.gmra.mxu0 %vm40_vm0, %v2048_v14  ;;  %v3693_v32 = vadd.f32 %v3692_v25, %v3691_v9  ;;  %v3688_v35 = vadd.f32 %v3687_v59, %v3686_v28 }
 0x923   :  { %4723 = vmatprep.mubr.msk.f32.mxu0 %vm5109_vm1, %v5108_v2 }
 0x924   :  { %v3694_v19 = vrot.slane %v3693_v32, 4  ;;  %v3689_v40 = vrot.slane %v3688_v35, 1 }
 0x926   :  { %v3695_v15 = vadd.f32 %v3694_v19, %v3693_v32  ;;  %v3690_v4 = vadd.f32 %v3689_v40, %v3688_v35 }
 0x928   :  { %v3696_v52 = vrot.slane %v3695_v15, 2 }
 0x92a   :  { %v3697_v63 = vadd.f32 %v3696_v52, %v3695_v15 }
 0x92c   :  { %v3698_v43 = vrot.slane %v3697_v63, 1 }
 0x92e   :  { %v3699_v61 = vadd.f32 %v3698_v43, %v3697_v63 }
 0x930   :  { %v5873_v6 = vsel %vm3700_vm7, %v3690_v4, %v3699_v61 }
 0x9da   :  { %v4694_v53 = vpop.f32.mrf.mxu0 }
 0x9db   :  { %v5888_v39 = vadd.f32 %v4694_v53, %v4157_v10 }
 0x9dc   :  { %v2228_v47 = vpop.f32.mrf.mxu0 }
 0x9dd   :  { %v5896_v50 = vadd.f32 %v4157_v10, %v2228_v47 }
 0x9e2   :  { %v4697_v58 = vpop.f32.mrf.mxu0 }
 0x9e3   :  { %v5878_v29 = vadd.f32 %v4697_v58, %v4157_v10 }
 0x9e4   :  { %v2238_v60 = vpop.f32.mrf.mxu0 }
 0x9e5   :  { %4699 = vmatpush3.xpose.msk.msra.mxu1 %vm450_vm3, %v5878_v29  ;;  %v5883_v48 = vadd.f32 %v4157_v10, %v2238_v60 }
 0x9e6   :  { %4700 = vmatprep.subr.mxu1 %v5108_v2 }
 0x9e9   :  { %4701 = vmatpush3.xpose.msk.msra.mxu1 %vm450_vm3, %v5883_v48 }
 0x9ea   :  { %4702 = vmatprep.subr.mxu1 %v5108_v2 }
 0x9ed   :  { %4703 = vmatpush3.xpose.msk.msra.mxu1 %vm450_vm3, %v5888_v39 }
 0x9ee   :  { %4704 = vmatprep.subr.mxu1 %v5108_v2 }
 0x9f1   :  { %4705 = vmatpush3.xpose.msk.msra.mxu1 %vm450_vm3, %v5896_v50 }
 0x9f2   :  { %4749 = vmatprep.subr.mxu1 %v5108_v2 }
 0x9f4   :  { %4707 = vmatmul.mubr.msk.f32.vlgmr.msra.gmra.mxu1 %vm450_vm3, %v5901_v12 }
 0x9f5   :  { %4709 = vmatprep.mubr.msk.f32.mxu1 %vm5109_vm1, %v5108_v2 }
 0x9f8   :  { %4710 = vmatmul.mubr.msk.f32.gmra.mxu1 %vm450_vm3, %v5909_v54 }
 0x9f9   :  { %4712 = vmatprep.mubr.msk.f32.mxu1 %vm5109_vm1, %v5108_v2 }
 0x9fc   :  { %4713 = vmatmul.mubr.msk.f32.gmra.mxu1 %vm450_vm3, %v5916_v51 }
 0x9fd   :  { %4757 = vmatprep.mubr.msk.f32.mxu1 %vm5109_vm1, %v5108_v2 }
 0xab4   :  { %v2334_v22 = vpop.f32.mrf.mxu1 }
 0xab5   :  { %v2335_v56 = vadd.f32 %v2334_v22, %v5925_v57 }
 0xab6   :  { %v4708_v34 = vpop.f32.mrf.mxu1 }
 0xab7   :  { %v2348_v0 = vsel %vm40_vm0, %v2335_v56, -inf }
 0xab8   :  { %2349 = vmax.xlane.f32.xlu0 %v2348_v0  ;;  %v2339_v37 = vpop.f32.mrf.mxu1 }
 0xab9   :  { %v2340_v41 = vadd.f32 %v2339_v37, %v5931_v62 }
 0xaba   :  { %v4711_v36 = vpop.f32.mrf.mxu1 }
 0xabb   :  { %v2351_v3 = vsel %vm40_vm0, %v2340_v41, -inf }
 0xabc   :  { %2352 = vmax.xlane.f32.xlu1 %v2351_v3  ;;  %v2344_v23 = vpop.f32.mrf.mxu1 }
 0xabd   :  { %v2345_v16 = vadd.f32 %v2344_v23, %v5938_v1 }
 0xabe   :  { %v4714_v7 = vpop.f32.mrf.mxu1 }
 0xabf   :  { %v2354_v18 = vsel %vm40_vm0, %v2345_v16, -inf }
 0xac0   :  { %2355 = vmax.xlane.f32.xlu0 %v2354_v18 }
 0xacd   :  { %2385 = vrot.lane.b32.xlu1 %v5883_v48, %s5113_s13 }
 0xad1   :  { %2383 = vrot.lane.b32.xlu1 %v5888_v39, %s5113_s13 }
 0xad5   :  { %2494 = vrot.lane.b32.xlu1 %v5878_v29, %s5110_s10 }
 0xad6   :  { %2387 = vrot.lane.b32.xlu0 %v5878_v29, %s5113_s13 }
 0xada   :  { %2381 = vrot.lane.b32.xlu0 %v5896_v50, %s5113_s13 }
 0xb41   :  { %v2350_v8 = vpop.xlane.xlu0 %2349 }
 0xb42   :  { %v2357_v5 = vsub.f32 %v2335_v56, %v2350_v8 }
 0xb44   :  { %v2360_v45 = vmul.f32 1.442695, %v2357_v5 }
 0xb45   :  { %v2353_v49 = vpop.xlane.xlu1 %2352 }
 0xb46   :  { %5026 = vpow2.f32 %v2360_v45  ;;  %v2358_v13 = vsub.f32 %v2340_v41, %v2353_v49 }
 0xb48   :  { %v2362_v20 = vmul.f32 1.442695, %v2358_v13 }
 0xb49   :  { %v2356_v46 = vpop.xlane.xlu0 %2355  ;;  %v2386_v11 = vpop.permute.xlu1 %2385 }
 0xb4a   :  { %5028 = vpow2.f32 %v2362_v20  ;;  %v2359_v14 = vsub.f32 %v2345_v16, %v2356_v46 }
 0xb4c   :  { %v2364_v28 = vmul.f32 1.442695, %v2359_v14 }
 0xb4d   :  { %v2388_v24 = vpop.permute.xlu0 %2387  ;;  %v2384_v27 = vpop.permute.xlu1 %2383 }
 0xb4e   :  { %4716 = vmatpush3.msra.mxu0 %v2388_v24  ;;  %5030 = vpow2.f32 %v2364_v28 }
 0xb4f   :  { %4717 = vmatprep.subr.mxu0 %v5108_v2 }
 0xb50   :  { %4718 = vmatpush3.msra.mxu0 %v2386_v11 }
 0xb51   :  { %4719 = vmatprep.subr.mxu0 %v5108_v2  ;;  %v2382_v17 = vpop.permute.xlu0 %2381  ;;  %v2495_v25 = vpop.permute.xlu1 %2494 }
 0xb52   :  { %4720 = vmatpush3.msra.mxu0 %v2384_v27 }
 0xb53   :  { %v5027_v55 = vpop.eup %5026  ;;  %4721 = vmatprep.subr.mxu0 %v5108_v2 }
 0xb54   :  { %4722 = vmatpush3.msra.mxu0 %v2382_v17  ;;  %v2366_v26 = vsel %vm40_vm0, %v5027_v55, 0.0 }
 0xb55   :  { %2367 = vadd.xlane.f32.xlu1 %v2366_v26  ;;  %4732 = vmatprep.subr.mxu0 %v5108_v2 }
 0xb57   :  { %v5029_v21 = vpop.eup %5028 }
 0xb58   :  { %v2369_v30 = vsel %vm40_vm0, %v5029_v21, 0.0 }
 0xb59   :  { %2370 = vadd.xlane.f32.xlu0 %v2369_v30 }
 0xb5b   :  { %v5031_v31 = vpop.eup %5030 }
 0xb5c   :  { %v2372_v9 = vsel %vm40_vm0, %v5031_v31, 0.0 }
 0xb66   :  { %2490 = vrot.lane.b32.xlu1 %v5888_v39, %s5110_s10 }
 0xb6f   :  { %2492 = vrot.lane.b32.xlu0 %v5883_v48, %s5110_s10 }
 0xb73   :  { %2488 = vrot.lane.b32.xlu0 %v5896_v50, %s5110_s10 }
 0xb77   :  { %2484 = vrot.lane.b32.xlu0 %v5909_v54, %s5110_s10 }
 0xb8a   :  { %2373 = vadd.xlane.f32.xlu1 %v2372_v9 }
 0xb9b   :  { %2482 = vrot.lane.b32.xlu1 %v5901_v12, %s5110_s10 }
 0xb9f   :  { %2486 = vrot.lane.b32.xlu1 %v5916_v51, %s5110_s10 }
 0xbde   :  { %v2368_v59 = vpop.xlane.xlu1 %2367 }
 0xbdf   :  { %5032 = vrcp.f32 %v2368_v59 }
 0xbe2   :  { %v2371_v32 = vpop.xlane.xlu0 %2370  ;;  %v2491_v63 = vpop.permute.xlu1 %2490 }
 0xbe3   :  { %5034 = vrcp.f32 %v2371_v32 }
 0xbe6   :  { %v2493_v40 = vpop.permute.xlu0 %2492 }
 0xbea   :  { %v2489_v43 = vpop.permute.xlu0 %2488 }
 0xbec   :  { %v5033_v19 = vpop.eup %5032 }
 0xbed   :  { %v2378_v35 = vmul.f32 %v5033_v19, %v5027_v55 }
 0xbee   :  { %v2485_v10 = vpop.permute.xlu0 %2484 }
 0xbef   :  { %4724 = vmatmul.mubr.msk.f32.vlgmr.msra.gmra.mxu0 %vm40_vm0, %v2378_v35 }
 0xbf0   :  { %v5035_v15 = vpop.eup %5034  ;;  %4733 = vmatpush3.xpose.msk.msra.mxu0 %vm450_vm3, %v2495_v25  ;;  %4726 = vmatprep.mubr.msk.f32.mxu0 %vm5109_vm1, %v5108_v2 }
 0xbf1   :  { %4734 = vmatprep.subr.mxu0 %v5108_v2  ;;  %v2379_v52 = vmul.f32 %v5035_v15, %v5029_v21 }
 0xbf3   :  { %4727 = vmatmul.mubr.msk.f32.gmra.mxu0 %vm40_vm0, %v2379_v52 }
 0xbf4   :  { %4735 = vmatpush3.xpose.msk.msra.mxu0 %vm450_vm3, %v2493_v40  ;;  %4729 = vmatprep.mubr.msk.f32.mxu0 %vm5109_vm1, %v5108_v2 }
 0xbf5   :  { %4736 = vmatprep.subr.mxu0 %v5108_v2 }
 0xbf8   :  { %4737 = vmatpush3.xpose.msk.msra.mxu0 %vm450_vm3, %v2491_v63 }
 0xbf9   :  { %4738 = vmatprep.subr.mxu0 %v5108_v2 }
 0xbfc   :  { %4739 = vmatpush3.xpose.msk.msra.mxu0 %vm450_vm3, %v2489_v43 }
 0xbfd   :  { %4783 = vmatprep.subr.mxu0 %v5108_v2 }
 0xc13   :  { %v2374_v4 = vpop.xlane.xlu1 %2373 }
 0xc14   :  { %5036 = vrcp.f32 %v2374_v4 }
 0xc17   :  { %v2483_v47 = vpop.permute.xlu1 %2482 }
 0xc1b   :  { %v2487_v58 = vpop.permute.xlu1 %2486 }
 0xc21   :  { %v5037_v61 = vpop.eup %5036 }
 0xc22   :  { %v2380_v53 = vmul.f32 %v5037_v61, %v5031_v31 }
 0xc24   :  { %4730 = vmatmul.mubr.msk.f32.gmra.mxu0 %vm40_vm0, %v2380_v53 }
 0xc25   :  { %4740 = vmatprep.mubr.msk.f32.mxu0 %vm5109_vm1, %v5108_v2 }
 0xc28   :  { %4741 = vmatmul.mubr.msk.f32.vlgmr.msra.gmra.mxu0 %vm450_vm3, %v2483_v47 }
 0xc29   :  { %4743 = vmatprep.mubr.msk.f32.mxu0 %vm5109_vm1, %v5108_v2 }
 0xc2c   :  { %4744 = vmatmul.mubr.msk.f32.gmra.mxu0 %vm450_vm3, %v2485_v10 }
 0xc2d   :  { %4746 = vmatprep.mubr.msk.f32.mxu0 %vm5109_vm1, %v5108_v2 }
 0xc30   :  { %4747 = vmatmul.mubr.msk.f32.gmra.mxu0 %vm450_vm3, %v2487_v58 }
 0xc31   :  { %4791 = vmatprep.mubr.msk.f32.mxu0 %vm5109_vm1, %v5108_v2 }
 0xcaf   :  { %v5998_v60 = vpop.f32.mrf.mxu0 }
 0xcb1   :  { %v4725_v33 = vpop.f32.mrf.mxu0 }
 0xcb3   :  { %v6000_v22 = vpop.f32.mrf.mxu0 }
 0xcb5   :  { %v4728_v56 = vpop.f32.mrf.mxu0 }
 0xce4   :  { %v6002_v34 = vpop.f32.mrf.mxu0 }
 0xce6   :  { %v4731_v0 = vpop.f32.mrf.mxu0 }
 0xce8   :  { %v2576_v37 = vpop.f32.mrf.mxu0 }
 0xce9   :  { %v2577_v41 = vadd.f32 %v2576_v37, %v5925_v57 }
 0xcea   :  { %v4742_v36 = vpop.f32.mrf.mxu0 }
 0xceb   :  { %v2590_v3 = vsel %vm40_vm0, %v2577_v41, -inf }
 0xcec   :  { %2591 = vmax.xlane.f32.xlu0 %v2590_v3  ;;  %v2581_v23 = vpop.f32.mrf.mxu0 }
 0xced   :  { %v2582_v16 = vadd.f32 %v2581_v23, %v5931_v62 }
 0xcee   :  { %v4745_v7 = vpop.f32.mrf.mxu0 }
 0xcef   :  { %v2593_v18 = vsel %vm40_vm0, %v2582_v16, -inf }
 0xcf0   :  { %2594 = vmax.xlane.f32.xlu1 %v2593_v18  ;;  %v2586_v8 = vpop.f32.mrf.mxu0 }
 0xcf1   :  { %v2587_v5 = vadd.f32 %v2586_v8, %v5938_v1 }
 0xcf2   :  { %v4748_v45 = vpop.f32.mrf.mxu0 }
 0xcf3   :  { %v2596_v49 = vsel %vm40_vm0, %v2587_v5, -inf }
 0xcf4   :  { %2597 = vmax.xlane.f32.xlu0 %v2596_v49 }
 0xd01   :  { %2629 = vrot.lane.b32.xlu1 %v5878_v29, %s5114_s14 }
 0xd05   :  { %2625 = vrot.lane.b32.xlu1 %v5888_v39, %s5114_s14 }
 0xd09   :  { %2623 = vrot.lane.b32.xlu1 %v5896_v50, %s5114_s14 }
 0xd0a   :  { %2627 = vrot.lane.b32.xlu0 %v5883_v48, %s5114_s14 }
 0xd0d   :  { %2734 = vrot.lane.b32.xlu1 %v5883_v48, %s5111_s11 }
 0xd75   :  { %v2592_v13 = vpop.xlane.xlu0 %2591 }
 0xd76   :  { %v2599_v20 = vsub.f32 %v2577_v41, %v2592_v13 }
 0xd78   :  { %v2602_v46 = vmul.f32 1.442695, %v2599_v20 }
 0xd79   :  { %v2595_v11 = vpop.xlane.xlu1 %2594 }
 0xd7a   :  { %5038 = vpow2.f32 %v2602_v46  ;;  %v2600_v24 = vsub.f32 %v2582_v16, %v2595_v11 }
 0xd7c   :  { %v2604_v27 = vmul.f32 1.442695, %v2600_v24 }
 0xd7d   :  { %v2630_v55 = vpop.permute.xlu1 %2629  ;;  %v2598_v17 = vpop.xlane.xlu0 %2597 }
 0xd7e   :  { %5040 = vpow2.f32 %v2604_v27  ;;  %4750 = vmatpush3.msra.mxu1 %v2630_v55  ;;  %v2601_v25 = vsub.f32 %v2587_v5, %v2598_v17 }
 0xd7f   :  { %4751 = vmatprep.subr.mxu1 %v5108_v2 }
 0xd80   :  { %v2606_v59 = vmul.f32 1.442695, %v2601_v25 }
 0xd81   :  { %v2626_v26 = vpop.permute.xlu1 %2625  ;;  %v2628_v21 = vpop.permute.xlu0 %2627 }
 0xd82   :  { %4752 = vmatpush3.msra.mxu1 %v2628_v21  ;;  %5042 = vpow2.f32 %v2606_v59 }
 0xd83   :  { %4753 = vmatprep.subr.mxu1 %v5108_v2 }
 0xd84   :  { %4754 = vmatpush3.msra.mxu1 %v2626_v26 }
 0xd85   :  { %v2624_v30 = vpop.permute.xlu1 %2623  ;;  %4755 = vmatprep.subr.mxu1 %v5108_v2 }
 0xd86   :  { %4756 = vmatpush3.msra.mxu1 %v2624_v30 }
 0xd87   :  { %v5039_v14 = vpop.eup %5038  ;;  %4766 = vmatprep.subr.mxu1 %v5108_v2 }
 0xd88   :  { %v2608_v28 = vsel %vm40_vm0, %v5039_v14, 0.0 }
 0xd89   :  { %2609 = vadd.xlane.f32.xlu0 %v2608_v28  ;;  %v2735_v35 = vpop.permute.xlu1 %2734 }
 0xd8b   :  { %v5041_v31 = vpop.eup %5040 }
 0xd8c   :  { %v2611_v9 = vsel %vm40_vm0, %v5041_v31, 0.0 }
 0xd8d   :  { %2612 = vadd.xlane.f32.xlu1 %v2611_v9 }
 0xd8f   :  { %v5043_v32 = vpop.eup %5042 }
 0xd90   :  { %v2614_v19 = vsel %vm40_vm0, %v5043_v32, 0.0 }
 0xd9e   :  { %2730 = vrot.lane.b32.xlu1 %v5896_v50, %s5111_s11 }
 0xd9f   :  { %2736 = vrot.lane.b32.xlu0 %v5878_v29, %s5111_s11 }
 0xda2   :  { %2726 = vrot.lane.b32.xlu1 %v5909_v54, %s5111_s11 }
 0xdbe   :  { %2615 = vadd.xlane.f32.xlu0 %v2614_v19 }
 0xdd4   :  { %2732 = vrot.lane.b32.xlu0 %v5888_v39, %s5111_s11 }
 0xdd8   :  { %2724 = vrot.lane.b32.xlu0 %v5901_v12, %s5111_s11 }
 0xddc   :  { %2728 = vrot.lane.b32.xlu0 %v5916_v51, %s5111_s11 }
 0xe12   :  { %v2610_v15 = vpop.xlane.xlu0 %2609 }
 0xe13   :  { %5044 = vrcp.f32 %v2610_v15 }
 0xe16   :  { %v2613_v52 = vpop.xlane.xlu1 %2612  ;;  %v2737_v43 = vpop.permute.xlu0 %2736 }
 0xe17   :  { %5046 = vrcp.f32 %v2613_v52 }
 0xe1a   :  { %v2731_v10 = vpop.permute.xlu1 %2730 }
 0xe1e   :  { %v2727_v0 = vpop.permute.xlu1 %2726 }
 0xe20   :  { %v5045_v40 = vpop.eup %5044 }
 0xe21   :  { %v2620_v63 = vmul.f32 %v5045_v40, %v5039_v14 }
 0xe23   :  { %4758 = vmatmul.mubr.msk.f32.vlgmr.msra.gmra.mxu1 %vm40_vm0, %v2620_v63 }
 0xe24   :  { %v5047_v4 = vpop.eup %5046  ;;  %4767 = vmatpush3.xpose.msk.msra.mxu1 %vm450_vm3, %v2737_v43  ;;  %4760 = vmatprep.mubr.msk.f32.mxu1 %vm5109_vm1, %v5108_v2 }
 0xe25   :  { %4768 = vmatprep.subr.mxu1 %v5108_v2  ;;  %v2621_v61 = vmul.f32 %v5047_v4, %v5041_v31 }
 0xe27   :  { %4761 = vmatmul.mubr.msk.f32.gmra.mxu1 %vm40_vm0, %v2621_v61 }
 0xe28   :  { %4769 = vmatpush3.xpose.msk.msra.mxu1 %vm450_vm3, %v2735_v35  ;;  %4763 = vmatprep.mubr.msk.f32.mxu1 %vm5109_vm1, %v5108_v2 }
 0xe29   :  { %4770 = vmatprep.subr.mxu1 %v5108_v2 }
 0xe47   :  { %v2616_v53 = vpop.xlane.xlu0 %2615 }
 0xe48   :  { %5048 = vrcp.f32 %v2616_v53 }
 0xe4b   :  { %v2733_v47 = vpop.permute.xlu0 %2732 }
 0xe4c   :  { %4771 = vmatpush3.xpose.msk.msra.mxu1 %vm450_vm3, %v2733_v47 }
 0xe4d   :  { %4772 = vmatprep.subr.mxu1 %v5108_v2 }
 0xe4f   :  { %v2725_v56 = vpop.permute.xlu0 %2724 }
 0xe50   :  { %4773 = vmatpush3.xpose.msk.msra.mxu1 %vm450_vm3, %v2731_v10 }
 0xe51   :  { %4817 = vmatprep.subr.mxu1 %v5108_v2 }
 0xe53   :  { %v2729_v37 = vpop.permute.xlu0 %2728 }
 0xe55   :  { %v5049_v58 = vpop.eup %5048 }
 0xe56   :  { %v2622_v33 = vmul.f32 %v5049_v58, %v5043_v32 }
 0xe58   :  { %4764 = vmatmul.mubr.msk.f32.gmra.mxu1 %vm40_vm0, %v2622_v33 }
 0xe59   :  { %4774 = vmatprep.mubr.msk.f32.mxu1 %vm5109_vm1, %v5108_v2 }
 0xe5c   :  { %4775 = vmatmul.mubr.msk.f32.vlgmr.msra.gmra.mxu1 %vm450_vm3, %v2725_v56 }
 0xe5d   :  { %4777 = vmatprep.mubr.msk.f32.mxu1 %vm5109_vm1, %v5108_v2 }
 0xe60   :  { %4778 = vmatmul.mubr.msk.f32.gmra.mxu1 %vm450_vm3, %v2727_v0 }
 0xe61   :  { %4780 = vmatprep.mubr.msk.f32.mxu1 %vm5109_vm1, %v5108_v2 }
 0xe64   :  { %4781 = vmatmul.mubr.msk.f32.gmra.mxu1 %vm450_vm3, %v2729_v37 }
 0xe65   :  { %4825 = vmatprep.mubr.msk.f32.mxu1 %vm5109_vm1, %v5108_v2 }
 0xee3   :  { %v6065_v41 = vpop.f32.mrf.mxu1 }
 0xee5   :  { %v4759_v36 = vpop.f32.mrf.mxu1 }
 0xee7   :  { %v6067_v3 = vpop.f32.mrf.mxu1 }
 0xee9   :  { %v4762_v23 = vpop.f32.mrf.mxu1 }
 0xf18   :  { %v6069_v16 = vpop.f32.mrf.mxu1 }
 0xf1a   :  { %v4765_v7 = vpop.f32.mrf.mxu1 }
 0xf1c   :  { %v2818_v18 = vpop.f32.mrf.mxu1 }
 0xf1d   :  { %v2819_v8 = vadd.f32 %v2818_v18, %v5925_v57 }
 0xf1e   :  { %v4776_v5 = vpop.f32.mrf.mxu1 }
 0xf1f   :  { %v2832_v45 = vsel %vm40_vm0, %v2819_v8, -inf }
 0xf20   :  { %2833 = vmax.xlane.f32.xlu1 %v2832_v45  ;;  %v2823_v49 = vpop.f32.mrf.mxu1 }
 0xf21   :  { %v2824_v13 = vadd.f32 %v2823_v49, %v5931_v62 }
 0xf22   :  { %v4779_v20 = vpop.f32.mrf.mxu1 }
 0xf23   :  { %v2835_v46 = vsel %vm40_vm0, %v2824_v13, -inf }
 0xf24   :  { %2836 = vmax.xlane.f32.xlu0 %v2835_v46  ;;  %v2828_v11 = vpop.f32.mrf.mxu1 }
 0xf25   :  { %v2829_v24 = vadd.f32 %v2828_v11, %v5938_v1 }
 0xf26   :  { %v4782_v27 = vpop.f32.mrf.mxu1 }
 0xf27   :  { %v2838_v55 = vsel %vm40_vm0, %v2829_v24, -inf }
 0xf28   :  { %2839 = vmax.xlane.f32.xlu0 %v2838_v55 }
 0xf31   :  { %2869 = vrot.lane.b32.xlu1 %v5883_v48, %s5115_s15 }
 0xf35   :  { %2867 = vrot.lane.b32.xlu1 %v5888_v39, %s5115_s15 }
 0xf39   :  { %2978 = vrot.lane.b32.xlu1 %v5878_v29, %s5112_s12 }
 0xf3e   :  { %2871 = vrot.lane.b32.xlu0 %v5878_v29, %s5115_s15 }
 0xf42   :  { %2865 = vrot.lane.b32.xlu0 %v5896_v50, %s5115_s15 }
 0xfa9   :  { %v2834_v17 = vpop.xlane.xlu1 %2833 }
 0xfaa   :  { %v2841_v26 = vsub.f32 %v2819_v8, %v2834_v17 }
 0xfac   :  { %v2844_v21 = vmul.f32 1.442695, %v2841_v26 }
 0xfad   :  { %v2837_v30 = vpop.xlane.xlu0 %2836  ;;  %v2870_v9 = vpop.permute.xlu1 %2869 }
 0xfae   :  { %5050 = vpow2.f32 %v2844_v21  ;;  %v2842_v14 = vsub.f32 %v2824_v13, %v2837_v30 }
 0xfb0   :  { %v2846_v28 = vmul.f32 1.442695, %v2842_v14 }
 0xfb1   :  { %v2840_v31 = vpop.xlane.xlu0 %2839  ;;  %v2868_v59 = vpop.permute.xlu1 %2867 }
 0xfb2   :  { %5052 = vpow2.f32 %v2846_v28  ;;  %v2843_v40 = vsub.f32 %v2829_v24, %v2840_v31 }
 0xfb4   :  { %v2848_v63 = vmul.f32 1.442695, %v2843_v40 }
 0xfb5   :  { %v2872_v25 = vpop.permute.xlu0 %2871  ;;  %v2979_v61 = vpop.permute.xlu1 %2978 }
 0xfb6   :  { %4784 = vmatpush3.msra.mxu0 %v2872_v25  ;;  %5054 = vpow2.f32 %v2848_v63 }
 0xfb7   :  { %4785 = vmatprep.subr.mxu0 %v5108_v2 }
 0xfb8   :  { %4786 = vmatpush3.msra.mxu0 %v2870_v9 }
 0xfb9   :  { %4787 = vmatprep.subr.mxu0 %v5108_v2  ;;  %v2866_v19 = vpop.permute.xlu0 %2865 }
 0xfba   :  { %4788 = vmatpush3.msra.mxu0 %v2868_v59 }
 0xfbb   :  { %v5051_v32 = vpop.eup %5050  ;;  %4789 = vmatprep.subr.mxu0 %v5108_v2 }
 0xfbc   :  { %4790 = vmatpush3.msra.mxu0 %v2866_v19  ;;  %v2850_v35 = vsel %vm40_vm0, %v5051_v32, 0.0 }
 0xfbd   :  { %2851 = vadd.xlane.f32.xlu1 %v2850_v35  ;;  %4800 = vmatprep.subr.mxu0 %v5108_v2 }
 0xfbf   :  { %v5053_v15 = vpop.eup %5052 }
 0xfc0   :  { %v2853_v52 = vsel %vm40_vm0, %v5053_v15, 0.0 }
 0xfc1   :  { %2854 = vadd.xlane.f32.xlu0 %v2853_v52 }
 0xfc3   :  { %v5055_v43 = vpop.eup %5054 }
 0xfc4   :  { %v2856_v4 = vsel %vm40_vm0, %v5055_v43, 0.0 }
 0xfce   :  { %2974 = vrot.lane.b32.xlu1 %v5888_v39, %s5112_s12 }
 0xfd7   :  { %2976 = vrot.lane.b32.xlu0 %v5883_v48, %s5112_s12 }
 0xfdb   :  { %2972 = vrot.lane.b32.xlu0 %v5896_v50, %s5112_s12 }
 0xfdf   :  { %2968 = vrot.lane.b32.xlu0 %v5909_v54, %s5112_s12 }
 0xff2   :  { %2857 = vadd.xlane.f32.xlu1 %v2856_v4 }
0x1003   :  { %2966 = vrot.lane.b32.xlu1 %v5901_v12, %s5112_s12 }
0x1007   :  { %2970 = vrot.lane.b32.xlu1 %v5916_v51, %s5112_s12 }
0x1046   :  { %v2852_v53 = vpop.xlane.xlu1 %2851 }
0x1047   :  { %5056 = vrcp.f32 %v2852_v53 }
0x104a   :  { %v2855_v47 = vpop.xlane.xlu0 %2854  ;;  %v2975_v51 = vpop.permute.xlu1 %2974 }
0x104b   :  { %5058 = vrcp.f32 %v2855_v47 }
0x104e   :  { %v2977_v33 = vpop.permute.xlu0 %2976 }
0x1052   :  { %v2973_v56 = vpop.permute.xlu0 %2972 }
0x1054   :  { %v5057_v10 = vpop.eup %5056 }
0x1055   :  { %v2862_v58 = vmul.f32 %v5057_v10, %v5051_v32 }
0x1056   :  { %v2969_v7 = vpop.permute.xlu0 %2968 }
0x1057   :  { %4792 = vmatmul.mubr.msk.f32.vlgmr.msra.gmra.mxu0 %vm40_vm0, %v2862_v58 }
0x1058   :  { %v5059_v54 = vpop.eup %5058  ;;  %4801 = vmatpush3.xpose.msk.msra.mxu0 %vm450_vm3, %v2979_v61  ;;  %4794 = vmatprep.mubr.msk.f32.mxu0 %vm5109_vm1, %v5108_v2 }
0x1059   :  { %4802 = vmatprep.subr.mxu0 %v5108_v2  ;;  %v2863_v12 = vmul.f32 %v5059_v54, %v5053_v15 }
0x105b   :  { %4795 = vmatmul.mubr.msk.f32.gmra.mxu0 %vm40_vm0, %v2863_v12 }
0x105c   :  { %4803 = vmatpush3.xpose.msk.msra.mxu0 %vm450_vm3, %v2977_v33  ;;  %4797 = vmatprep.mubr.msk.f32.mxu0 %vm5109_vm1, %v5108_v2  ;;  %v3256_v33 = vld [vmem:[%s6423_s5 + $0x58] sm:$0xff] }
0x105d   :  { %4804 = vmatprep.subr.mxu0 %v5108_v2 }
0x1060   :  { %4805 = vmatpush3.xpose.msk.msra.mxu0 %vm450_vm3, %v2975_v51  ;;  %v3255_v51 = vld [vmem:[%s6423_s5 + $0x50] sm:$0xff] }
0x1061   :  { %4806 = vmatprep.subr.mxu0 %v5108_v2 }
0x1064   :  { %4807 = vmatpush3.xpose.msk.msra.mxu0 %vm450_vm3, %v2973_v56  ;;  %v3254_v56 = vld [vmem:[%s6423_s5 + $0x48] sm:$0xff] }
0x1065   :  { %4851 = vmatprep.subr.mxu0 %v5108_v2 }
0x107b   :  { %v2858_v0 = vpop.xlane.xlu1 %2857 }
0x107c   :  { %5060 = vrcp.f32 %v2858_v0  ;;  %v3253_v0 = vld [vmem:[%s6423_s5 + $0x40] sm:$0xff] }
0x107f   :  { %v2967_v23 = vpop.permute.xlu1 %2966 }
0x1083   :  { %v2971_v18 = vpop.permute.xlu1 %2970 }
0x1089   :  { %v5061_v37 = vpop.eup %5060 }
0x108a   :  { %v2864_v36 = vmul.f32 %v5061_v37, %v5055_v43 }
0x108c   :  { %4798 = vmatmul.mubr.msk.f32.gmra.mxu0 %vm40_vm0, %v2864_v36 }
0x108d   :  { %4808 = vmatprep.mubr.msk.f32.mxu0 %vm5109_vm1, %v5108_v2 }
0x1090   :  { %4809 = vmatmul.mubr.msk.f32.vlgmr.msra.gmra.mxu0 %vm450_vm3, %v2967_v23 }
0x1091   :  { %4811 = vmatprep.mubr.msk.f32.mxu0 %vm5109_vm1, %v5108_v2 }
0x1094   :  { %4812 = vmatmul.mubr.msk.f32.gmra.mxu0 %vm450_vm3, %v2969_v7 }
0x1095   :  { %4814 = vmatprep.mubr.msk.f32.mxu0 %vm5109_vm1, %v5108_v2 }
0x1098   :  { %4815 = vmatmul.mubr.msk.f32.gmra.mxu0 %vm450_vm3, %v2971_v18 }
0x1099   :  { %4859 = vmatprep.mubr.msk.f32.mxu0 %vm5109_vm1, %v5108_v2 }
0x1117   :  { %v2952_v8 = vpop.f32.mrf.mxu0 }
0x1119   :  { %v4793_v5 = vpop.f32.mrf.mxu0 }
0x111b   :  { %v2957_v45 = vpop.f32.mrf.mxu0 }
0x111d   :  { %v4796_v49 = vpop.f32.mrf.mxu0 }
0x114c   :  { %v6132_v13 = vpop.f32.mrf.mxu0 }
0x114e   :  { %v4799_v20 = vpop.f32.mrf.mxu0 }
0x1150   :  { %v3060_v46 = vpop.f32.mrf.mxu0 }
0x1151   :  { %v3061_v11 = vadd.f32 %v3060_v46, %v5925_v57 }
0x1152   :  { %v4810_v24 = vpop.f32.mrf.mxu0 }
0x1153   :  { %v3074_v27 = vsel %vm40_vm0, %v3061_v11, -inf }
0x1154   :  { %3075 = vmax.xlane.f32.xlu0 %v3074_v27  ;;  %v3065_v55 = vpop.f32.mrf.mxu0 }
0x1155   :  { %v3066_v17 = vadd.f32 %v3065_v55, %v5931_v62 }
0x1156   :  { %v4813_v26 = vpop.f32.mrf.mxu0 }
0x1157   :  { %v3077_v21 = vsel %vm40_vm0, %v3066_v17, -inf }
0x1158   :  { %3078 = vmax.xlane.f32.xlu1 %v3077_v21  ;;  %v3070_v30 = vpop.f32.mrf.mxu0 }
0x1159   :  { %v3071_v14 = vadd.f32 %v3070_v30, %v5938_v1 }
0x115a   :  { %v4816_v28 = vpop.f32.mrf.mxu0 }
0x115b   :  { %v3080_v31 = vsel %vm40_vm0, %v3071_v14, -inf  ;;  %v4202_v28 = vld [vmem:[%s6423_s5 + $0xc2] ss:$0 sm:$0xff] }
0x115c   :  { %3081 = vmax.xlane.f32.xlu0 %v3080_v31 }
0x1169   :  { %3113 = vrot.lane.b32.xlu1 %v5878_v29, %s5116_s2 }
0x11dd   :  { %v3076_v57 = vpop.xlane.xlu0 %3075 }
0x11de   :  { %v3083_v9 = vsub.f32 %v3061_v11, %v3076_v57 }
0x11e0   :  { %v3086_v25 = vmul.f32 1.442695, %v3083_v9 }
0x11e1   :  { %v3079_v59 = vpop.xlane.xlu1 %3078 }
0x11e2   :  { %5062 = vpow2.f32 %v3086_v25  ;;  %v3084_v62 = vsub.f32 %v3066_v17, %v3079_v59 }
0x11e4   :  { %v3088_v32 = vmul.f32 1.442695, %v3084_v62 }
0x11e5   :  { %v3114_v19 = vpop.permute.xlu1 %3113  ;;  %v3082_v35 = vpop.xlane.xlu0 %3081 }
0x11e6   :  { %5064 = vpow2.f32 %v3088_v32  ;;  %v3085_v15 = vsub.f32 %v3071_v14, %v3082_v35  ;;  %4818 = vmatpush3.msra.mxu1 %v3114_v19 }
0x11e7   :  { %4819 = vmatprep.subr.mxu1 %v5108_v2 }
0x11e8   :  { %v3090_v1 = vmul.f32 1.442695, %v3085_v15 }
0x11ea   :  { %5066 = vpow2.f32 %v3090_v1 }
0x11ef   :  { %v5063_v52 = vpop.eup %5062 }
0x11f0   :  { %v3092_v40 = vsel %vm40_vm0, %v5063_v52, 0.0 }
0x11f1   :  { %3093 = vadd.xlane.f32.xlu0 %v3092_v40 }
0x11f3   :  { %v5065_v29 = vpop.eup %5064 }
0x11f4   :  { %v3095_v63 = vsel %vm40_vm0, %v5065_v29, 0.0 }
0x11f5   :  { %3096 = vadd.xlane.f32.xlu1 %v3095_v63 }
0x11f7   :  { %v5067_v43 = vpop.eup %5066 }
0x11f8   :  { %v3098_v4 = vsel %vm40_vm0, %v5067_v43, 0.0 }
0x11f9   :  { %3099 = vadd.xlane.f32.xlu0 %v3098_v4 }
0x1206   :  { %3109 = vrot.lane.b32.xlu1 %v5888_v39, %s5116_s2 }
0x120a   :  { %3107 = vrot.lane.b32.xlu1 %v5896_v50, %s5116_s2 }
0x120e   :  { %3223 = vrot.lane.b32.xlu1 %v2952_v8, %s5118_s28 }
0x120f   :  { %3111 = vrot.lane.b32.xlu0 %v5883_v48, %s5116_s2 }
0x1212   :  { %3213 = vrot.lane.b32.xlu1 %v6067_v3, %s5117_s23 }
0x1213   :  { %3211 = vrot.lane.b32.xlu0 %v6065_v41, %s5117_s23 }
0x1217   :  { %3225 = vrot.lane.b32.xlu0 %v2957_v45, %s5118_s28 }
0x127a   :  { %v3094_v61 = vpop.xlane.xlu0 %3093 }
0x127b   :  { %5068 = vrcp.f32 %v3094_v61 }
0x127e   :  { %v3097_v53 = vpop.xlane.xlu1 %3096 }
0x127f   :  { %5070 = vrcp.f32 %v3097_v53  ;;  %v3418_v53 = vld [vmem:[%s6423_s5 + $0x78] sm:$0xff] }
0x1280   :  { %4852 = vmatpush3.msra.mxu0 %v3418_v53 }
0x1281   :  { %4853 = vmatprep.subr.mxu0 %v5108_v2 }
0x1282   :  { %v3100_v39 = vpop.xlane.xlu0 %3099  ;;  %v3110_v50 = vpop.permute.xlu1 %3109 }
0x1283   :  { %5072 = vrcp.f32 %v3100_v39  ;;  %v3416_v39 = vld [vmem:[%s6423_s5 + $0x68] sm:$0xff] }
0x1286   :  { %v3112_v47 = vpop.permute.xlu0 %3111  ;;  %v3108_v3 = vpop.permute.xlu1 %3107 }
0x1287   :  { %4820 = vmatpush3.msra.mxu1 %v3112_v47  ;;  %v3523_v47 = vld [vmem:[%s6423_s5 + $0xb8] sm:$0xff] }
0x1288   :  { %v5069_v10 = vpop.eup %5068  ;;  %4821 = vmatprep.subr.mxu1 %v5108_v2 }
0x1289   :  { %v3104_v48 = vmul.f32 %v5069_v10, %v5063_v52  ;;  %4822 = vmatpush3.msra.mxu1 %v3110_v50  ;;  %v3415_v50 = vld [vmem:[%s6423_s5 + $0x60] sm:$0xff]  ;;  %v3522_v10 = vld [vmem:[%s6423_s5 + $0xb0] sm:$0xff] }
0x128a   :  { %4823 = vmatprep.subr.mxu1 %v5108_v2  ;;  %v3212_v5 = vpop.permute.xlu0 %3211  ;;  %v3224_v45 = vpop.permute.xlu1 %3223 }
0x128b   :  { %4824 = vmatpush3.msra.mxu1 %v3108_v3  ;;  %v3244_v20 = vsel %vm450_vm3, %v5998_v60, %v3212_v5  ;;  %v3520_v3 = vld [vmem:[%s6423_s5 + $0xa0] sm:$0xff] }
0x128c   :  { %v5071_v41 = vpop.eup %5070  ;;  %4826 = vmatmul.mubr.msk.f32.vlgmr.msra.gmra.mxu1 %vm40_vm0, %v3104_v48  ;;  %4834 = vmatprep.subr.mxu1 %v5108_v2  ;;  %v3247_v11 = vsel %vm1549_vm5, %v3244_v20, %v3224_v45  ;;  %v3521_v48 = vld [vmem:[%s6423_s5 + $0xa8] sm:$0xff] }
0x128d   :  { %4828 = vmatprep.mubr.msk.f32.mxu1 %vm5109_vm1, %v5108_v2  ;;  %v3105_v58 = vmul.f32 %v5071_v41, %v5065_v29  ;;  %4835 = vmatpush3.msra.mxu1 %v3256_v33  ;;  %v3519_v41 = vld [vmem:[%s6423_s5 + $0x98] sm:$0xff] }
0x128e   :  { %4836 = vmatprep.subr.mxu1 %v5108_v2  ;;  %v3226_v49 = vpop.permute.xlu0 %3225  ;;  %v3214_v46 = vpop.permute.xlu1 %3213 }
0x128f   :  { %4837 = vmatpush3.msra.mxu1 %v3255_v51  ;;  %v3245_v24 = vsel %vm450_vm3, %v6000_v22, %v3214_v46 }
0x1290   :  { %v5073_v54 = vpop.eup %5072  ;;  %4829 = vmatmul.mubr.msk.f32.gmra.mxu1 %vm40_vm0, %v3105_v58  ;;  %4838 = vmatprep.subr.mxu1 %v5108_v2 }
0x1291   :  { %4831 = vmatprep.mubr.msk.f32.mxu1 %vm5109_vm1, %v5108_v2  ;;  %v3106_v12 = vmul.f32 %v5073_v54, %v5067_v43  ;;  %4839 = vmatpush3.msra.mxu1 %v3254_v56 }
0x1292   :  { %4840 = vmatprep.subr.mxu1 %v5108_v2 }
0x1293   :  { %4841 = vmatpush3.msra.mxu1 %v3253_v0 }
0x1294   :  { %4832 = vmatmul.mubr.msk.f32.gmra.mxu1 %vm40_vm0, %v3106_v12  ;;  %4868 = vmatprep.subr.mxu1 %v5108_v2 }
0x1295   :  { %4842 = vmatprep.mubr.msk.f32.mxu1 %vm5109_vm1, %v5108_v2 }
0x134c   :  { %v3194_v37 = vpop.f32.mrf.mxu1 }
0x134d   :  { %3235 = vrot.lane.b32.xlu0 %v3194_v37, %s5119_s0 }
0x134e   :  { %v4827_v36 = vpop.f32.mrf.mxu1 }
0x1350   :  { %v3199_v23 = vpop.f32.mrf.mxu1 }
0x1351   :  { %3215 = vrot.lane.b32.xlu0 %v6069_v16, %s5117_s23  ;;  %3237 = vrot.lane.b32.xlu1 %v3199_v23, %s5119_s0 }
0x1352   :  { %v4830_v7 = vpop.f32.mrf.mxu1 }
0x1354   :  { %v3204_v18 = vpop.f32.mrf.mxu1 }
0x1355   :  { %3227 = vrot.lane.b32.xlu1 %v6132_v13, %s5118_s28  ;;  %3239 = vrot.lane.b32.xlu0 %v3204_v18, %s5119_s0  ;;  %v3248_v13 = vsel %vm1549_vm5, %v3245_v24, %v3226_v49 }
0x1356   :  { %v4833_v8 = vpop.f32.mrf.mxu1 }
0x13bf   :  { %v3236_v16 = vpop.permute.xlu0 %3235 }
0x13c0   :  { %v3250_v27 = vsel %vm557_vm4, %v3247_v11, %v3236_v16 }
0x13c1   :  { %4843 = vmatmul.mubr.msk.f32.vlgmr.msra.gmra.mxu1 %vm40_vm0, %v3250_v27 }
0x13c2   :  { %4845 = vmatprep.mubr.msk.f32.mxu1 %vm5109_vm1, %v5108_v2  ;;  %4869 = vmatpush3.msra.mxu1 %v3523_v47 }
0x13c3   :  { %v3216_v55 = vpop.permute.xlu0 %3215  ;;  %v3238_v17 = vpop.permute.xlu1 %3237  ;;  %4870 = vmatprep.subr.mxu1 %v5108_v2 }
0x13c4   :  { %v3251_v60 = vsel %vm557_vm4, %v3248_v13, %v3238_v17  ;;  %v3246_v22 = vsel %vm450_vm3, %v6002_v34, %v3216_v55  ;;  %4871 = vmatpush3.msra.mxu1 %v3522_v10  ;;  %v4206_v55 = vld [vmem:[%s6423_s5 + $0xc5] ss:$0 sm:$0xff] }
0x13c5   :  { %4846 = vmatmul.mubr.msk.f32.gmra.mxu1 %vm40_vm0, %v3251_v60  ;;  %4872 = vmatprep.subr.mxu1 %v5108_v2  ;;  %v4207_v60 = vld [vmem:[%s6423_s5 + $0xc6] ss:$0 sm:$0xff] }
0x13c6   :  { %4848 = vmatprep.mubr.msk.f32.mxu1 %vm5109_vm1, %v5108_v2  ;;  %4873 = vmatpush3.msra.mxu1 %v3521_v48 }
0x13c7   :  { %v3228_v26 = vpop.permute.xlu1 %3227  ;;  %v3240_v21 = vpop.permute.xlu0 %3239  ;;  %4874 = vmatprep.subr.mxu1 %v5108_v2 }
0x13c8   :  { %v3249_v30 = vsel %vm1549_vm5, %v3246_v22, %v3228_v26  ;;  %4875 = vmatpush3.msra.mxu1 %v3520_v3 }
0x13c9   :  { %v3252_v14 = vsel %vm557_vm4, %v3249_v30, %v3240_v21  ;;  %4876 = vmatprep.subr.mxu1 %v5108_v2 }
0x13ca   :  { %4849 = vmatmul.mubr.msk.f32.gmra.mxu1 %vm40_vm0, %v3252_v14 }
0x13cb   :  { %4884 = vmatprep.mubr.msk.f32.mxu1 %vm5109_vm1, %v5108_v2  ;;  %4877 = vmatpush3.msra.mxu1 %v3519_v41 }
0x13cc   :  { %4878 = vmatprep.subr.mxu1 %v5108_v2 }
0x1481   :  { %v3337_v31 = vpop.f32.mrf.mxu1 }
0x1482   :  { %v3338_v57 = vadd.f32 %v4202_v28, %v3337_v31 }
0x1483   :  { %v4844_v9 = vpop.f32.mrf.mxu1 }
0x1484   :  { %v6218_v34 = vadd.f32 %v3338_v57, %v5271_v38 }
0x1485   :  { %v3342_v25 = vpop.f32.mrf.mxu1 }
0x1486   :  { %v3343_v59 = vadd.f32 %v4202_v28, %v3342_v25  ;;  %v3356_v62 = vsel %vm40_vm0, %v6218_v34, 0.0  ;;  %v3368_v32 = vmul.f32 %v6218_v34, %v6218_v34 }
0x1487   :  { %3357 = vadd.xlane.f32.xlu1 %v3356_v62  ;;  %v4847_v19 = vpop.f32.mrf.mxu1  ;;  %v3518_v62 = vld [vmem:[%s6423_s5 + $0x90] sm:$0xff] }
0x1488   :  { %v6225_v35 = vadd.f32 %v3343_v59, %v5282_v42  ;;  %v3371_v15 = vsel %vm40_vm0, %v3368_v32, 0.0  ;;  %4879 = vmatpush3.msra.mxu1 %v3518_v62  ;;  %v3517_v32 = vld [vmem:[%s6423_s5 + $0x88] sm:$0xff]  ;;  %v3516_v19 = vld [vmem:[%s6423_s5 + $0x80] sm:$0xff] }
0x1489   :  { %3372 = vadd.xlane.f32.xlu0 %v3371_v15  ;;  %4880 = vmatprep.subr.mxu1 %v5108_v2 }
0x148a   :  { %v3347_v1 = vpop.f32.mrf.mxu1  ;;  %v3369_v38 = vmul.f32 %v6225_v35, %v6225_v35  ;;  %v3359_v63 = vsel %vm40_vm0, %v6225_v35, 0.0  ;;  %4881 = vmatpush3.msra.mxu1 %v3517_v32 }
0x148b   :  { %v3348_v52 = vadd.f32 %v4202_v28, %v3347_v1  ;;  %4882 = vmatprep.subr.mxu1 %v5108_v2 }
0x148c   :  { %v4850_v40 = vpop.f32.mrf.mxu1  ;;  %v3374_v29 = vsel %vm40_vm0, %v3369_v38, 0.0  ;;  %4883 = vmatpush3.msra.mxu1 %v3516_v19 }
0x148d   :  { %v6234_v43 = vadd.f32 %v3348_v52, %v5288_v44  ;;  %3375 = vadd.xlane.f32.xlu1 %v3374_v29  ;;  %3360 = vadd.xlane.f32.xlu0 %v3359_v63  ;;  %v3417_v44 = vld [vmem:[%s6423_s5 + $0x70] sm:$0xff] }
0x148e   :  { %4854 = vmatpush3.msra.mxu0 %v3417_v44  ;;  %4915 = vmatprep.subr.mxu1 %v5108_v2 }
0x148f   :  { %v3362_v42 = vsel %vm40_vm0, %v6234_v43, 0.0  ;;  %v3370_v4 = vmul.f32 %v6234_v43, %v6234_v43  ;;  %4855 = vmatprep.subr.mxu0 %v5108_v2 }
0x1490   :  { %4856 = vmatpush3.msra.mxu0 %v3416_v39 }
0x1491   :  { %3363 = vadd.xlane.f32.xlu0 %v3362_v42  ;;  %v3377_v61 = vsel %vm40_vm0, %v3370_v4, 0.0  ;;  %4857 = vmatprep.subr.mxu0 %v5108_v2 }
0x1492   :  { %3378 = vadd.xlane.f32.xlu1 %v3377_v61  ;;  %4858 = vmatpush3.msra.mxu0 %v3415_v50  ;;  %v4212_v50 = vld [vmem:[%s6423_s5 + $0xc4] ss:$0 sm:$0xff] }
0x1493   :  { %4893 = vmatprep.subr.mxu0 %v5108_v2 }
0x1510   :  { %v3358_v58 = vpop.xlane.xlu1 %3357 }
0x1511   :  { %v3365_v54 = vmul.f32 0.03125, %v3358_v58 }
0x1512   :  { %v3373_v12 = vpop.xlane.xlu0 %3372 }
0x1513   :  { %v3383_v33 = vmul.f32 %v3365_v54, %v3365_v54  ;;  %v3380_v51 = vmul.f32 0.03125, %v3373_v12  ;;  %v3389_v27 = vsub.f32 %v6218_v34, %v3365_v54 }
0x1515   :  { %v3386_v56 = vsub.f32 %v3380_v51, %v3383_v33 }
0x1516   :  { %v3376_v0 = vpop.xlane.xlu1 %3375  ;;  %v3361_v37 = vpop.xlane.xlu0 %3360 }
0x1517   :  { %v3392_v36 = vadd.f32 1e-05, %v3386_v56  ;;  %v3366_v23 = vmul.f32 0.03125, %v3361_v37  ;;  %v3381_v7 = vmul.f32 0.03125, %v3376_v0 }
0x1519   :  { %5074 = vrsqrt.f32 %v3392_v36  ;;  %v3384_v18 = vmul.f32 %v3366_v23, %v3366_v23  ;;  %v3390_v21 = vsub.f32 %v6225_v35, %v3366_v23  ;;  %v4208_v35 = vld [vmem:[%s6423_s5 + $0xc3] ss:$0 sm:$0xff] }
0x151a   :  { %v3364_v8 = vpop.xlane.xlu0 %3363 }
0x151b   :  { %v3387_v5 = vsub.f32 %v3381_v7, %v3384_v18  ;;  %v3367_v45 = vmul.f32 0.03125, %v3364_v8  ;;  %v3379_v49 = vpop.xlane.xlu1 %3378 }
0x151c   :  { %v3382_v20 = vmul.f32 0.03125, %v3379_v49  ;;  %v3738_v49 = vld [vmem:[%s6424_s6 + $0x80] sm:$0xff] }
0x151d   :  { %v3393_v46 = vadd.f32 1e-05, %v3387_v5  ;;  %v3385_v11 = vmul.f32 %v3367_v45, %v3367_v45  ;;  %v3391_v31 = vsub.f32 %v6234_v43, %v3367_v45  ;;  %v3739_v45 = vld [vmem:[%s6424_s6 + $0x88] sm:$0xff] }
0x151f   :  { %5076 = vrsqrt.f32 %v3393_v46  ;;  %v3388_v16 = vsub.f32 %v3382_v20, %v3385_v11  ;;  %v3737_v20 = vld [vmem:[%s6424_s6 + $0x78] sm:$0xff]  ;;  %v3736_v46 = vld [vmem:[%s6424_s6 + $0x70] sm:$0xff] }
0x1521   :  { %v3394_v24 = vadd.f32 1e-05, %v3388_v16 }
0x1523   :  { %5078 = vrsqrt.f32 %v3394_v24 }
0x1526   :  { %v5075_v13 = vpop.eup %5074 }
0x1527   :  { %v3398_v17 = vmul.f32 %v5075_v13, %v3389_v27 }
0x1529   :  { %v3405_v22 = vmul.f32 %v4206_v55, %v3398_v17 }
0x152b   :  { %v3412_v26 = vadd.f32 %v4207_v60, %v3405_v22 }
0x152c   :  { %v5077_v30 = vpop.eup %5076 }
0x152d   :  { %v3399_v14 = vmul.f32 %v5077_v30, %v3390_v21  ;;  %4860 = vmatmul.mubr.msk.f32.vlgmr.msra.gmra.mxu0 %vm40_vm0, %v3412_v26 }
0x152e   :  { %4862 = vmatprep.mubr.msk.f32.mxu0 %vm5109_vm1, %v5108_v2  ;;  %4894 = vmatpush3.msra.mxu0 %v3739_v45 }
0x152f   :  { %v3406_v28 = vmul.f32 %v4206_v55, %v3399_v14  ;;  %4895 = vmatprep.subr.mxu0 %v5108_v2 }
0x1530   :  { %v5079_v57 = vpop.eup %5078  ;;  %4896 = vmatpush3.msra.mxu0 %v3738_v49 }
0x1531   :  { %v3413_v9 = vadd.f32 %v4207_v60, %v3406_v28  ;;  %v3400_v34 = vmul.f32 %v5079_v57, %v3391_v31  ;;  %4897 = vmatprep.subr.mxu0 %v5108_v2 }
0x1532   :  { %4898 = vmatpush3.msra.mxu0 %v3737_v20 }
0x1533   :  { %4863 = vmatmul.mubr.msk.f32.gmra.mxu0 %vm40_vm0, %v3413_v9  ;;  %v3407_v25 = vmul.f32 %v4206_v55, %v3400_v34  ;;  %4899 = vmatprep.subr.mxu0 %v5108_v2 }
0x1534   :  { %4865 = vmatprep.mubr.msk.f32.mxu0 %vm5109_vm1, %v5108_v2  ;;  %4900 = vmatpush3.msra.mxu0 %v3736_v46  ;;  %v3735_v46 = vld [vmem:[%s6424_s6 + $0x68] sm:$0xff] }
0x1535   :  { %v3414_v59 = vadd.f32 %v4207_v60, %v3407_v25  ;;  %4904 = vmatprep.subr.mxu0 %v5108_v2 }
0x1537   :  { %4866 = vmatmul.mubr.msk.f32.gmra.mxu0 %vm40_vm0, %v3414_v59 }
0x1538   :  { %4901 = vmatprep.mubr.msk.f32.mxu0 %vm5109_vm1, %v5108_v2 }
0x15ed   :  { %v3499_v15 = vpop.f32.mrf.mxu0 }
0x15ee   :  { %v3500_v1 = vadd.f32 %v4208_v35, %v3499_v15 }
0x15ef   :  { %v4861_v38 = vpop.f32.mrf.mxu0 }
0x15f0   :  { %v3513_v52 = vmax.f32 %v3500_v1, 0.0 }
0x15f2   :  { %4885 = vmatmul.mubr.msk.f32.vlgmr.msra.gmra.mxu1 %vm1869_vm6, %v3513_v52 }
0x15f3   :  { %v3504_v40 = vpop.f32.mrf.mxu0  ;;  %4887 = vmatprep.mubr.msk.f32.mxu1 %vm5109_vm1, %v5108_v2 }
0x15f4   :  { %v3505_v29 = vadd.f32 %v4208_v35, %v3504_v40  ;;  %v4217_v40 = vld [vmem:[%s6423_s5 + $0xc8] ss:$0 sm:$0xff] }
0x15f5   :  { %v4864_v63 = vpop.f32.mrf.mxu0 }
0x15f6   :  { %v3514_v43 = vmax.f32 %v3505_v29, 0.0 }
0x15f7   :  { %v3509_v42 = vpop.f32.mrf.mxu0 }
0x15f8   :  { %v3510_v4 = vadd.f32 %v4208_v35, %v3509_v42  ;;  %4888 = vmatmul.mubr.msk.f32.gmra.mxu1 %vm1869_vm6, %v3514_v43  ;;  %v4216_v35 = vld [vmem:[%s6423_s5 + $0xc7] ss:$0 sm:$0xff] }
0x15f9   :  { %v4867_v61 = vpop.f32.mrf.mxu0  ;;  %4890 = vmatprep.mubr.msk.f32.mxu1 %vm5109_vm1, %v5108_v2 }
0x15fa   :  { %v3515_v53 = vmax.f32 %v3510_v4, 0.0 }
0x15fc   :  { %4891 = vmatmul.mubr.msk.f32.gmra.mxu1 %vm1869_vm6, %v3515_v53 }
0x15fd   :  { %4923 = vmatprep.mubr.msk.f32.mxu1 %vm5109_vm1, %v5108_v2 }
0x16b2   :  { %v3604_v44 = vpop.f32.mrf.mxu1 }
0x16b3   :  { %v3605_v58 = vadd.f32 %v4212_v50, %v3604_v44 }
0x16b4   :  { %v4886_v39 = vpop.f32.mrf.mxu1 }
0x16b5   :  { %v6323_v0 = vadd.f32 %v3605_v58, %v3412_v26 }
0x16b7   :  { %v3623_v7 = vsel %vm40_vm0, %v6323_v0, 0.0  ;;  %v3635_v8 = vmul.f32 %v6323_v0, %v6323_v0 }
0x16b8   :  { %v3609_v47 = vpop.f32.mrf.mxu1 }
0x16b9   :  { %v3610_v10 = vadd.f32 %v4212_v50, %v3609_v47  ;;  %v3638_v5 = vsel %vm40_vm0, %v3635_v8, 0.0 }
0x16ba   :  { %v4889_v48 = vpop.f32.mrf.mxu1 }
0x16bb   :  { %v3619_v3 = vadd.f32 %v3610_v10, %v3413_v9 }
0x16bc   :  { %v3614_v41 = vpop.f32.mrf.mxu1 }
0x16bd   :  { %v3615_v54 = vadd.f32 %v4212_v50, %v3614_v41  ;;  %v3626_v12 = vsel %vm40_vm0, %v3619_v3, 0.0  ;;  %v3636_v33 = vmul.f32 %v3619_v3, %v3619_v3 }
0x16be   :  { %3627 = vadd.xlane.f32.xlu0 %v3626_v12  ;;  %v4892_v51 = vpop.f32.mrf.mxu1 }
0x16bf   :  { %v3620_v56 = vadd.f32 %v3615_v54, %v3414_v59  ;;  %v3641_v37 = vsel %vm40_vm0, %v3636_v33, 0.0 }
0x16c1   :  { %v3629_v36 = vsel %vm40_vm0, %v3620_v56, 0.0  ;;  %v3637_v23 = vmul.f32 %v3620_v56, %v3620_v56 }
0x16c2   :  { %3642 = vadd.xlane.f32.xlu0 %v3641_v37  ;;  %3630 = vadd.xlane.f32.xlu1 %v3629_v36 }
0x16c3   :  { %v3644_v18 = vsel %vm40_vm0, %v3637_v23, 0.0 }
0x16c6   :  { %3624 = vadd.xlane.f32.xlu0 %v3623_v7  ;;  %3645 = vadd.xlane.f32.xlu1 %v3644_v18 }
0x16ca   :  { %3639 = vadd.xlane.f32.xlu1 %v3638_v5 }
0x1747   :  { %v3628_v11 = vpop.xlane.xlu0 %3627 }
0x1748   :  { %v3633_v16 = vmul.f32 0.03125, %v3628_v11  ;;  %v3734_v11 = vld [vmem:[%s6424_s6 + $0x60] sm:$0xff] }
0x174a   :  { %v3651_v13 = vmul.f32 %v3633_v16, %v3633_v16  ;;  %v3657_v32 = vsub.f32 %v3619_v3, %v3633_v16  ;;  %v3733_v16 = vld [vmem:[%s6424_s6 + $0x58] sm:$0xff] }
0x174b   :  { %v3643_v24 = vpop.xlane.xlu0 %3642  ;;  %v3631_v27 = vpop.xlane.xlu1 %3630 }
0x174c   :  { %v3648_v55 = vmul.f32 0.03125, %v3643_v24  ;;  %v3634_v17 = vmul.f32 0.03125, %v3631_v27  ;;  %v3732_v24 = vld [vmem:[%s6424_s6 + $0x50] sm:$0xff]  ;;  %v3702_v27 = vmul.f32 0.0625, %v5873_v6  ;;  %v3894_v6 = vld [vmem:[%s6424_s6 + $0x98] sm:$0xff] }
0x174e   :  { %v3654_v60 = vsub.f32 %v3648_v55, %v3651_v13  ;;  %v3652_v30 = vmul.f32 %v3634_v17, %v3634_v17  ;;  %v3658_v38 = vsub.f32 %v3620_v56, %v3634_v17  ;;  %v3896_v13 = vld [vmem:[%s6424_s6 + $0xa8] sm:$0xff]  ;;  %v3895_v55 = vld [vmem:[%s6424_s6 + $0xa0] sm:$0xff]  ;;  %v3893_v17 = vld [vmem:[%s6424_s6 + $0x90] sm:$0xff] }
0x174f   :  { %v3625_v22 = vpop.xlane.xlu0 %3624  ;;  %v3646_v26 = vpop.xlane.xlu1 %3645  ;;  %4916 = vmatpush3.msra.mxu1 %v3896_v13 }
0x1750   :  { %v3660_v21 = vadd.f32 1e-05, %v3654_v60  ;;  %v3632_v14 = vmul.f32 0.03125, %v3625_v22  ;;  %v3649_v28 = vmul.f32 0.03125, %v3646_v26  ;;  %4917 = vmatprep.subr.mxu1 %v5108_v2 }
0x1751   :  { %4918 = vmatpush3.msra.mxu1 %v3895_v55 }
0x1752   :  { %5080 = vrsqrt.f32 %v3660_v21  ;;  %v3655_v31 = vsub.f32 %v3649_v28, %v3652_v30  ;;  %v3650_v9 = vmul.f32 %v3632_v14, %v3632_v14  ;;  %v3656_v43 = vsub.f32 %v6323_v0, %v3632_v14  ;;  %4919 = vmatprep.subr.mxu1 %v5108_v2  ;;  %v4220_v21 = vld [vmem:[%s6424_s6 + $0xc2] ss:$0 sm:$0xff] }
0x1753   :  { %v3640_v57 = vpop.xlane.xlu1 %3639  ;;  %4920 = vmatpush3.msra.mxu1 %v3894_v6 }
0x1754   :  { %v3661_v34 = vadd.f32 1e-05, %v3655_v31  ;;  %v3647_v25 = vmul.f32 0.03125, %v3640_v57  ;;  %4921 = vmatprep.subr.mxu1 %v5108_v2  ;;  %v3977_v57 = vld [vmem:[%s6424_s6 + $0xb8] sm:$0xff] }
0x1755   :  { %4922 = vmatpush3.msra.mxu1 %v3893_v17 }
0x1756   :  { %5082 = vrsqrt.f32 %v3661_v34  ;;  %v3653_v59 = vsub.f32 %v3647_v25, %v3650_v9  ;;  %v3976_v9 = vld [vmem:[%s6424_s6 + $0xb0] sm:$0xff]  ;;  %v4221_v34 = vld [vmem:[%s6424_s6 + $0xc3] ss:$0 sm:$0xff] }
0x1758   :  { %v3659_v62 = vadd.f32 1e-05, %v3653_v59 }
0x175a   :  { %5084 = vrsqrt.f32 %v3659_v62 }
0x175f   :  { %v5081_v19 = vpop.eup %5080 }
0x1760   :  { %v3666_v15 = vmul.f32 %v5081_v19, %v3657_v32  ;;  %v4223_v19 = vld [vmem:[%s6424_s6 + $0xc4] ss:$0 sm:$0xff] }
0x1762   :  { %v3673_v1 = vmul.f32 %v4216_v35, %v3666_v15 }
0x1763   :  { %v5083_v52 = vpop.eup %5082 }
0x1764   :  { %v3667_v29 = vmul.f32 %v5083_v52, %v3658_v38  ;;  %v3680_v63 = vadd.f32 %v4217_v40, %v3673_v1 }
0x1766   :  { %v3674_v42 = vmul.f32 %v4216_v35, %v3667_v29  ;;  %v3716_v44 = vrot.slane %v3680_v63, 4  ;;  %v3705_v41 = vsel %vm3704_vm9, %v3680_v63, 0.0 }
0x1767   :  { %v5085_v4 = vpop.eup %5084 }
0x1768   :  { %v3681_v61 = vadd.f32 %v4217_v40, %v3674_v42  ;;  %v3665_v53 = vmul.f32 %v5085_v4, %v3656_v43 }
0x176a   :  { %v3717_v39 = vrot.slane %v3681_v61, 4  ;;  %v3672_v50 = vmul.f32 %v4216_v35, %v3665_v53 }
0x176c   :  { %v3718_v47 = vsel %vm3715_vm8, %v3716_v44, %v3717_v39  ;;  %v3722_v10 = vsel %vm3704_vm9, %v3717_v39, 0.0  ;;  %v3679_v48 = vadd.f32 %v4217_v40, %v3672_v50 }
0x176d   :  { %v3721_v3 = vsel %vm40_vm0, %v3718_v47, 0.0 }
0x176e   :  { %v3723_v58 = vadd.f32 %v3722_v10, %v3721_v3  ;;  %v3703_v54 = vsel %vm40_vm0, %v3679_v48, 0.0 }
0x176f   :  { %v3706_v12 = vadd.f32 %v3705_v41, %v3703_v54 }
0x1770   :  { %v3724_v33 = vrot.slane %v3723_v58, 4 }
0x1771   :  { %v3707_v51 = vrot.slane %v3706_v12, 4 }
0x1772   :  { %v3725_v56 = vadd.f32 %v3724_v33, %v3723_v58 }
0x1773   :  { %v3708_v0 = vadd.f32 %v3707_v51, %v3706_v12 }
0x1774   :  { %v3726_v37 = vrot.slane %v3725_v56, 2 }
0x1775   :  { %v3709_v36 = vrot.slane %v3708_v0, 2 }
0x1776   :  { %v3727_v23 = vadd.f32 %v3726_v37, %v3725_v56 }
0x1777   :  { %v3710_v7 = vadd.f32 %v3709_v36, %v3708_v0 }
0x1778   :  { %v3728_v18 = vrot.slane %v3727_v23, 1 }
0x1779   :  { %v3711_v8 = vrot.slane %v3710_v7, 1 }
0x177a   :  { %v3729_v5 = vadd.f32 %v3728_v18, %v3727_v23 }
0x177b   :  { %v3712_v45 = vadd.f32 %v3711_v8, %v3710_v7 }
0x177d   :  { %v3730_v49 = vsel %vm3700_vm7, %v3712_v45, %v3729_v5 }
0x177e   :  { %v3731_v20 = vmul.f32 0.083333336, %v3730_v49 }
0x1780   :  { %4902 = vmatmul.mubr.msk.f32.vlgmr.msra.gmra.mxu0 %vm40_vm0, %v3731_v20 }
0x1781   :  { %4905 = vmatpush3.msra.mxu0 %v3735_v46  ;;  %4912 = vmatprep.mubr.msk.f32.mxu0 %vm5109_vm1, %v5108_v2 }
0x1782   :  { %4906 = vmatprep.subr.mxu0 %v5108_v2 }
0x1783   :  { %4907 = vmatpush3.msra.mxu0 %v3734_v11 }
0x1784   :  { %4908 = vmatprep.subr.mxu0 %v5108_v2 }
0x1785   :  { %4909 = vmatpush3.msra.mxu0 %v3733_v16 }
0x1786   :  { %4910 = vmatprep.subr.mxu0 %v5108_v2 }
0x1787   :  { %4911 = vmatpush3.msra.mxu0 %v3732_v24 }
0x1788   :  { %4913 = vmatmul.mubr.msk.f32.vlgmr.msra.gmra.mxu0 %vm40_vm0, %v3702_v27  ;;  %4926 = vmatprep.subr.mxu0 %v5108_v2 }
0x1789   :  { %4930 = vmatprep.mubr.msk.f32.mxu0 %vm5109_vm1, %v5108_v2  ;;  %4927 = vmatpush3.msra.mxu0 %v3977_v57 }
0x178a   :  { %4928 = vmatprep.subr.mxu0 %v5108_v2 }
0x178b   :  { %4929 = vmatpush3.msra.mxu0 %v3976_v9 }
0x1840   :  { %v3809_v60 = vpop.f32.mrf.mxu0 }
0x1842   :  { %v4903_v22 = vpop.f32.mrf.mxu0 }
0x1848   :  { %v3882_v26 = vpop.f32.mrf.mxu0 }
0x1849   :  { %v3883_v30 = vadd.f32 %v3882_v26, %v3809_v60 }
0x184a   :  { %v4914_v14 = vpop.f32.mrf.mxu0 }
0x184b   :  { %v3891_v28 = vadd.f32 %v4220_v21, %v3883_v30 }
0x184d   :  { %v3892_v31 = vmax.f32 %v3891_v28, 0.0 }
0x184f   :  { %4924 = vmatmul.mubr.msk.f32.vlgmr.msra.gmra.mxu1 %vm40_vm0, %v3892_v31 }
0x190f   :  { %v3971_v25 = vpop.f32.mrf.mxu1 }
0x1910   :  { %v3972_v59 = vadd.f32 %v4221_v34, %v3971_v25 }
0x1911   :  { %v4925_v62 = vpop.f32.mrf.mxu1 }
0x1912   :  { %v3975_v32 = vmax.f32 %v3972_v59, 0.0 }
0x1914   :  { %4931 = vmatmul.mubr.msk.f32.vlgmr.msra.gmra.mxu0 %vm1549_vm5, %v3975_v32 }
0x19d4   :  { %v4052_v2 = vpop.f32.mrf.mxu0 }
0x19d5   :  { %v4053_v35 = vadd.f32 %v4223_v19, %v4052_v2 }
0x19d6   :  { %v4932_v15 = vpop.f32.mrf.mxu0 }
0x19d7   :  { %4057 = vst.msk [vmem:[#allocation2] sm:$0x3] %vm4056_vm10, %v4053_v35 }
0x19d8   :  { %5097 = shalt.err (!%p5094_p4)
}
0x19d9   :  { %4067 = dma.vmem_to_hbm [thread:$0]  %s4065_s27, 32, %s6425_s7, [#allocation3]  }
0x19da   :  { %5106 = dma.done.wait [#allocation3], 32  }
0x19db   :  { %5107 = vsyncadd [#allocation3], 4294967264 }
0x19dc   :  { %4071 = vsyncpa [#allocation3], 1 }

</bundles_post_ra>
